<compile_context>
chip_gen: v7x
topology: tpu7x:2x2x1
jax: 0.10.0
libtpu: 0.0.40
codegen_flags: <defaults>
</compile_context>

<pallas_src>
import jax
import jax.numpy as jnp
from jax.experimental import pallas as pl
from jax.experimental.pallas import tpu as pltpu


# ----------------------------------------------------------------------------
# Static geometry.  Input (B, 1, 159, 71) makes the conv stack flatten to
# exactly 512 features, matching nn.Linear(512, 128):
#   (159,71) -conv1-> (79,35) -pool-> (39,35) -conv2-> (19,17) -pool-> (9,17)
#            -conv3-> ( 4, 8) -pool-> ( 2, 8)   ;  32*2*8 = 512
# ----------------------------------------------------------------------------
KH = KW = 5
STRIDE = 2
PAD = 1
CHANS = (1, 8, 16, 32)
H_IN, W_IN = 159, 71


def _conv_geometry(h, w):
    layers = []
    for i in range(3):
        cin, cout = CHANS[i], CHANS[i + 1]
        hp, wp = h + 2 * PAD, w + 2 * PAD
        hout = (hp - KH) // STRIDE + 1
        wout = (wp - KW) // STRIDE + 1
        hpool = hout // 2                      # MaxPool2d((2,1)), floor
        layers.append(dict(
            cin=cin, cout=cout, hp=hp, wp=wp, hout=hout, wout=wout,
            hpool=hpool, k=wp * cin, n=wout * cout,
            n_even=(hp + 1) // 2,              # even padded-H rows 0, 2, ...
            n_odd=hp // 2,                     # odd  padded-H rows 1, 3, ...
        ))
        h, w = hpool, wout
    return layers


GEOM = _conv_geometry(H_IN, W_IN)
assert GEOM[-1]["hpool"] * GEOM[-1]["n"] == 512
for _g in GEOM:
    assert _g["n_even"] >= _g["hout"] + 2 and _g["n_odd"] >= _g["hout"] + 1


# ----------------------------------------------------------------------------
# The fused kernel (one batch element per grid step).
# ----------------------------------------------------------------------------
def _cnn_kernel(e1_ref, o1_ref,
                w1_ref, s1_ref, t1_ref,
                w2_ref, s2_ref, t2_ref,
                w3_ref, s3_ref, t3_ref,
                fc1a_ref, fc1b_ref, b1_ref,
                fc2_ref, b2_ref, fc3_ref, b3_ref,
                out_ref,
                e2_scr, o2_scr, e3_scr, o3_scr):
    f32, bf16 = jnp.float32, jnp.bfloat16

    def conv_pool_bn_relu(e, o, w_ref, s_ref, t_ref, hout):
        # Conv output row ho reads padded rows 2*ho + kh, kh = 0..4.  With the
        # input split into even (e) / odd (o) padded rows, each H-tap is a
        # contiguous slice and a single MXU matmul against the block-banded
        # weight (W taps + channel mixing pre-folded on the host).
        y = jnp.dot(e[0:hout].astype(bf16), w_ref[0], preferred_element_type=f32)
        y += jnp.dot(o[0:hout].astype(bf16), w_ref[1], preferred_element_type=f32)
        y += jnp.dot(e[1:hout + 1].astype(bf16), w_ref[2], preferred_element_type=f32)
        y += jnp.dot(o[1:hout + 1].astype(bf16), w_ref[3], preferred_element_type=f32)
        y += jnp.dot(e[2:hout + 2].astype(bf16), w_ref[4], preferred_element_type=f32)
        # MaxPool2d((2,1)) over adjacent conv rows (pooled row hp = row 2*hp of
        # the result below), then eval-mode BatchNorm + ReLU, all in f32.
        p = jnp.maximum(y[0:hout - 1], y[1:hout])
        return jnp.maximum(p * s_ref[...] + t_ref[...], 0.0)

    def scatter_pooled(p, e_scr, o_scr, hpool, cin_next):
        # Write pooled rows (pooled[hp] == p[2*hp]) into the next conv's
        # even/odd padded-row buffers, leaving one channel group of zeros on
        # each side of the W axis (its W padding) and zero H-padding rows.
        e_scr[...] = jnp.zeros_like(e_scr)
        o_scr[...] = jnp.zeros_like(o_scr)
        c0 = cin_next
        c1 = c0 + p.shape[1]
        for m in range((hpool + 1) // 2):        # odd padded row 2m+1 <- pooled[2m]
            o_scr[m:m + 1, c0:c1] = p[4 * m:4 * m + 1]
        for m in range(1, hpool // 2 + 1):       # even padded row 2m <- pooled[2m-1]
            e_scr[m:m + 1, c0:c1] = p[4 * m - 2:4 * m - 1]

    g1, g2, g3 = GEOM

    # conv block 1: Conv(1->8) -> MaxPool(2,1) -> BN -> ReLU
    p1 = conv_pool_bn_relu(e1_ref[0], o1_ref[0], w1_ref, s1_ref, t1_ref, g1["hout"])
    scatter_pooled(p1, e2_scr, o2_scr, g1["hpool"], g2["cin"])

    # conv block 2: Conv(8->16) -> MaxPool(2,1) -> BN -> ReLU
    p2 = conv_pool_bn_relu(e2_scr[...], o2_scr[...], w2_ref, s2_ref, t2_ref, g2["hout"])
    scatter_pooled(p2, e3_scr, o3_scr, g2["hpool"], g3["cin"])

    # conv block 3: Conv(16->32) -> MaxPool(2,1) -> BN -> ReLU
    p3 = conv_pool_bn_relu(e3_scr[...], o3_scr[...], w3_ref, s3_ref, t3_ref, g3["hout"])

    # MLP head: fc1 -> ReLU -> fc2 -> ReLU -> fc3.  The flattened conv output
    # is [pooled row h=0 | pooled row h=1]; fc1 was row-permuted on the host so
    # this NHWC flatten matches PyTorch's NCHW reshape ordering.
    # TODO(synk): Dropout2d(p=0.3) / Dropout(p=0.4) are identity (eval mode).
    row0 = p3[0:1].astype(bf16)                  # pooled row 0 = p3[0]
    row1 = p3[2:3].astype(bf16)                  # pooled row 1 = p3[2]
    h = jnp.dot(row0, fc1a_ref[...], preferred_element_type=f32)
    h += jnp.dot(row1, fc1b_ref[...], preferred_element_type=f32)
    h = jnp.maximum(h + b1_ref[...], 0.0)
    h = jnp.dot(h.astype(bf16), fc2_ref[...], preferred_element_type=f32)
    h = jnp.maximum(h + b2_ref[...], 0.0)
    out = jnp.dot(h.astype(bf16), fc3_ref[...], preferred_element_type=f32) + b3_ref[...]
    out_ref[...] = out.reshape(1, 1, -1)


# ----------------------------------------------------------------------------
# Host wrapper: tiny prep glue (pad + even/odd row split) and one pallas_call.
# ----------------------------------------------------------------------------
def _rep_spec(shape):
    return pl.BlockSpec(shape, lambda b: (0,) * len(shape))


@jax.jit
def cnn_model_forward(prep, x_nchw, length=None):
    # `length` is unused by the PyTorch forward; kept for signature parity.
    B = x_nchw.shape[0]
    g1, g2, g3 = GEOM
    xp = jnp.pad(x_nchw[:, 0].astype(jnp.float32),
                 ((0, 0), (PAD, PAD), (PAD, PAD)))            # (B, 161, 73)
    e1 = xp[:, 0::2, :]                                        # (B, 81, 73)
    o1 = xp[:, 1::2, :]                                        # (B, 80, 73)

    out = pl.pallas_call(
        _cnn_kernel,
        out_shape=jax.ShapeDtypeStruct((B, 1, 8), jnp.float32),
        grid=(B,),
        in_specs=[
            pl.BlockSpec((1, g1["n_even"], g1["k"]), lambda b: (b, 0, 0)),
            pl.BlockSpec((1, g1["n_odd"], g1["k"]), lambda b: (b, 0, 0)),
            _rep_spec(prep["w1"].shape), _rep_spec(prep["s1"].shape), _rep_spec(prep["t1"].shape),
            _rep_spec(prep["w2"].shape), _rep_spec(prep["s2"].shape), _rep_spec(prep["t2"].shape),
            _rep_spec(prep["w3"].shape), _rep_spec(prep["s3"].shape), _rep_spec(prep["t3"].shape),
            _rep_spec(prep["fc1a"].shape), _rep_spec(prep["fc1b"].shape), _rep_spec(prep["b1"].shape),
            _rep_spec(prep["fc2"].shape), _rep_spec(prep["b2"].shape),
            _rep_spec(prep["fc3"].shape), _rep_spec(prep["b3"].shape),
        ],
        out_specs=pl.BlockSpec((1, 1, 8), lambda b: (b, 0, 0)),
        scratch_shapes=[
            pltpu.VMEM((g2["n_even"], g2["k"]), jnp.float32),
            pltpu.VMEM((g2["n_odd"], g2["k"]), jnp.float32),
            pltpu.VMEM((g3["n_even"], g3["k"]), jnp.float32),
            pltpu.VMEM((g3["n_odd"], g3["k"]), jnp.float32),
        ],
        compiler_params=pltpu.CompilerParams(
            dimension_semantics=("parallel",),   # batch -> both TCs on v7x
        ),
    )(e1, o1,
      prep["w1"], prep["s1"], prep["t1"],
      prep["w2"], prep["s2"], prep["t2"],
      prep["w3"], prep["s3"], prep["t3"],
      prep["fc1a"], prep["fc1b"], prep["b1"],
      prep["fc2"], prep["b2"], prep["fc3"], prep["b3"])
    return out[:, 0, :]


# ----------------------------------------------------------------------------
# Parameters: PyTorch-layout init + one-time host-side repack for the kernel.
# ----------------------------------------------------------------------------
def init_params(key):
    ks = jax.random.split(key, 16)
    p = {}
    p["w_conv1"] = jax.random.normal(ks[0], (8, 1, 5, 5), jnp.float32) * 0.20
    p["w_conv2"] = jax.random.normal(ks[1], (16, 8, 5, 5), jnp.float32) * 0.07
    p["w_conv3"] = jax.random.normal(ks[2], (32, 16, 5, 5), jnp.float32) * 0.05
    eps = 1e-5
    for i, c, ki in [(1, 8, 3), (2, 16, 4), (3, 32, 5)]:
        gamma = 1.0 + 0.1 * jax.random.normal(ks[ki], (c,), jnp.float32)
        beta = 0.05 * jax.random.normal(ks[ki + 3], (c,), jnp.float32)
        running_mean = jnp.zeros((c,), jnp.float32)
        running_var = jnp.ones((c,), jnp.float32)
        scale = gamma / jnp.sqrt(running_var + eps)      # eval-mode BN fold
        shift = beta - running_mean * scale
        p[f"bn{i}_scale"] = scale
        p[f"bn{i}_shift"] = shift
    p["w_fc1"] = jax.random.normal(ks[9], (512, 128), jnp.float32) * (512 ** -0.5)
    p["b_fc1"] = 0.01 * jax.random.normal(ks[12], (1, 128), jnp.float32)
    p["w_fc2"] = jax.random.normal(ks[10], (128, 32), jnp.float32) * (128 ** -0.5)
    p["b_fc2"] = 0.01 * jax.random.normal(ks[13], (1, 32), jnp.float32)
    p["w_fc3"] = jax.random.normal(ks[11], (32, 8), jnp.float32) * (32 ** -0.5)
    p["b_fc3"] = 0.01 * jax.random.normal(ks[14], (1, 8), jnp.float32)
    return p


def _band_conv_weight(w_conv, wp, wout):
    """(Cout, Cin, KH, KW) -> (KH, Wp*Cin, Wout*Cout): folds the stride-2
    W-direction taps and channel mixing into one block-banded matrix per
    H-tap, so each in-kernel H-tap is a single plain matmul."""
    wk = jnp.transpose(w_conv, (2, 3, 1, 0))                    # (KH, KW, Cin, Cout)
    w_idx = jnp.arange(wp)
    wo_idx = jnp.arange(wout)
    kw_idx = jnp.arange(KW)
    sel = (w_idx[None, :, None] ==
           STRIDE * wo_idx[None, None, :] + kw_idx[:, None, None]).astype(jnp.float32)
    big = jnp.einsum("kwv,hkio->hwivo", sel, wk)                # (KH, Wp, Cin, Wout, Cout)
    cin, cout = w_conv.shape[1], w_conv.shape[0]
    return big.reshape(KH, wp * cin, wout * cout).astype(jnp.bfloat16)


def prepare_params(p):
    g1, g2, g3 = GEOM
    prep = {}
    for idx, g, wkey in ((1, g1, "w_conv1"), (2, g2, "w_conv2"), (3, g3, "w_conv3")):
        prep[f"w{idx}"] = _band_conv_weight(p[wkey], g["wp"], g["wout"])
        prep[f"s{idx}"] = jnp.tile(p[f"bn{idx}_scale"], g["wout"]).reshape(1, g["n"])
        prep[f"t{idx}"] = jnp.tile(p[f"bn{idx}_shift"], g["wout"]).reshape(1, g["n"])
    # fc1: permute rows from PyTorch's NCHW flatten order (c*H*W + h*W + w) to
    # the kernel's NHWC order (h*W*C + w*C + c), then split by conv row h.
    n_c, n_h, n_w = g3["cout"], g3["hpool"], g3["wout"]          # 32, 2, 8
    j = jnp.arange(n_c * n_h * n_w)
    jh = j // (n_w * n_c)
    jw = (j % (n_w * n_c)) // n_c
    jc = j % n_c
    src = jc * (n_h * n_w) + jh * n_w + jw
    w_fc1_nhwc = p["w_fc1"][src, :]
    half = n_w * n_c                                             # 256
    prep["fc1a"] = w_fc1_nhwc[:half].astype(jnp.bfloat16)
    prep["fc1b"] = w_fc1_nhwc[half:].astype(jnp.bfloat16)
    prep["b1"] = p["b_fc1"]
    prep["fc2"] = p["w_fc2"].astype(jnp.bfloat16)
    prep["b2"] = p["b_fc2"]
    prep["fc3"] = p["w_fc3"].astype(jnp.bfloat16)
    prep["b3"] = p["b_fc3"]
    return prep


# ----------------------------------------------------------------------------
if __name__ == "__main__":
    key = jax.random.PRNGKey(0)
    pkey, xkey = jax.random.split(key)
    params = init_params(pkey)
    prep = prepare_params(params)        # one-time host-side repack

    x = jax.random.normal(xkey, (2, 1, H_IN, W_IN), jnp.float32)
    length = jnp.array([H_IN, H_IN], jnp.int32)   # unused by forward (parity)

    out = cnn_model_forward(prep, x, length)
    out = jax.block_until_ready(out)
    assert out.shape == (2, 8), out.shape
    assert bool(jnp.all(jnp.isfinite(out)))
    print("KERNEL_OK")
</pallas_src>

<mosaic_0001>
module attributes {stable_mosaic.version = 11 : i64} {
  func.func @_cnn_kernel(%arg0: i32, %arg1: memref<1x81x73xf32, #tpu.memory_space<vmem>>, %arg2: memref<1x80x73xf32, #tpu.memory_space<vmem>>, %arg3: memref<5x73x280xbf16, #tpu.memory_space<vmem>>, %arg4: memref<1x280xf32, #tpu.memory_space<vmem>>, %arg5: memref<1x280xf32, #tpu.memory_space<vmem>>, %arg6: memref<5x296x272xbf16, #tpu.memory_space<vmem>>, %arg7: memref<1x272xf32, #tpu.memory_space<vmem>>, %arg8: memref<1x272xf32, #tpu.memory_space<vmem>>, %arg9: memref<5x304x256xbf16, #tpu.memory_space<vmem>>, %arg10: memref<1x256xf32, #tpu.memory_space<vmem>>, %arg11: memref<1x256xf32, #tpu.memory_space<vmem>>, %arg12: memref<256x128xbf16, #tpu.memory_space<vmem>>, %arg13: memref<256x128xbf16, #tpu.memory_space<vmem>>, %arg14: memref<1x128xf32, #tpu.memory_space<vmem>>, %arg15: memref<128x32xbf16, #tpu.memory_space<vmem>>, %arg16: memref<1x32xf32, #tpu.memory_space<vmem>>, %arg17: memref<32x8xbf16, #tpu.memory_space<vmem>>, %arg18: memref<1x8xf32, #tpu.memory_space<vmem>>, %arg19: memref<1x1x8xf32, #tpu.memory_space<vmem>>, %arg20: memref<21x296xf32, #tpu.memory_space<vmem>>, %arg21: memref<20x296xf32, #tpu.memory_space<vmem>>, %arg22: memref<6x304xf32, #tpu.memory_space<vmem>>, %arg23: memref<5x304xf32, #tpu.memory_space<vmem>>) attributes {dimension_semantics = [#tpu.dimension_semantics<parallel>], iteration_bounds = array<i64: 2>, scalar_prefetch = 0 : i64, scratch_operands = 4 : i64, tpu.core_type = #tpu.core_type<tc>, window_params = [{transform_indices = @transform_0, window_bounds = array<i64: 1, 81, 73>}, {transform_indices = @transform_1, window_bounds = array<i64: 1, 80, 73>}, {pipeline_mode = #tpu.pipeline_mode<synchronous>, transform_indices = @transform_2, window_bounds = array<i64: 5, 73, 280>}, {pipeline_mode = #tpu.pipeline_mode<synchronous>, transform_indices = @transform_3, window_bounds = array<i64: 1, 280>}, {pipeline_mode = #tpu.pipeline_mode<synchronous>, transform_indices = @transform_4, window_bounds = array<i64: 1, 280>}, {pipeline_mode = #tpu.pipeline_mode<synchronous>, transform_indices = @transform_5, window_bounds = array<i64: 5, 296, 272>}, {pipeline_mode = #tpu.pipeline_mode<synchronous>, transform_indices = @transform_6, window_bounds = array<i64: 1, 272>}, {pipeline_mode = #tpu.pipeline_mode<synchronous>, transform_indices = @transform_7, window_bounds = array<i64: 1, 272>}, {pipeline_mode = #tpu.pipeline_mode<synchronous>, transform_indices = @transform_8, window_bounds = array<i64: 5, 304, 256>}, {pipeline_mode = #tpu.pipeline_mode<synchronous>, transform_indices = @transform_9, window_bounds = array<i64: 1, 256>}, {pipeline_mode = #tpu.pipeline_mode<synchronous>, transform_indices = @transform_10, window_bounds = array<i64: 1, 256>}, {pipeline_mode = #tpu.pipeline_mode<synchronous>, transform_indices = @transform_11, window_bounds = array<i64: 256, 128>}, {pipeline_mode = #tpu.pipeline_mode<synchronous>, transform_indices = @transform_12, window_bounds = array<i64: 256, 128>}, {pipeline_mode = #tpu.pipeline_mode<synchronous>, transform_indices = @transform_13, window_bounds = array<i64: 1, 128>}, {pipeline_mode = #tpu.pipeline_mode<synchronous>, transform_indices = @transform_14, window_bounds = array<i64: 128, 32>}, {pipeline_mode = #tpu.pipeline_mode<synchronous>, transform_indices = @transform_15, window_bounds = array<i64: 1, 32>}, {pipeline_mode = #tpu.pipeline_mode<synchronous>, transform_indices = @transform_16, window_bounds = array<i64: 32, 8>}, {pipeline_mode = #tpu.pipeline_mode<synchronous>, transform_indices = @transform_17, window_bounds = array<i64: 1, 8>}, {transform_indices = @transform_18, window_bounds = array<i64: 1, 1, 8>}]} {
    %c0 = arith.constant 0 : index
    %c0_0 = arith.constant 0 : index
    %c0_1 = arith.constant 0 : index
    %0 = vector.load %arg1[%c0, %c0_0, %c0_1] : memref<1x81x73xf32, #tpu.memory_space<vmem>>, vector<1x81x73xf32>
    %1 = vector.shape_cast %0 : vector<1x81x73xf32> to vector<81x73xf32>
    %c0_2 = arith.constant 0 : index
    %c0_3 = arith.constant 0 : index
    %c0_4 = arith.constant 0 : index
    %2 = vector.load %arg2[%c0_2, %c0_3, %c0_4] : memref<1x80x73xf32, #tpu.memory_space<vmem>>, vector<1x80x73xf32>
    %3 = vector.shape_cast %2 : vector<1x80x73xf32> to vector<80x73xf32>
    %4 = vector.extract_strided_slice %1 {offsets = [0, 0], sizes = [79, 73], strides = [1, 1]} : vector<81x73xf32> to vector<79x73xf32>
    %5 = arith.truncf %4 : vector<79x73xf32> to vector<79x73xbf16>
    %c0_5 = arith.constant 0 : index
    %c0_6 = arith.constant 0 : index
    %c0_7 = arith.constant 0 : index
    %6 = vector.load %arg3[%c0_5, %c0_6, %c0_7] : memref<5x73x280xbf16, #tpu.memory_space<vmem>>, vector<1x73x280xbf16>
    %7 = vector.shape_cast %6 : vector<1x73x280xbf16> to vector<73x280xbf16>
    %cst = arith.constant dense<0.000000e+00> : vector<79x280xf32>
    %8 = tpu.matmul %5, %7, %cst {dimension_numbers = #tpu.dot_dimension_numbers<[1], [0], [0], [1], [0, 0, 1, 1], [], []>} : vector<79x73xbf16>, vector<73x280xbf16>, vector<79x280xf32> -> vector<79x280xf32>
    %9 = vector.extract_strided_slice %3 {offsets = [0, 0], sizes = [79, 73], strides = [1, 1]} : vector<80x73xf32> to vector<79x73xf32>
    %10 = arith.truncf %9 : vector<79x73xf32> to vector<79x73xbf16>
    %c1 = arith.constant 1 : index
    %c0_8 = arith.constant 0 : index
    %c0_9 = arith.constant 0 : index
    %11 = vector.load %arg3[%c1, %c0_8, %c0_9] : memref<5x73x280xbf16, #tpu.memory_space<vmem>>, vector<1x73x280xbf16>
    %12 = vector.shape_cast %11 : vector<1x73x280xbf16> to vector<73x280xbf16>
    %cst_10 = arith.constant dense<0.000000e+00> : vector<79x280xf32>
    %13 = tpu.matmul %10, %12, %cst_10 {dimension_numbers = #tpu.dot_dimension_numbers<[1], [0], [0], [1], [0, 0, 1, 1], [], []>} : vector<79x73xbf16>, vector<73x280xbf16>, vector<79x280xf32> -> vector<79x280xf32>
    %14 = arith.addf %8, %13 : vector<79x280xf32>
    %15 = vector.extract_strided_slice %1 {offsets = [1, 0], sizes = [79, 73], strides = [1, 1]} : vector<81x73xf32> to vector<79x73xf32>
    %16 = arith.truncf %15 : vector<79x73xf32> to vector<79x73xbf16>
    %c2 = arith.constant 2 : index
    %c0_11 = arith.constant 0 : index
    %c0_12 = arith.constant 0 : index
    %17 = vector.load %arg3[%c2, %c0_11, %c0_12] : memref<5x73x280xbf16, #tpu.memory_space<vmem>>, vector<1x73x280xbf16>
    %18 = vector.shape_cast %17 : vector<1x73x280xbf16> to vector<73x280xbf16>
    %cst_13 = arith.constant dense<0.000000e+00> : vector<79x280xf32>
    %19 = tpu.matmul %16, %18, %cst_13 {dimension_numbers = #tpu.dot_dimension_numbers<[1], [0], [0], [1], [0, 0, 1, 1], [], []>} : vector<79x73xbf16>, vector<73x280xbf16>, vector<79x280xf32> -> vector<79x280xf32>
    %20 = arith.addf %14, %19 : vector<79x280xf32>
    %21 = vector.extract_strided_slice %3 {offsets = [1, 0], sizes = [79, 73], strides = [1, 1]} : vector<80x73xf32> to vector<79x73xf32>
    %22 = arith.truncf %21 : vector<79x73xf32> to vector<79x73xbf16>
    %c3 = arith.constant 3 : index
    %c0_14 = arith.constant 0 : index
    %c0_15 = arith.constant 0 : index
    %23 = vector.load %arg3[%c3, %c0_14, %c0_15] : memref<5x73x280xbf16, #tpu.memory_space<vmem>>, vector<1x73x280xbf16>
    %24 = vector.shape_cast %23 : vector<1x73x280xbf16> to vector<73x280xbf16>
    %cst_16 = arith.constant dense<0.000000e+00> : vector<79x280xf32>
    %25 = tpu.matmul %22, %24, %cst_16 {dimension_numbers = #tpu.dot_dimension_numbers<[1], [0], [0], [1], [0, 0, 1, 1], [], []>} : vector<79x73xbf16>, vector<73x280xbf16>, vector<79x280xf32> -> vector<79x280xf32>
    %26 = arith.addf %20, %25 : vector<79x280xf32>
    %27 = vector.extract_strided_slice %1 {offsets = [2, 0], sizes = [79, 73], strides = [1, 1]} : vector<81x73xf32> to vector<79x73xf32>
    %28 = arith.truncf %27 : vector<79x73xf32> to vector<79x73xbf16>
    %c4 = arith.constant 4 : index
    %c0_17 = arith.constant 0 : index
    %c0_18 = arith.constant 0 : index
    %29 = vector.load %arg3[%c4, %c0_17, %c0_18] : memref<5x73x280xbf16, #tpu.memory_space<vmem>>, vector<1x73x280xbf16>
    %30 = vector.shape_cast %29 : vector<1x73x280xbf16> to vector<73x280xbf16>
    %cst_19 = arith.constant dense<0.000000e+00> : vector<79x280xf32>
    %31 = tpu.matmul %28, %30, %cst_19 {dimension_numbers = #tpu.dot_dimension_numbers<[1], [0], [0], [1], [0, 0, 1, 1], [], []>} : vector<79x73xbf16>, vector<73x280xbf16>, vector<79x280xf32> -> vector<79x280xf32>
    %32 = arith.addf %26, %31 : vector<79x280xf32>
    %33 = vector.extract_strided_slice %32 {offsets = [0, 0], sizes = [78, 280], strides = [1, 1]} : vector<79x280xf32> to vector<78x280xf32>
    %34 = vector.extract_strided_slice %32 {offsets = [1, 0], sizes = [78, 280], strides = [1, 1]} : vector<79x280xf32> to vector<78x280xf32>
    %35 = arith.maximumf %33, %34 : vector<78x280xf32>
    %c0_20 = arith.constant 0 : index
    %c0_21 = arith.constant 0 : index
    %36 = vector.load %arg4[%c0_20, %c0_21] : memref<1x280xf32, #tpu.memory_space<vmem>>, vector<1x280xf32>
    %37 = vector.broadcast %36 : vector<1x280xf32> to vector<78x280xf32>
    %38 = arith.mulf %35, %37 : vector<78x280xf32>
    %c0_22 = arith.constant 0 : index
    %c0_23 = arith.constant 0 : index
    %39 = vector.load %arg5[%c0_22, %c0_23] : memref<1x280xf32, #tpu.memory_space<vmem>>, vector<1x280xf32>
    %40 = vector.broadcast %39 : vector<1x280xf32> to vector<78x280xf32>
    %41 = arith.addf %38, %40 : vector<78x280xf32>
    %cst_24 = arith.constant 0.000000e+00 : f32
    %42 = vector.broadcast %cst_24 : f32 to vector<78x280xf32>
    %43 = arith.maximumf %41, %42 : vector<78x280xf32>
    %cst_25 = arith.constant 0.000000e+00 : f32
    %44 = vector.broadcast %cst_25 : f32 to vector<21x296xf32>
    %c0_26 = arith.constant 0 : index
    %c0_27 = arith.constant 0 : index
    %45 = vector.load %arg20[%c0_26, %c0_27] : memref<21x296xf32, #tpu.memory_space<vmem>>, vector<21x296xf32>
    tpu.vector_store %arg20[%c0_26, %c0_27], %44 {strides = array<i32>} : memref<21x296xf32, #tpu.memory_space<vmem>>, vector<21x296xf32>,
    %cst_28 = arith.constant 0.000000e+00 : f32
    %46 = vector.broadcast %cst_28 : f32 to vector<20x296xf32>
    %c0_29 = arith.constant 0 : index
    %c0_30 = arith.constant 0 : index
    %47 = vector.load %arg21[%c0_29, %c0_30] : memref<20x296xf32, #tpu.memory_space<vmem>>, vector<20x296xf32>
    tpu.vector_store %arg21[%c0_29, %c0_30], %46 {strides = array<i32>} : memref<20x296xf32, #tpu.memory_space<vmem>>, vector<20x296xf32>,
    %48 = vector.extract_strided_slice %43 {offsets = [0, 0], sizes = [1, 280], strides = [1, 1]} : vector<78x280xf32> to vector<1x280xf32>
    %c0_31 = arith.constant 0 : index
    %c8 = arith.constant 8 : index
    %49 = vector.load %arg21[%c0_31, %c8] : memref<20x296xf32, #tpu.memory_space<vmem>>, vector<1x280xf32>
    tpu.vector_store %arg21[%c0_31, %c8], %48 {strides = array<i32>} : memref<20x296xf32, #tpu.memory_space<vmem>>, vector<1x280xf32>,
    %50 = vector.extract_strided_slice %43 {offsets = [4, 0], sizes = [1, 280], strides = [1, 1]} : vector<78x280xf32> to vector<1x280xf32>
    %c1_32 = arith.constant 1 : index
    %c8_33 = arith.constant 8 : index
    %51 = vector.load %arg21[%c1_32, %c8_33] : memref<20x296xf32, #tpu.memory_space<vmem>>, vector<1x280xf32>
    tpu.vector_store %arg21[%c1_32, %c8_33], %50 {strides = array<i32>} : memref<20x296xf32, #tpu.memory_space<vmem>>, vector<1x280xf32>,
    %52 = vector.extract_strided_slice %43 {offsets = [8, 0], sizes = [1, 280], strides = [1, 1]} : vector<78x280xf32> to vector<1x280xf32>
    %c2_34 = arith.constant 2 : index
    %c8_35 = arith.constant 8 : index
    %53 = vector.load %arg21[%c2_34, %c8_35] : memref<20x296xf32, #tpu.memory_space<vmem>>, vector<1x280xf32>
    tpu.vector_store %arg21[%c2_34, %c8_35], %52 {strides = array<i32>} : memref<20x296xf32, #tpu.memory_space<vmem>>, vector<1x280xf32>,
    %54 = vector.extract_strided_slice %43 {offsets = [12, 0], sizes = [1, 280], strides = [1, 1]} : vector<78x280xf32> to vector<1x280xf32>
    %c3_36 = arith.constant 3 : index
    %c8_37 = arith.constant 8 : index
    %55 = vector.load %arg21[%c3_36, %c8_37] : memref<20x296xf32, #tpu.memory_space<vmem>>, vector<1x280xf32>
    tpu.vector_store %arg21[%c3_36, %c8_37], %54 {strides = array<i32>} : memref<20x296xf32, #tpu.memory_space<vmem>>, vector<1x280xf32>,
    %56 = vector.extract_strided_slice %43 {offsets = [16, 0], sizes = [1, 280], strides = [1, 1]} : vector<78x280xf32> to vector<1x280xf32>
    %c4_38 = arith.constant 4 : index
    %c8_39 = arith.constant 8 : index
    %57 = vector.load %arg21[%c4_38, %c8_39] : memref<20x296xf32, #tpu.memory_space<vmem>>, vector<1x280xf32>
    tpu.vector_store %arg21[%c4_38, %c8_39], %56 {strides = array<i32>} : memref<20x296xf32, #tpu.memory_space<vmem>>, vector<1x280xf32>,
    %58 = vector.extract_strided_slice %43 {offsets = [20, 0], sizes = [1, 280], strides = [1, 1]} : vector<78x280xf32> to vector<1x280xf32>
    %c5 = arith.constant 5 : index
    %c8_40 = arith.constant 8 : index
    %59 = vector.load %arg21[%c5, %c8_40] : memref<20x296xf32, #tpu.memory_space<vmem>>, vector<1x280xf32>
    tpu.vector_store %arg21[%c5, %c8_40], %58 {strides = array<i32>} : memref<20x296xf32, #tpu.memory_space<vmem>>, vector<1x280xf32>,
    %60 = vector.extract_strided_slice %43 {offsets = [24, 0], sizes = [1, 280], strides = [1, 1]} : vector<78x280xf32> to vector<1x280xf32>
    %c6 = arith.constant 6 : index
    %c8_41 = arith.constant 8 : index
    %61 = vector.load %arg21[%c6, %c8_41] : memref<20x296xf32, #tpu.memory_space<vmem>>, vector<1x280xf32>
    tpu.vector_store %arg21[%c6, %c8_41], %60 {strides = array<i32>} : memref<20x296xf32, #tpu.memory_space<vmem>>, vector<1x280xf32>,
    %62 = vector.extract_strided_slice %43 {offsets = [28, 0], sizes = [1, 280], strides = [1, 1]} : vector<78x280xf32> to vector<1x280xf32>
    %c7 = arith.constant 7 : index
    %c8_42 = arith.constant 8 : index
    %63 = vector.load %arg21[%c7, %c8_42] : memref<20x296xf32, #tpu.memory_space<vmem>>, vector<1x280xf32>
    tpu.vector_store %arg21[%c7, %c8_42], %62 {strides = array<i32>} : memref<20x296xf32, #tpu.memory_space<vmem>>, vector<1x280xf32>,
    %64 = vector.extract_strided_slice %43 {offsets = [32, 0], sizes = [1, 280], strides = [1, 1]} : vector<78x280xf32> to vector<1x280xf32>
    %c8_43 = arith.constant 8 : index
    %c8_44 = arith.constant 8 : index
    %65 = vector.load %arg21[%c8_43, %c8_44] : memref<20x296xf32, #tpu.memory_space<vmem>>, vector<1x280xf32>
    tpu.vector_store %arg21[%c8_43, %c8_44], %64 {strides = array<i32>} : memref<20x296xf32, #tpu.memory_space<vmem>>, vector<1x280xf32>,
    %66 = vector.extract_strided_slice %43 {offsets = [36, 0], sizes = [1, 280], strides = [1, 1]} : vector<78x280xf32> to vector<1x280xf32>
    %c9 = arith.constant 9 : index
    %c8_45 = arith.constant 8 : index
    %67 = vector.load %arg21[%c9, %c8_45] : memref<20x296xf32, #tpu.memory_space<vmem>>, vector<1x280xf32>
    tpu.vector_store %arg21[%c9, %c8_45], %66 {strides = array<i32>} : memref<20x296xf32, #tpu.memory_space<vmem>>, vector<1x280xf32>,
    %68 = vector.extract_strided_slice %43 {offsets = [40, 0], sizes = [1, 280], strides = [1, 1]} : vector<78x280xf32> to vector<1x280xf32>
    %c10 = arith.constant 10 : index
    %c8_46 = arith.constant 8 : index
    %69 = vector.load %arg21[%c10, %c8_46] : memref<20x296xf32, #tpu.memory_space<vmem>>, vector<1x280xf32>
    tpu.vector_store %arg21[%c10, %c8_46], %68 {strides = array<i32>} : memref<20x296xf32, #tpu.memory_space<vmem>>, vector<1x280xf32>,
    %70 = vector.extract_strided_slice %43 {offsets = [44, 0], sizes = [1, 280], strides = [1, 1]} : vector<78x280xf32> to vector<1x280xf32>
    %c11 = arith.constant 11 : index
    %c8_47 = arith.constant 8 : index
    %71 = vector.load %arg21[%c11, %c8_47] : memref<20x296xf32, #tpu.memory_space<vmem>>, vector<1x280xf32>
    tpu.vector_store %arg21[%c11, %c8_47], %70 {strides = array<i32>} : memref<20x296xf32, #tpu.memory_space<vmem>>, vector<1x280xf32>,
    %72 = vector.extract_strided_slice %43 {offsets = [48, 0], sizes = [1, 280], strides = [1, 1]} : vector<78x280xf32> to vector<1x280xf32>
    %c12 = arith.constant 12 : index
    %c8_48 = arith.constant 8 : index
    %73 = vector.load %arg21[%c12, %c8_48] : memref<20x296xf32, #tpu.memory_space<vmem>>, vector<1x280xf32>
    tpu.vector_store %arg21[%c12, %c8_48], %72 {strides = array<i32>} : memref<20x296xf32, #tpu.memory_space<vmem>>, vector<1x280xf32>,
    %74 = vector.extract_strided_slice %43 {offsets = [52, 0], sizes = [1, 280], strides = [1, 1]} : vector<78x280xf32> to vector<1x280xf32>
    %c13 = arith.constant 13 : index
    %c8_49 = arith.constant 8 : index
    %75 = vector.load %arg21[%c13, %c8_49] : memref<20x296xf32, #tpu.memory_space<vmem>>, vector<1x280xf32>
    tpu.vector_store %arg21[%c13, %c8_49], %74 {strides = array<i32>} : memref<20x296xf32, #tpu.memory_space<vmem>>, vector<1x280xf32>,
    %76 = vector.extract_strided_slice %43 {offsets = [56, 0], sizes = [1, 280], strides = [1, 1]} : vector<78x280xf32> to vector<1x280xf32>
    %c14 = arith.constant 14 : index
    %c8_50 = arith.constant 8 : index
    %77 = vector.load %arg21[%c14, %c8_50] : memref<20x296xf32, #tpu.memory_space<vmem>>, vector<1x280xf32>
    tpu.vector_store %arg21[%c14, %c8_50], %76 {strides = array<i32>} : memref<20x296xf32, #tpu.memory_space<vmem>>, vector<1x280xf32>,
    %78 = vector.extract_strided_slice %43 {offsets = [60, 0], sizes = [1, 280], strides = [1, 1]} : vector<78x280xf32> to vector<1x280xf32>
    %c15 = arith.constant 15 : index
    %c8_51 = arith.constant 8 : index
    %79 = vector.load %arg21[%c15, %c8_51] : memref<20x296xf32, #tpu.memory_space<vmem>>, vector<1x280xf32>
    tpu.vector_store %arg21[%c15, %c8_51], %78 {strides = array<i32>} : memref<20x296xf32, #tpu.memory_space<vmem>>, vector<1x280xf32>,
    %80 = vector.extract_strided_slice %43 {offsets = [64, 0], sizes = [1, 280], strides = [1, 1]} : vector<78x280xf32> to vector<1x280xf32>
    %c16 = arith.constant 16 : index
    %c8_52 = arith.constant 8 : index
    %81 = vector.load %arg21[%c16, %c8_52] : memref<20x296xf32, #tpu.memory_space<vmem>>, vector<1x280xf32>
    tpu.vector_store %arg21[%c16, %c8_52], %80 {strides = array<i32>} : memref<20x296xf32, #tpu.memory_space<vmem>>, vector<1x280xf32>,
    %82 = vector.extract_strided_slice %43 {offsets = [68, 0], sizes = [1, 280], strides = [1, 1]} : vector<78x280xf32> to vector<1x280xf32>
    %c17 = arith.constant 17 : index
    %c8_53 = arith.constant 8 : index
    %83 = vector.load %arg21[%c17, %c8_53] : memref<20x296xf32, #tpu.memory_space<vmem>>, vector<1x280xf32>
    tpu.vector_store %arg21[%c17, %c8_53], %82 {strides = array<i32>} : memref<20x296xf32, #tpu.memory_space<vmem>>, vector<1x280xf32>,
    %84 = vector.extract_strided_slice %43 {offsets = [72, 0], sizes = [1, 280], strides = [1, 1]} : vector<78x280xf32> to vector<1x280xf32>
    %c18 = arith.constant 18 : index
    %c8_54 = arith.constant 8 : index
    %85 = vector.load %arg21[%c18, %c8_54] : memref<20x296xf32, #tpu.memory_space<vmem>>, vector<1x280xf32>
    tpu.vector_store %arg21[%c18, %c8_54], %84 {strides = array<i32>} : memref<20x296xf32, #tpu.memory_space<vmem>>, vector<1x280xf32>,
    %86 = vector.extract_strided_slice %43 {offsets = [76, 0], sizes = [1, 280], strides = [1, 1]} : vector<78x280xf32> to vector<1x280xf32>
    %c19 = arith.constant 19 : index
    %c8_55 = arith.constant 8 : index
    %87 = vector.load %arg21[%c19, %c8_55] : memref<20x296xf32, #tpu.memory_space<vmem>>, vector<1x280xf32>
    tpu.vector_store %arg21[%c19, %c8_55], %86 {strides = array<i32>} : memref<20x296xf32, #tpu.memory_space<vmem>>, vector<1x280xf32>,
    %88 = vector.extract_strided_slice %43 {offsets = [2, 0], sizes = [1, 280], strides = [1, 1]} : vector<78x280xf32> to vector<1x280xf32>
    %c1_56 = arith.constant 1 : index
    %c8_57 = arith.constant 8 : index
    %89 = vector.load %arg20[%c1_56, %c8_57] : memref<21x296xf32, #tpu.memory_space<vmem>>, vector<1x280xf32>
    tpu.vector_store %arg20[%c1_56, %c8_57], %88 {strides = array<i32>} : memref<21x296xf32, #tpu.memory_space<vmem>>, vector<1x280xf32>,
    %90 = vector.extract_strided_slice %43 {offsets = [6, 0], sizes = [1, 280], strides = [1, 1]} : vector<78x280xf32> to vector<1x280xf32>
    %c2_58 = arith.constant 2 : index
    %c8_59 = arith.constant 8 : index
    %91 = vector.load %arg20[%c2_58, %c8_59] : memref<21x296xf32, #tpu.memory_space<vmem>>, vector<1x280xf32>
    tpu.vector_store %arg20[%c2_58, %c8_59], %90 {strides = array<i32>} : memref<21x296xf32, #tpu.memory_space<vmem>>, vector<1x280xf32>,
    %92 = vector.extract_strided_slice %43 {offsets = [10, 0], sizes = [1, 280], strides = [1, 1]} : vector<78x280xf32> to vector<1x280xf32>
    %c3_60 = arith.constant 3 : index
    %c8_61 = arith.constant 8 : index
    %93 = vector.load %arg20[%c3_60, %c8_61] : memref<21x296xf32, #tpu.memory_space<vmem>>, vector<1x280xf32>
    tpu.vector_store %arg20[%c3_60, %c8_61], %92 {strides = array<i32>} : memref<21x296xf32, #tpu.memory_space<vmem>>, vector<1x280xf32>,
    %94 = vector.extract_strided_slice %43 {offsets = [14, 0], sizes = [1, 280], strides = [1, 1]} : vector<78x280xf32> to vector<1x280xf32>
    %c4_62 = arith.constant 4 : index
    %c8_63 = arith.constant 8 : index
    %95 = vector.load %arg20[%c4_62, %c8_63] : memref<21x296xf32, #tpu.memory_space<vmem>>, vector<1x280xf32>
    tpu.vector_store %arg20[%c4_62, %c8_63], %94 {strides = array<i32>} : memref<21x296xf32, #tpu.memory_space<vmem>>, vector<1x280xf32>,
    %96 = vector.extract_strided_slice %43 {offsets = [18, 0], sizes = [1, 280], strides = [1, 1]} : vector<78x280xf32> to vector<1x280xf32>
    %c5_64 = arith.constant 5 : index
    %c8_65 = arith.constant 8 : index
    %97 = vector.load %arg20[%c5_64, %c8_65] : memref<21x296xf32, #tpu.memory_space<vmem>>, vector<1x280xf32>
    tpu.vector_store %arg20[%c5_64, %c8_65], %96 {strides = array<i32>} : memref<21x296xf32, #tpu.memory_space<vmem>>, vector<1x280xf32>,
    %98 = vector.extract_strided_slice %43 {offsets = [22, 0], sizes = [1, 280], strides = [1, 1]} : vector<78x280xf32> to vector<1x280xf32>
    %c6_66 = arith.constant 6 : index
    %c8_67 = arith.constant 8 : index
    %99 = vector.load %arg20[%c6_66, %c8_67] : memref<21x296xf32, #tpu.memory_space<vmem>>, vector<1x280xf32>
    tpu.vector_store %arg20[%c6_66, %c8_67], %98 {strides = array<i32>} : memref<21x296xf32, #tpu.memory_space<vmem>>, vector<1x280xf32>,
    %100 = vector.extract_strided_slice %43 {offsets = [26, 0], sizes = [1, 280], strides = [1, 1]} : vector<78x280xf32> to vector<1x280xf32>
    %c7_68 = arith.constant 7 : index
    %c8_69 = arith.constant 8 : index
    %101 = vector.load %arg20[%c7_68, %c8_69] : memref<21x296xf32, #tpu.memory_space<vmem>>, vector<1x280xf32>
    tpu.vector_store %arg20[%c7_68, %c8_69], %100 {strides = array<i32>} : memref<21x296xf32, #tpu.memory_space<vmem>>, vector<1x280xf32>,
    %102 = vector.extract_strided_slice %43 {offsets = [30, 0], sizes = [1, 280], strides = [1, 1]} : vector<78x280xf32> to vector<1x280xf32>
    %c8_70 = arith.constant 8 : index
    %c8_71 = arith.constant 8 : index
    %103 = vector.load %arg20[%c8_70, %c8_71] : memref<21x296xf32, #tpu.memory_space<vmem>>, vector<1x280xf32>
    tpu.vector_store %arg20[%c8_70, %c8_71], %102 {strides = array<i32>} : memref<21x296xf32, #tpu.memory_space<vmem>>, vector<1x280xf32>,
    %104 = vector.extract_strided_slice %43 {offsets = [34, 0], sizes = [1, 280], strides = [1, 1]} : vector<78x280xf32> to vector<1x280xf32>
    %c9_72 = arith.constant 9 : index
    %c8_73 = arith.constant 8 : index
    %105 = vector.load %arg20[%c9_72, %c8_73] : memref<21x296xf32, #tpu.memory_space<vmem>>, vector<1x280xf32>
    tpu.vector_store %arg20[%c9_72, %c8_73], %104 {strides = array<i32>} : memref<21x296xf32, #tpu.memory_space<vmem>>, vector<1x280xf32>,
    %106 = vector.extract_strided_slice %43 {offsets = [38, 0], sizes = [1, 280], strides = [1, 1]} : vector<78x280xf32> to vector<1x280xf32>
    %c10_74 = arith.constant 10 : index
    %c8_75 = arith.constant 8 : index
    %107 = vector.load %arg20[%c10_74, %c8_75] : memref<21x296xf32, #tpu.memory_space<vmem>>, vector<1x280xf32>
    tpu.vector_store %arg20[%c10_74, %c8_75], %106 {strides = array<i32>} : memref<21x296xf32, #tpu.memory_space<vmem>>, vector<1x280xf32>,
    %108 = vector.extract_strided_slice %43 {offsets = [42, 0], sizes = [1, 280], strides = [1, 1]} : vector<78x280xf32> to vector<1x280xf32>
    %c11_76 = arith.constant 11 : index
    %c8_77 = arith.constant 8 : index
    %109 = vector.load %arg20[%c11_76, %c8_77] : memref<21x296xf32, #tpu.memory_space<vmem>>, vector<1x280xf32>
    tpu.vector_store %arg20[%c11_76, %c8_77], %108 {strides = array<i32>} : memref<21x296xf32, #tpu.memory_space<vmem>>, vector<1x280xf32>,
    %110 = vector.extract_strided_slice %43 {offsets = [46, 0], sizes = [1, 280], strides = [1, 1]} : vector<78x280xf32> to vector<1x280xf32>
    %c12_78 = arith.constant 12 : index
    %c8_79 = arith.constant 8 : index
    %111 = vector.load %arg20[%c12_78, %c8_79] : memref<21x296xf32, #tpu.memory_space<vmem>>, vector<1x280xf32>
    tpu.vector_store %arg20[%c12_78, %c8_79], %110 {strides = array<i32>} : memref<21x296xf32, #tpu.memory_space<vmem>>, vector<1x280xf32>,
    %112 = vector.extract_strided_slice %43 {offsets = [50, 0], sizes = [1, 280], strides = [1, 1]} : vector<78x280xf32> to vector<1x280xf32>
    %c13_80 = arith.constant 13 : index
    %c8_81 = arith.constant 8 : index
    %113 = vector.load %arg20[%c13_80, %c8_81] : memref<21x296xf32, #tpu.memory_space<vmem>>, vector<1x280xf32>
    tpu.vector_store %arg20[%c13_80, %c8_81], %112 {strides = array<i32>} : memref<21x296xf32, #tpu.memory_space<vmem>>, vector<1x280xf32>,
    %114 = vector.extract_strided_slice %43 {offsets = [54, 0], sizes = [1, 280], strides = [1, 1]} : vector<78x280xf32> to vector<1x280xf32>
    %c14_82 = arith.constant 14 : index
    %c8_83 = arith.constant 8 : index
    %115 = vector.load %arg20[%c14_82, %c8_83] : memref<21x296xf32, #tpu.memory_space<vmem>>, vector<1x280xf32>
    tpu.vector_store %arg20[%c14_82, %c8_83], %114 {strides = array<i32>} : memref<21x296xf32, #tpu.memory_space<vmem>>, vector<1x280xf32>,
    %116 = vector.extract_strided_slice %43 {offsets = [58, 0], sizes = [1, 280], strides = [1, 1]} : vector<78x280xf32> to vector<1x280xf32>
    %c15_84 = arith.constant 15 : index
    %c8_85 = arith.constant 8 : index
    %117 = vector.load %arg20[%c15_84, %c8_85] : memref<21x296xf32, #tpu.memory_space<vmem>>, vector<1x280xf32>
    tpu.vector_store %arg20[%c15_84, %c8_85], %116 {strides = array<i32>} : memref<21x296xf32, #tpu.memory_space<vmem>>, vector<1x280xf32>,
    %118 = vector.extract_strided_slice %43 {offsets = [62, 0], sizes = [1, 280], strides = [1, 1]} : vector<78x280xf32> to vector<1x280xf32>
    %c16_86 = arith.constant 16 : index
    %c8_87 = arith.constant 8 : index
    %119 = vector.load %arg20[%c16_86, %c8_87] : memref<21x296xf32, #tpu.memory_space<vmem>>, vector<1x280xf32>
    tpu.vector_store %arg20[%c16_86, %c8_87], %118 {strides = array<i32>} : memref<21x296xf32, #tpu.memory_space<vmem>>, vector<1x280xf32>,
    %120 = vector.extract_strided_slice %43 {offsets = [66, 0], sizes = [1, 280], strides = [1, 1]} : vector<78x280xf32> to vector<1x280xf32>
    %c17_88 = arith.constant 17 : index
    %c8_89 = arith.constant 8 : index
    %121 = vector.load %arg20[%c17_88, %c8_89] : memref<21x296xf32, #tpu.memory_space<vmem>>, vector<1x280xf32>
    tpu.vector_store %arg20[%c17_88, %c8_89], %120 {strides = array<i32>} : memref<21x296xf32, #tpu.memory_space<vmem>>, vector<1x280xf32>,
    %122 = vector.extract_strided_slice %43 {offsets = [70, 0], sizes = [1, 280], strides = [1, 1]} : vector<78x280xf32> to vector<1x280xf32>
    %c18_90 = arith.constant 18 : index
    %c8_91 = arith.constant 8 : index
    %123 = vector.load %arg20[%c18_90, %c8_91] : memref<21x296xf32, #tpu.memory_space<vmem>>, vector<1x280xf32>
    tpu.vector_store %arg20[%c18_90, %c8_91], %122 {strides = array<i32>} : memref<21x296xf32, #tpu.memory_space<vmem>>, vector<1x280xf32>,
    %124 = vector.extract_strided_slice %43 {offsets = [74, 0], sizes = [1, 280], strides = [1, 1]} : vector<78x280xf32> to vector<1x280xf32>
    %c19_92 = arith.constant 19 : index
    %c8_93 = arith.constant 8 : index
    %125 = vector.load %arg20[%c19_92, %c8_93] : memref<21x296xf32, #tpu.memory_space<vmem>>, vector<1x280xf32>
    tpu.vector_store %arg20[%c19_92, %c8_93], %124 {strides = array<i32>} : memref<21x296xf32, #tpu.memory_space<vmem>>, vector<1x280xf32>,
    %c0_94 = arith.constant 0 : index
    %c0_95 = arith.constant 0 : index
    %126 = vector.load %arg20[%c0_94, %c0_95] : memref<21x296xf32, #tpu.memory_space<vmem>>, vector<21x296xf32>
    %c0_96 = arith.constant 0 : index
    %c0_97 = arith.constant 0 : index
    %127 = vector.load %arg21[%c0_96, %c0_97] : memref<20x296xf32, #tpu.memory_space<vmem>>, vector<20x296xf32>
    %128 = vector.extract_strided_slice %126 {offsets = [0, 0], sizes = [19, 296], strides = [1, 1]} : vector<21x296xf32> to vector<19x296xf32>
    %129 = arith.truncf %128 : vector<19x296xf32> to vector<19x296xbf16>
    %c0_98 = arith.constant 0 : index
    %c0_99 = arith.constant 0 : index
    %c0_100 = arith.constant 0 : index
    %130 = vector.load %arg6[%c0_98, %c0_99, %c0_100] : memref<5x296x272xbf16, #tpu.memory_space<vmem>>, vector<1x296x272xbf16>
    %131 = vector.shape_cast %130 : vector<1x296x272xbf16> to vector<296x272xbf16>
    %cst_101 = arith.constant dense<0.000000e+00> : vector<19x272xf32>
    %132 = tpu.matmul %129, %131, %cst_101 {dimension_numbers = #tpu.dot_dimension_numbers<[1], [0], [0], [1], [0, 0, 1, 1], [], []>} : vector<19x296xbf16>, vector<296x272xbf16>, vector<19x272xf32> -> vector<19x272xf32>
    %133 = vector.extract_strided_slice %127 {offsets = [0, 0], sizes = [19, 296], strides = [1, 1]} : vector<20x296xf32> to vector<19x296xf32>
    %134 = arith.truncf %133 : vector<19x296xf32> to vector<19x296xbf16>
    %c1_102 = arith.constant 1 : index
    %c0_103 = arith.constant 0 : index
    %c0_104 = arith.constant 0 : index
    %135 = vector.load %arg6[%c1_102, %c0_103, %c0_104] : memref<5x296x272xbf16, #tpu.memory_space<vmem>>, vector<1x296x272xbf16>
    %136 = vector.shape_cast %135 : vector<1x296x272xbf16> to vector<296x272xbf16>
    %cst_105 = arith.constant dense<0.000000e+00> : vector<19x272xf32>
    %137 = tpu.matmul %134, %136, %cst_105 {dimension_numbers = #tpu.dot_dimension_numbers<[1], [0], [0], [1], [0, 0, 1, 1], [], []>} : vector<19x296xbf16>, vector<296x272xbf16>, vector<19x272xf32> -> vector<19x272xf32>
    %138 = arith.addf %132, %137 : vector<19x272xf32>
    %139 = vector.extract_strided_slice %126 {offsets = [1, 0], sizes = [19, 296], strides = [1, 1]} : vector<21x296xf32> to vector<19x296xf32>
    %140 = arith.truncf %139 : vector<19x296xf32> to vector<19x296xbf16>
    %c2_106 = arith.constant 2 : index
    %c0_107 = arith.constant 0 : index
    %c0_108 = arith.constant 0 : index
    %141 = vector.load %arg6[%c2_106, %c0_107, %c0_108] : memref<5x296x272xbf16, #tpu.memory_space<vmem>>, vector<1x296x272xbf16>
    %142 = vector.shape_cast %141 : vector<1x296x272xbf16> to vector<296x272xbf16>
    %cst_109 = arith.constant dense<0.000000e+00> : vector<19x272xf32>
    %143 = tpu.matmul %140, %142, %cst_109 {dimension_numbers = #tpu.dot_dimension_numbers<[1], [0], [0], [1], [0, 0, 1, 1], [], []>} : vector<19x296xbf16>, vector<296x272xbf16>, vector<19x272xf32> -> vector<19x272xf32>
    %144 = arith.addf %138, %143 : vector<19x272xf32>
    %145 = vector.extract_strided_slice %127 {offsets = [1, 0], sizes = [19, 296], strides = [1, 1]} : vector<20x296xf32> to vector<19x296xf32>
    %146 = arith.truncf %145 : vector<19x296xf32> to vector<19x296xbf16>
    %c3_110 = arith.constant 3 : index
    %c0_111 = arith.constant 0 : index
    %c0_112 = arith.constant 0 : index
    %147 = vector.load %arg6[%c3_110, %c0_111, %c0_112] : memref<5x296x272xbf16, #tpu.memory_space<vmem>>, vector<1x296x272xbf16>
    %148 = vector.shape_cast %147 : vector<1x296x272xbf16> to vector<296x272xbf16>
    %cst_113 = arith.constant dense<0.000000e+00> : vector<19x272xf32>
    %149 = tpu.matmul %146, %148, %cst_113 {dimension_numbers = #tpu.dot_dimension_numbers<[1], [0], [0], [1], [0, 0, 1, 1], [], []>} : vector<19x296xbf16>, vector<296x272xbf16>, vector<19x272xf32> -> vector<19x272xf32>
    %150 = arith.addf %144, %149 : vector<19x272xf32>
    %151 = vector.extract_strided_slice %126 {offsets = [2, 0], sizes = [19, 296], strides = [1, 1]} : vector<21x296xf32> to vector<19x296xf32>
    %152 = arith.truncf %151 : vector<19x296xf32> to vector<19x296xbf16>
    %c4_114 = arith.constant 4 : index
    %c0_115 = arith.constant 0 : index
    %c0_116 = arith.constant 0 : index
    %153 = vector.load %arg6[%c4_114, %c0_115, %c0_116] : memref<5x296x272xbf16, #tpu.memory_space<vmem>>, vector<1x296x272xbf16>
    %154 = vector.shape_cast %153 : vector<1x296x272xbf16> to vector<296x272xbf16>
    %cst_117 = arith.constant dense<0.000000e+00> : vector<19x272xf32>
    %155 = tpu.matmul %152, %154, %cst_117 {dimension_numbers = #tpu.dot_dimension_numbers<[1], [0], [0], [1], [0, 0, 1, 1], [], []>} : vector<19x296xbf16>, vector<296x272xbf16>, vector<19x272xf32> -> vector<19x272xf32>
    %156 = arith.addf %150, %155 : vector<19x272xf32>
    %157 = vector.extract_strided_slice %156 {offsets = [0, 0], sizes = [18, 272], strides = [1, 1]} : vector<19x272xf32> to vector<18x272xf32>
    %158 = vector.extract_strided_slice %156 {offsets = [1, 0], sizes = [18, 272], strides = [1, 1]} : vector<19x272xf32> to vector<18x272xf32>
    %159 = arith.maximumf %157, %158 : vector<18x272xf32>
    %c0_118 = arith.constant 0 : index
    %c0_119 = arith.constant 0 : index
    %160 = vector.load %arg7[%c0_118, %c0_119] : memref<1x272xf32, #tpu.memory_space<vmem>>, vector<1x272xf32>
    %161 = vector.broadcast %160 : vector<1x272xf32> to vector<18x272xf32>
    %162 = arith.mulf %159, %161 : vector<18x272xf32>
    %c0_120 = arith.constant 0 : index
    %c0_121 = arith.constant 0 : index
    %163 = vector.load %arg8[%c0_120, %c0_121] : memref<1x272xf32, #tpu.memory_space<vmem>>, vector<1x272xf32>
    %164 = vector.broadcast %163 : vector<1x272xf32> to vector<18x272xf32>
    %165 = arith.addf %162, %164 : vector<18x272xf32>
    %cst_122 = arith.constant 0.000000e+00 : f32
    %166 = vector.broadcast %cst_122 : f32 to vector<18x272xf32>
    %167 = arith.maximumf %165, %166 : vector<18x272xf32>
    %cst_123 = arith.constant 0.000000e+00 : f32
    %168 = vector.broadcast %cst_123 : f32 to vector<6x304xf32>
    %c0_124 = arith.constant 0 : index
    %c0_125 = arith.constant 0 : index
    %169 = vector.load %arg22[%c0_124, %c0_125] : memref<6x304xf32, #tpu.memory_space<vmem>>, vector<6x304xf32>
    tpu.vector_store %arg22[%c0_124, %c0_125], %168 {strides = array<i32>} : memref<6x304xf32, #tpu.memory_space<vmem>>, vector<6x304xf32>,
    %cst_126 = arith.constant 0.000000e+00 : f32
    %170 = vector.broadcast %cst_126 : f32 to vector<5x304xf32>
    %c0_127 = arith.constant 0 : index
    %c0_128 = arith.constant 0 : index
    %171 = vector.load %arg23[%c0_127, %c0_128] : memref<5x304xf32, #tpu.memory_space<vmem>>, vector<5x304xf32>
    tpu.vector_store %arg23[%c0_127, %c0_128], %170 {strides = array<i32>} : memref<5x304xf32, #tpu.memory_space<vmem>>, vector<5x304xf32>,
    %172 = vector.extract_strided_slice %167 {offsets = [0, 0], sizes = [1, 272], strides = [1, 1]} : vector<18x272xf32> to vector<1x272xf32>
    %c0_129 = arith.constant 0 : index
    %c16_130 = arith.constant 16 : index
    %173 = vector.load %arg23[%c0_129, %c16_130] : memref<5x304xf32, #tpu.memory_space<vmem>>, vector<1x272xf32>
    tpu.vector_store %arg23[%c0_129, %c16_130], %172 {strides = array<i32>} : memref<5x304xf32, #tpu.memory_space<vmem>>, vector<1x272xf32>,
    %174 = vector.extract_strided_slice %167 {offsets = [4, 0], sizes = [1, 272], strides = [1, 1]} : vector<18x272xf32> to vector<1x272xf32>
    %c1_131 = arith.constant 1 : index
    %c16_132 = arith.constant 16 : index
    %175 = vector.load %arg23[%c1_131, %c16_132] : memref<5x304xf32, #tpu.memory_space<vmem>>, vector<1x272xf32>
    tpu.vector_store %arg23[%c1_131, %c16_132], %174 {strides = array<i32>} : memref<5x304xf32, #tpu.memory_space<vmem>>, vector<1x272xf32>,
    %176 = vector.extract_strided_slice %167 {offsets = [8, 0], sizes = [1, 272], strides = [1, 1]} : vector<18x272xf32> to vector<1x272xf32>
    %c2_133 = arith.constant 2 : index
    %c16_134 = arith.constant 16 : index
    %177 = vector.load %arg23[%c2_133, %c16_134] : memref<5x304xf32, #tpu.memory_space<vmem>>, vector<1x272xf32>
    tpu.vector_store %arg23[%c2_133, %c16_134], %176 {strides = array<i32>} : memref<5x304xf32, #tpu.memory_space<vmem>>, vector<1x272xf32>,
    %178 = vector.extract_strided_slice %167 {offsets = [12, 0], sizes = [1, 272], strides = [1, 1]} : vector<18x272xf32> to vector<1x272xf32>
    %c3_135 = arith.constant 3 : index
    %c16_136 = arith.constant 16 : index
    %179 = vector.load %arg23[%c3_135, %c16_136] : memref<5x304xf32, #tpu.memory_space<vmem>>, vector<1x272xf32>
    tpu.vector_store %arg23[%c3_135, %c16_136], %178 {strides = array<i32>} : memref<5x304xf32, #tpu.memory_space<vmem>>, vector<1x272xf32>,
    %180 = vector.extract_strided_slice %167 {offsets = [16, 0], sizes = [1, 272], strides = [1, 1]} : vector<18x272xf32> to vector<1x272xf32>
    %c4_137 = arith.constant 4 : index
    %c16_138 = arith.constant 16 : index
    %181 = vector.load %arg23[%c4_137, %c16_138] : memref<5x304xf32, #tpu.memory_space<vmem>>, vector<1x272xf32>
    tpu.vector_store %arg23[%c4_137, %c16_138], %180 {strides = array<i32>} : memref<5x304xf32, #tpu.memory_space<vmem>>, vector<1x272xf32>,
    %182 = vector.extract_strided_slice %167 {offsets = [2, 0], sizes = [1, 272], strides = [1, 1]} : vector<18x272xf32> to vector<1x272xf32>
    %c1_139 = arith.constant 1 : index
    %c16_140 = arith.constant 16 : index
    %183 = vector.load %arg22[%c1_139, %c16_140] : memref<6x304xf32, #tpu.memory_space<vmem>>, vector<1x272xf32>
    tpu.vector_store %arg22[%c1_139, %c16_140], %182 {strides = array<i32>} : memref<6x304xf32, #tpu.memory_space<vmem>>, vector<1x272xf32>,
    %184 = vector.extract_strided_slice %167 {offsets = [6, 0], sizes = [1, 272], strides = [1, 1]} : vector<18x272xf32> to vector<1x272xf32>
    %c2_141 = arith.constant 2 : index
    %c16_142 = arith.constant 16 : index
    %185 = vector.load %arg22[%c2_141, %c16_142] : memref<6x304xf32, #tpu.memory_space<vmem>>, vector<1x272xf32>
    tpu.vector_store %arg22[%c2_141, %c16_142], %184 {strides = array<i32>} : memref<6x304xf32, #tpu.memory_space<vmem>>, vector<1x272xf32>,
    %186 = vector.extract_strided_slice %167 {offsets = [10, 0], sizes = [1, 272], strides = [1, 1]} : vector<18x272xf32> to vector<1x272xf32>
    %c3_143 = arith.constant 3 : index
    %c16_144 = arith.constant 16 : index
    %187 = vector.load %arg22[%c3_143, %c16_144] : memref<6x304xf32, #tpu.memory_space<vmem>>, vector<1x272xf32>
    tpu.vector_store %arg22[%c3_143, %c16_144], %186 {strides = array<i32>} : memref<6x304xf32, #tpu.memory_space<vmem>>, vector<1x272xf32>,
    %188 = vector.extract_strided_slice %167 {offsets = [14, 0], sizes = [1, 272], strides = [1, 1]} : vector<18x272xf32> to vector<1x272xf32>
    %c4_145 = arith.constant 4 : index
    %c16_146 = arith.constant 16 : index
    %189 = vector.load %arg22[%c4_145, %c16_146] : memref<6x304xf32, #tpu.memory_space<vmem>>, vector<1x272xf32>
    tpu.vector_store %arg22[%c4_145, %c16_146], %188 {strides = array<i32>} : memref<6x304xf32, #tpu.memory_space<vmem>>, vector<1x272xf32>,
    %c0_147 = arith.constant 0 : index
    %c0_148 = arith.constant 0 : index
    %190 = vector.load %arg22[%c0_147, %c0_148] : memref<6x304xf32, #tpu.memory_space<vmem>>, vector<6x304xf32>
    %c0_149 = arith.constant 0 : index
    %c0_150 = arith.constant 0 : index
    %191 = vector.load %arg23[%c0_149, %c0_150] : memref<5x304xf32, #tpu.memory_space<vmem>>, vector<5x304xf32>
    %192 = vector.extract_strided_slice %190 {offsets = [0, 0], sizes = [4, 304], strides = [1, 1]} : vector<6x304xf32> to vector<4x304xf32>
    %193 = arith.truncf %192 : vector<4x304xf32> to vector<4x304xbf16>
    %c0_151 = arith.constant 0 : index
    %c0_152 = arith.constant 0 : index
    %c0_153 = arith.constant 0 : index
    %194 = vector.load %arg9[%c0_151, %c0_152, %c0_153] : memref<5x304x256xbf16, #tpu.memory_space<vmem>>, vector<1x304x256xbf16>
    %195 = vector.shape_cast %194 : vector<1x304x256xbf16> to vector<304x256xbf16>
    %cst_154 = arith.constant dense<0.000000e+00> : vector<4x256xf32>
    %196 = tpu.matmul %193, %195, %cst_154 {dimension_numbers = #tpu.dot_dimension_numbers<[1], [0], [0], [1], [0, 0, 1, 1], [], []>} : vector<4x304xbf16>, vector<304x256xbf16>, vector<4x256xf32> -> vector<4x256xf32>
    %197 = vector.extract_strided_slice %191 {offsets = [0, 0], sizes = [4, 304], strides = [1, 1]} : vector<5x304xf32> to vector<4x304xf32>
    %198 = arith.truncf %197 : vector<4x304xf32> to vector<4x304xbf16>
    %c1_155 = arith.constant 1 : index
    %c0_156 = arith.constant 0 : index
    %c0_157 = arith.constant 0 : index
    %199 = vector.load %arg9[%c1_155, %c0_156, %c0_157] : memref<5x304x256xbf16, #tpu.memory_space<vmem>>, vector<1x304x256xbf16>
    %200 = vector.shape_cast %199 : vector<1x304x256xbf16> to vector<304x256xbf16>
    %cst_158 = arith.constant dense<0.000000e+00> : vector<4x256xf32>
    %201 = tpu.matmul %198, %200, %cst_158 {dimension_numbers = #tpu.dot_dimension_numbers<[1], [0], [0], [1], [0, 0, 1, 1], [], []>} : vector<4x304xbf16>, vector<304x256xbf16>, vector<4x256xf32> -> vector<4x256xf32>
    %202 = arith.addf %196, %201 : vector<4x256xf32>
    %203 = vector.extract_strided_slice %190 {offsets = [1, 0], sizes = [4, 304], strides = [1, 1]} : vector<6x304xf32> to vector<4x304xf32>
    %204 = arith.truncf %203 : vector<4x304xf32> to vector<4x304xbf16>
    %c2_159 = arith.constant 2 : index
    %c0_160 = arith.constant 0 : index
    %c0_161 = arith.constant 0 : index
    %205 = vector.load %arg9[%c2_159, %c0_160, %c0_161] : memref<5x304x256xbf16, #tpu.memory_space<vmem>>, vector<1x304x256xbf16>
    %206 = vector.shape_cast %205 : vector<1x304x256xbf16> to vector<304x256xbf16>
    %cst_162 = arith.constant dense<0.000000e+00> : vector<4x256xf32>
    %207 = tpu.matmul %204, %206, %cst_162 {dimension_numbers = #tpu.dot_dimension_numbers<[1], [0], [0], [1], [0, 0, 1, 1], [], []>} : vector<4x304xbf16>, vector<304x256xbf16>, vector<4x256xf32> -> vector<4x256xf32>
    %208 = arith.addf %202, %207 : vector<4x256xf32>
    %209 = vector.extract_strided_slice %191 {offsets = [1, 0], sizes = [4, 304], strides = [1, 1]} : vector<5x304xf32> to vector<4x304xf32>
    %210 = arith.truncf %209 : vector<4x304xf32> to vector<4x304xbf16>
    %c3_163 = arith.constant 3 : index
    %c0_164 = arith.constant 0 : index
    %c0_165 = arith.constant 0 : index
    %211 = vector.load %arg9[%c3_163, %c0_164, %c0_165] : memref<5x304x256xbf16, #tpu.memory_space<vmem>>, vector<1x304x256xbf16>
    %212 = vector.shape_cast %211 : vector<1x304x256xbf16> to vector<304x256xbf16>
    %cst_166 = arith.constant dense<0.000000e+00> : vector<4x256xf32>
    %213 = tpu.matmul %210, %212, %cst_166 {dimension_numbers = #tpu.dot_dimension_numbers<[1], [0], [0], [1], [0, 0, 1, 1], [], []>} : vector<4x304xbf16>, vector<304x256xbf16>, vector<4x256xf32> -> vector<4x256xf32>
    %214 = arith.addf %208, %213 : vector<4x256xf32>
    %215 = vector.extract_strided_slice %190 {offsets = [2, 0], sizes = [4, 304], strides = [1, 1]} : vector<6x304xf32> to vector<4x304xf32>
    %216 = arith.truncf %215 : vector<4x304xf32> to vector<4x304xbf16>
    %c4_167 = arith.constant 4 : index
    %c0_168 = arith.constant 0 : index
    %c0_169 = arith.constant 0 : index
    %217 = vector.load %arg9[%c4_167, %c0_168, %c0_169] : memref<5x304x256xbf16, #tpu.memory_space<vmem>>, vector<1x304x256xbf16>
    %218 = vector.shape_cast %217 : vector<1x304x256xbf16> to vector<304x256xbf16>
    %cst_170 = arith.constant dense<0.000000e+00> : vector<4x256xf32>
    %219 = tpu.matmul %216, %218, %cst_170 {dimension_numbers = #tpu.dot_dimension_numbers<[1], [0], [0], [1], [0, 0, 1, 1], [], []>} : vector<4x304xbf16>, vector<304x256xbf16>, vector<4x256xf32> -> vector<4x256xf32>
    %220 = arith.addf %214, %219 : vector<4x256xf32>
    %221 = vector.extract_strided_slice %220 {offsets = [0, 0], sizes = [3, 256], strides = [1, 1]} : vector<4x256xf32> to vector<3x256xf32>
    %222 = vector.extract_strided_slice %220 {offsets = [1, 0], sizes = [3, 256], strides = [1, 1]} : vector<4x256xf32> to vector<3x256xf32>
    %223 = arith.maximumf %221, %222 : vector<3x256xf32>
    %c0_171 = arith.constant 0 : index
    %c0_172 = arith.constant 0 : index
    %224 = vector.load %arg10[%c0_171, %c0_172] : memref<1x256xf32, #tpu.memory_space<vmem>>, vector<1x256xf32>
    %225 = vector.broadcast %224 : vector<1x256xf32> to vector<3x256xf32>
    %226 = arith.mulf %223, %225 : vector<3x256xf32>
    %c0_173 = arith.constant 0 : index
    %c0_174 = arith.constant 0 : index
    %227 = vector.load %arg11[%c0_173, %c0_174] : memref<1x256xf32, #tpu.memory_space<vmem>>, vector<1x256xf32>
    %228 = vector.broadcast %227 : vector<1x256xf32> to vector<3x256xf32>
    %229 = arith.addf %226, %228 : vector<3x256xf32>
    %cst_175 = arith.constant 0.000000e+00 : f32
    %230 = vector.broadcast %cst_175 : f32 to vector<3x256xf32>
    %231 = arith.maximumf %229, %230 : vector<3x256xf32>
    %232 = vector.extract_strided_slice %231 {offsets = [0, 0], sizes = [1, 256], strides = [1, 1]} : vector<3x256xf32> to vector<1x256xf32>
    %233 = arith.truncf %232 : vector<1x256xf32> to vector<1x256xbf16>
    %234 = vector.extract_strided_slice %231 {offsets = [2, 0], sizes = [1, 256], strides = [1, 1]} : vector<3x256xf32> to vector<1x256xf32>
    %235 = arith.truncf %234 : vector<1x256xf32> to vector<1x256xbf16>
    %c0_176 = arith.constant 0 : index
    %c0_177 = arith.constant 0 : index
    %236 = vector.load %arg12[%c0_176, %c0_177] : memref<256x128xbf16, #tpu.memory_space<vmem>>, vector<256x128xbf16>
    %cst_178 = arith.constant dense<0.000000e+00> : vector<1x128xf32>
    %237 = tpu.matmul %233, %236, %cst_178 {dimension_numbers = #tpu.dot_dimension_numbers<[1], [0], [0], [1], [0, 0, 1, 1], [], []>} : vector<1x256xbf16>, vector<256x128xbf16>, vector<1x128xf32> -> vector<1x128xf32>
    %c0_179 = arith.constant 0 : index
    %c0_180 = arith.constant 0 : index
    %238 = vector.load %arg13[%c0_179, %c0_180] : memref<256x128xbf16, #tpu.memory_space<vmem>>, vector<256x128xbf16>
    %cst_181 = arith.constant dense<0.000000e+00> : vector<1x128xf32>
    %239 = tpu.matmul %235, %238, %cst_181 {dimension_numbers = #tpu.dot_dimension_numbers<[1], [0], [0], [1], [0, 0, 1, 1], [], []>} : vector<1x256xbf16>, vector<256x128xbf16>, vector<1x128xf32> -> vector<1x128xf32>
    %240 = arith.addf %237, %239 : vector<1x128xf32>
    %c0_182 = arith.constant 0 : index
    %c0_183 = arith.constant 0 : index
    %241 = vector.load %arg14[%c0_182, %c0_183] : memref<1x128xf32, #tpu.memory_space<vmem>>, vector<1x128xf32>
    %242 = arith.addf %240, %241 : vector<1x128xf32>
    %cst_184 = arith.constant 0.000000e+00 : f32
    %243 = vector.broadcast %cst_184 : f32 to vector<1x128xf32>
    %244 = arith.maximumf %242, %243 : vector<1x128xf32>
    %245 = arith.truncf %244 : vector<1x128xf32> to vector<1x128xbf16>
    %c0_185 = arith.constant 0 : index
    %c0_186 = arith.constant 0 : index
    %246 = vector.load %arg15[%c0_185, %c0_186] : memref<128x32xbf16, #tpu.memory_space<vmem>>, vector<128x32xbf16>
    %cst_187 = arith.constant dense<0.000000e+00> : vector<1x32xf32>
    %247 = tpu.matmul %245, %246, %cst_187 {dimension_numbers = #tpu.dot_dimension_numbers<[1], [0], [0], [1], [0, 0, 1, 1], [], []>} : vector<1x128xbf16>, vector<128x32xbf16>, vector<1x32xf32> -> vector<1x32xf32>
    %c0_188 = arith.constant 0 : index
    %c0_189 = arith.constant 0 : index
    %248 = vector.load %arg16[%c0_188, %c0_189] : memref<1x32xf32, #tpu.memory_space<vmem>>, vector<1x32xf32>
    %249 = arith.addf %247, %248 : vector<1x32xf32>
    %cst_190 = arith.constant 0.000000e+00 : f32
    %250 = vector.broadcast %cst_190 : f32 to vector<1x32xf32>
    %251 = arith.maximumf %249, %250 : vector<1x32xf32>
    %252 = arith.truncf %251 : vector<1x32xf32> to vector<1x32xbf16>
    %c0_191 = arith.constant 0 : index
    %c0_192 = arith.constant 0 : index
    %253 = vector.load %arg17[%c0_191, %c0_192] : memref<32x8xbf16, #tpu.memory_space<vmem>>, vector<32x8xbf16>
    %cst_193 = arith.constant dense<0.000000e+00> : vector<1x8xf32>
    %254 = tpu.matmul %252, %253, %cst_193 {dimension_numbers = #tpu.dot_dimension_numbers<[1], [0], [0], [1], [0, 0, 1, 1], [], []>} : vector<1x32xbf16>, vector<32x8xbf16>, vector<1x8xf32> -> vector<1x8xf32>
    %c0_194 = arith.constant 0 : index
    %c0_195 = arith.constant 0 : index
    %255 = vector.load %arg18[%c0_194, %c0_195] : memref<1x8xf32, #tpu.memory_space<vmem>>, vector<1x8xf32>
    %256 = arith.addf %254, %255 : vector<1x8xf32>
    %257 = vector.shape_cast %256 : vector<1x8xf32> to vector<1x1x8xf32>
    %c0_196 = arith.constant 0 : index
    %c0_197 = arith.constant 0 : index
    %c0_198 = arith.constant 0 : index
    %258 = vector.load %arg19[%c0_196, %c0_197, %c0_198] : memref<1x1x8xf32, #tpu.memory_space<vmem>>, vector<1x1x8xf32>
    tpu.vector_store %arg19[%c0_196, %c0_197, %c0_198], %257 {strides = array<i32>} : memref<1x1x8xf32, #tpu.memory_space<vmem>>, vector<1x1x8xf32>,
    return
  }
  func.func @transform_0(%arg0: i32) -> (i32, i32, i32) {
    %c0_i32 = arith.constant 0 : i32
    %c0_i32_0 = arith.constant 0 : i32
    %c0_i32_1 = arith.constant 0 : i32
    return %arg0, %c0_i32, %c0_i32_0 : i32, i32, i32
  }
  func.func @transform_1(%arg0: i32) -> (i32, i32, i32) {
    %c0_i32 = arith.constant 0 : i32
    %c0_i32_0 = arith.constant 0 : i32
    %c0_i32_1 = arith.constant 0 : i32
    return %arg0, %c0_i32, %c0_i32_0 : i32, i32, i32
  }
  func.func @transform_2(%arg0: i32) -> (i32, i32, i32) {
    %c0_i32 = arith.constant 0 : i32
    %c0_i32_0 = arith.constant 0 : i32
    %c0_i32_1 = arith.constant 0 : i32
    %c0_i32_2 = arith.constant 0 : i32
    return %c0_i32, %c0_i32_0, %c0_i32_1 : i32, i32, i32
  }
  func.func @transform_3(%arg0: i32) -> (i32, i32) {
    %c0_i32 = arith.constant 0 : i32
    %c0_i32_0 = arith.constant 0 : i32
    %c0_i32_1 = arith.constant 0 : i32
    return %c0_i32, %c0_i32_0 : i32, i32
  }
  func.func @transform_4(%arg0: i32) -> (i32, i32) {
    %c0_i32 = arith.constant 0 : i32
    %c0_i32_0 = arith.constant 0 : i32
    %c0_i32_1 = arith.constant 0 : i32
    return %c0_i32, %c0_i32_0 : i32, i32
  }
  func.func @transform_5(%arg0: i32) -> (i32, i32, i32) {
    %c0_i32 = arith.constant 0 : i32
    %c0_i32_0 = arith.constant 0 : i32
    %c0_i32_1 = arith.constant 0 : i32
    %c0_i32_2 = arith.constant 0 : i32
    return %c0_i32, %c0_i32_0, %c0_i32_1 : i32, i32, i32
  }
  func.func @transform_6(%arg0: i32) -> (i32, i32) {
    %c0_i32 = arith.constant 0 : i32
    %c0_i32_0 = arith.constant 0 : i32
    %c0_i32_1 = arith.constant 0 : i32
    return %c0_i32, %c0_i32_0 : i32, i32
  }
  func.func @transform_7(%arg0: i32) -> (i32, i32) {
    %c0_i32 = arith.constant 0 : i32
    %c0_i32_0 = arith.constant 0 : i32
    %c0_i32_1 = arith.constant 0 : i32
    return %c0_i32, %c0_i32_0 : i32, i32
  }
  func.func @transform_8(%arg0: i32) -> (i32, i32, i32) {
    %c0_i32 = arith.constant 0 : i32
    %c0_i32_0 = arith.constant 0 : i32
    %c0_i32_1 = arith.constant 0 : i32
    %c0_i32_2 = arith.constant 0 : i32
    return %c0_i32, %c0_i32_0, %c0_i32_1 : i32, i32, i32
  }
  func.func @transform_9(%arg0: i32) -> (i32, i32) {
    %c0_i32 = arith.constant 0 : i32
    %c0_i32_0 = arith.constant 0 : i32
    %c0_i32_1 = arith.constant 0 : i32
    return %c0_i32, %c0_i32_0 : i32, i32
  }
  func.func @transform_10(%arg0: i32) -> (i32, i32) {
    %c0_i32 = arith.constant 0 : i32
    %c0_i32_0 = arith.constant 0 : i32
    %c0_i32_1 = arith.constant 0 : i32
    return %c0_i32, %c0_i32_0 : i32, i32
  }
  func.func @transform_11(%arg0: i32) -> (i32, i32) {
    %c0_i32 = arith.constant 0 : i32
    %c0_i32_0 = arith.constant 0 : i32
    %c0_i32_1 = arith.constant 0 : i32
    return %c0_i32, %c0_i32_0 : i32, i32
  }
  func.func @transform_12(%arg0: i32) -> (i32, i32) {
    %c0_i32 = arith.constant 0 : i32
    %c0_i32_0 = arith.constant 0 : i32
    %c0_i32_1 = arith.constant 0 : i32
    return %c0_i32, %c0_i32_0 : i32, i32
  }
  func.func @transform_13(%arg0: i32) -> (i32, i32) {
    %c0_i32 = arith.constant 0 : i32
    %c0_i32_0 = arith.constant 0 : i32
    %c0_i32_1 = arith.constant 0 : i32
    return %c0_i32, %c0_i32_0 : i32, i32
  }
  func.func @transform_14(%arg0: i32) -> (i32, i32) {
    %c0_i32 = arith.constant 0 : i32
    %c0_i32_0 = arith.constant 0 : i32
    %c0_i32_1 = arith.constant 0 : i32
    return %c0_i32, %c0_i32_0 : i32, i32
  }
  func.func @transform_15(%arg0: i32) -> (i32, i32) {
    %c0_i32 = arith.constant 0 : i32
    %c0_i32_0 = arith.constant 0 : i32
    %c0_i32_1 = arith.constant 0 : i32
    return %c0_i32, %c0_i32_0 : i32, i32
  }
  func.func @transform_16(%arg0: i32) -> (i32, i32) {
    %c0_i32 = arith.constant 0 : i32
    %c0_i32_0 = arith.constant 0 : i32
    %c0_i32_1 = arith.constant 0 : i32
    return %c0_i32, %c0_i32_0 : i32, i32
  }
  func.func @transform_17(%arg0: i32) -> (i32, i32) {
    %c0_i32 = arith.constant 0 : i32
    %c0_i32_0 = arith.constant 0 : i32
    %c0_i32_1 = arith.constant 0 : i32
    return %c0_i32, %c0_i32_0 : i32, i32
  }
  func.func @transform_18(%arg0: i32) -> (i32, i32, i32) {
    %c0_i32 = arith.constant 0 : i32
    %c0_i32_0 = arith.constant 0 : i32
    %c0_i32_1 = arith.constant 0 : i32
    return %arg0, %c0_i32, %c0_i32_0 : i32, i32, i32
  }
}

</mosaic_0001>

<bundles_post_ra>
// kernel: cnn_model_forward.1
= control target key start
LH: loop header
LB: loop body
LE: loop exit
PB: predicated region body
PF: predicated region fallthrough
CT: control target
= control target key end

     0   :  { %s15317_s0 = inlined_call_operand.vmem [shape: f32[2,81,73], index: 0, kind: input, shape index: {}]   ;;  %s15318_s1 = inlined_call_operand.vmem [shape: f32[2,80,73], index: 1, kind: input, shape index: {}]   ;;  %s15319_s2 = inlined_call_operand.vmem [shape: bf16[5,73,280], index: 2, kind: input, shape index: {}]   ;;  %s15320_s3 = inlined_call_operand.vmem [shape: f32[1,280], index: 3, kind: input, shape index: {}]   ;;  %s15321_s4 = inlined_call_operand.vmem [shape: f32[1,280], index: 4, kind: input, shape index: {}]   ;;  %s15322_s5 = inlined_call_operand.vmem [shape: bf16[5,296,272], index: 5, kind: input, shape index: {}]   ;;  %s15323_s6 = inlined_call_operand.vmem [shape: f32[1,272], index: 6, kind: input, shape index: {}]   ;;  %s15324_s7 = inlined_call_operand.vmem [shape: f32[1,272], index: 7, kind: input, shape index: {}]   ;;  %s15325_s8 = inlined_call_operand.vmem [shape: bf16[5,304,256], index: 8, kind: input, shape index: {}]   ;;  %s15326_s9 = inlined_call_operand.vmem [shape: f32[1,256], index: 9, kind: input, shape index: {}]   ;;  %s15327_s10 = inlined_call_operand.vmem [shape: f32[1,256], index: 10, kind: input, shape index: {}]   ;;  %s15328_s11 = inlined_call_operand.vmem [shape: bf16[256,128], index: 11, kind: input, shape index: {}]   ;;  %s15329_s12 = inlined_call_operand.vmem [shape: bf16[256,128], index: 12, kind: input, shape index: {}]   ;;  %s15330_s13 = inlined_call_operand.vmem [shape: f32[1,128], index: 13, kind: input, shape index: {}]   ;;  %s15331_s14 = inlined_call_operand.vmem [shape: bf16[128,32], index: 14, kind: input, shape index: {}]   ;;  %s15332_s15 = inlined_call_operand.vmem [shape: f32[1,32], index: 15, kind: input, shape index: {}]   ;;  %s15333_s16 = inlined_call_operand.vmem [shape: bf16[32,8], index: 16, kind: input, shape index: {}]   ;;  %s15334_s17 = inlined_call_operand.vmem [shape: f32[1,8], index: 17, kind: input, shape index: {}]   ;;  %s15335_s18 = inlined_call_operand.hbm [shape: f32[2,1,8], index: 18, kind: output, shape index: {}]  }
   0x1   :  { %15348 = sst [smem:[#allocation14_spill]] %s15317_s0 }
   0x2   :  { %15349 = sst [smem:[#allocation15_spill]] %s15318_s1 }
   0x3   :  { %15350 = sst [smem:[#allocation16_spill]] %s15319_s2 }
   0x4   :  { %15351 = sst [smem:[#allocation17_spill]] %s15320_s3 }
   0x5   :  { %23 = vsyncpa [#allocation7], 0 }
   0x6   :  { %25 = vsyncpa [#allocation7 + $0x1], 0  ;;  %s12035_s27 = smov 0   ;;  %s12037_s28 = smov 0  }
   0x7   :  { %s12039_s29 = smov 0   ;;  %s12041_s30 = smov 0  }
   0x8 LB: > { %15352 = sst [smem:[#allocation9_spill]] %s11918_s27  ;;  %s12056_s0 = sadd.s32 4294967295, %s11930_s30   ;;  %s11930_s30 = sphi %s12041_s30, %s15386_s30   ;;  %s11926_s29 = sphi %s12039_s29, %s15391_s29   ;;  %s11922_s28 = sphi %s12037_s28, %s15390_s28   ;;  %s11918_s27 = sphi %s12035_s27, %s15389_s27  }
   0x9   : > { %15353 = sst [smem:[#allocation10_spill]] %s11926_s29  ;;  %s9005_s19 = sadd.s32 4294967294, %s11930_s30  }
   0xa   : > { %s12060_s1 = sadd.s32 1, %s11930_s30   ;;  %s426_s20 = sadd.s32 1, %s11926_s29 }
   0xb   : > { %15354 = sst [smem:[#allocation11_spill]] %s12060_s1  ;;  %s423_s21 = ssub.s32 %s11930_s30, %s12060_s1 }
   0xc   : > { %p436_p0 = scmp.ne.s32.totalorder %s11926_s29, %s11922_s28  ;;  %p424_p1 = scmp.eq.s32.totalorder %s423_s21, 0 }
   0xd   : > { %p437_p2 = scmp.eq.s32.totalorder %s12056_s0, 1  ;;  %p442_p3 = scmp.ne.s32.totalorder %s11922_s28, %s11918_s27 }
   0xe   : > { %p443_p4 = scmp.eq.s32.totalorder %s9005_s19, 1  ;;  %p9008_p7 = scmp.ge.s32.totalorder %s11930_s30, 1 }
   0xf   : > { %s12071_s22 = scalar_select %p424_p1, %s11926_s29, %s426_s20  }
  0x10   : > { %p12073_p5 = por %p437_p2, %p436_p0  ;;  %p12077_p6 = por %p443_p4, %p442_p3 }
  0x11   : > { %15355 = sst [smem:[#allocation12_spill]] %s12071_s22  ;;  %p525_p8 = scmp.lt.s32.totalorder %s11930_s30, 3 }
  0x12   : > { %s15357_s23 = scalar_select %p12077_p6, 1, 0 }
  0x13   : > { %p526_p9 = pnand %p9008_p7, %p525_p8 }
  0x14   : > { %15358 = sst [smem:[#allocation13_spill]] %s15357_s23  ;;  %s15359_s26 = sld [smem:[#allocation16_spill]] (!%p526_p9)  ;;  %v11932_v1 = vmov (!%p526_p9), 0.0   ;;  %vm759_vm0 = vcmask (!%p526_p9), 1043456   ;;  %vm760_vm1 = vcmask (!%p526_p9), 1044480   ;;  %v11933_v9 = vmov (!%p526_p9), 65535  }
  0x15   : > { %529 = sbr.rel (%p526_p9) target bundleno = 2574 (0xa0e), region = 92  ;;  %10486 = vmatprep.subr.bf16.mxu1 (!%p526_p9), %v11932_v1  ;;  %2469 = vst [vmem:[#allocation2] sm:$0xff] (!%p526_p9), %v11932_v1  ;;  %2470 = vst [vmem:[#allocation2 + $0x8] sm:$0xff] (!%p526_p9), %v11932_v1  ;;  %v761_v10 = vsel (!%p526_p9), %vm759_vm0, 4294967295, %v11933_v9  ;;  %vm11934_vm2 = vmmov (!%p526_p9), 0   ;;  %p583_p10 = scmp.lt.s32.totalorder (!%p526_p9), %s12056_s0, 1 }
  0x16   : > { %2473 = vst [vmem:[#allocation2 + $0x18] sm:$0xff] (!%p526_p9), %v11932_v1  ;;  %2474 = vst [vmem:[#allocation2 + $0x20] sm:$0xff] (!%p526_p9), %v11932_v1  ;;  %10496 = vmatprep.mubr.msk.bf16.mxu1 (!%p526_p9), %vm11934_vm2, %v11932_v1  ;;  %v12145_v16 = vsel (!%p526_p9), %vm760_vm1, %v761_v10, 0  ;;  %v15342_v17 = vmov (!%p526_p9), 0   ;;  %s15360_s29 = sld [smem:[#allocation15_spill]] (!%p526_p9)  ;;  %vm743_vm3 = vcmask (!%p526_p9), 596992  }
  0x17   : > { %2476 = vst [vmem:[#allocation2 + $0x30] sm:$0x1f] (!%p526_p9), %v11932_v1  ;;  %2477 = vst [vmem:[#allocation2 + $0x38] sm:$0x1f] (!%p526_p9), %v11932_v1  ;;  %804 = vmatprep.mubr.bf16.mxu0 (!%p526_p9), %v15342_v17  ;;  %vm1206_vm4 = vsmask.f32 (!%p526_p9), 7424 }
  0x18   : > { %2480 = vst [vmem:[#allocation3] sm:$0xff] (!%p526_p9), %v11932_v1  ;;  %2481 = vst [vmem:[#allocation3 + $0x8] sm:$0xff] (!%p526_p9), %v11932_v1  ;;  %vm1898_vm5 = vcmask (!%p526_p9), 1046528   ;;  %s15362_s3 = sld [smem:[#allocation17_spill]] (!%p526_p9)  ;;  %vm2471_vm6 = vcmask (!%p526_p9), 326656   ;;  %vm2488_vm7 = vcmask (!%p526_p9), 322560  }
  0x19   : > { %2483 = vst [vmem:[#allocation3 + $0x18] sm:$0xff] (!%p526_p9), %v11932_v1  ;;  %2484 = vst [vmem:[#allocation3 + $0x20] sm:$0xff] (!%p526_p9), %v11932_v1  ;;  %vm2478_vm8 = vcmask (!%p526_p9), 323584   ;;  %vm2519_vm11 = vcmask (!%p526_p9), 64512   ;;  %vm6523_vm13 = vcmask (!%p526_p9), 389120   ;;  %vm6519_vm14 = vcmask (!%p526_p9), 390144  }
  0x1a   : > { %v11064_v0 = vld [vmem:[%s15359_s26 + $0x7c] ss:$12 sps:$4 sm:$0xff] (!%p526_p9)   ;;  %2486 = vst [vmem:[#allocation3 + $0x30] sm:$0xf] (!%p526_p9), %v11932_v1  ;;  %2487 = vst [vmem:[#allocation3 + $0x38] sm:$0xf] (!%p526_p9), %v11932_v1 }
  0x1b   : > { %6517 = vst [vmem:[#allocation4] sm:$0x3f] (!%p526_p9), %v11932_v1  ;;  %6518 = vst [vmem:[#allocation4 + $0x8] sm:$0x3f] (!%p526_p9), %v11932_v1  ;;  %v11066_v2 = vld [vmem:[%s15359_s26 + $0x80] ss:$12 sps:$4 sm:$0xff] (!%p526_p9)   ;;  %772 = vmatprep.subr.bf16.mxu0 (!%p526_p9), %v11064_v0 }
  0x1c   : > { %6521 = vst [vmem:[#allocation5] sm:$0x1f] %v11932_v1  ;;  %6522 = vst [vmem:[#allocation5 + $0x8] sm:$0x1f] %v11932_v1  ;;  %v11067_v3 = vld [vmem:[%s15359_s26 + $0x78] ss:$12 sps:$4 sm:$0xff]   ;;  %10487 = vmatpush3.bf16.msra.mxu1 %v11066_v2 }
  0x1d   : > { %v11068_v4 = vld [vmem:[%s15359_s26 + $0x94] ss:$12 sps:$4 sm:$0xff]   ;;  %773 = vmatpush1.bf16.msra.mxu0 %v11067_v3  ;;  %10488 = vmatprep.subr.bf16.mxu1 %v11932_v1  ;;  %v11070_v5 = vld [vmem:[%s15359_s26 + $0x98] ss:$12 sps:$4 sm:$0xff]   ;;  %v11071_v6 = vld [vmem:[%s15359_s26 + $0x90] ss:$12 sps:$4 sm:$0xff]  }
  0x1e   : > { %774 = vmatprep.subr.bf16.mxu0 %v11068_v4  ;;  %v11072_v7 = vld [vmem:[%s15359_s26 + $0xac] ss:$12 sps:$4 sm:$0xff]   ;;  %v11074_v8 = vld [vmem:[%s15359_s26 + $0xb0] ss:$12 sps:$4 sm:$0xff]   ;;  %v11075_v11 = vld [vmem:[%s15359_s26 + $0xa8] ss:$12 sps:$4 sm:$0xff]  }
  0x1f   : > { %v11076_v12 = vld [vmem:[%s15359_s26 + $0xc4] ss:$12 sps:$4 sm:$0xff]   ;;  %v11078_v13 = vld [vmem:[%s15359_s26 + $0xc8] ss:$12 sps:$4 sm:$0xff]   ;;  %v11079_v14 = vld [vmem:[%s15359_s26 + $0xc0] ss:$12 sps:$4 sm:$0xff]  }
  0x20   : > { %10489 = vmatpush3.bf16.msra.mxu1 %v11070_v5  ;;  %v11080_v15 = vld [vmem:[%s15359_s26 + $0xdc] ss:$12 sps:$4 sm:$0x1f]   ;;  %v11082_v18 = vld [vmem:[%s15359_s26 + $0xe0] ss:$12 sps:$4 sm:$0x1f]  }
  0x21   : > { %775 = vmatpush1.bf16.msra.mxu0 %v11071_v6  ;;  %10490 = vmatprep.subr.bf16.mxu1 %v11932_v1  ;;  %s12152_s19 = scalar_select %p583_p10, %s12056_s0, 1  ;;  %v11083_v19 = vld [vmem:[%s15359_s26 + $0xd8] ss:$12 sps:$4 sm:$0x1f]   ;;  %v767_v20 = vand.u32 %v11080_v15, %v12145_v16  ;;  %v770_v21 = vand.u32 %v11082_v18, %v12145_v16  ;;  %v11087_v29 = vld [vmem:[%s15359_s26 + $0x8] ss:$12 sps:$4 sm:$0xff]  }
  0x22   : > { %776 = vmatprep.subr.bf16.mxu0 %v11072_v7  ;;  %v764_v22 = vand.u32 %v11083_v19, %v12145_v16  ;;  %v11086_v23 = vld [vmem:[%s15359_s26 + $0x4] ss:$12 sps:$4 sm:$0xff]   ;;  %v11084_v30 = vld [vmem:[%s15359_s26] ss:$12 sps:$4 sm:$0xff]   ;;  %v11090_v32 = vld [vmem:[%s15359_s26 + $0x1c] ss:$12 sps:$4 sm:$0xff]  }
  0x23   : > { %s11017_s21 = smul.u32 80, %s12152_s19  ;;  %v11091_v33 = vld [vmem:[%s15359_s26 + $0x20] ss:$12 sps:$4 sm:$0xff]   ;;  %v11088_v39 = vld [vmem:[%s15359_s26 + $0x18] ss:$12 sps:$4 sm:$0xff]   ;;  %s11939_s22 = smov [#allocation6]  }
  0x24   : > { %10491 = vmatpush3.bf16.msra.mxu1 %v11074_v8  ;;  %v11094_v42 = vld [vmem:[%s15359_s26 + $0x34] ss:$12 sps:$4 sm:$0xff]   ;;  %v11092_v45 = vld [vmem:[%s15359_s26 + $0x30] ss:$12 sps:$4 sm:$0xff]   ;;  %v11095_v47 = vld [vmem:[%s15359_s26 + $0x38] ss:$12 sps:$4 sm:$0xff]  }
  0x25   : > { %777 = vmatpush1.bf16.msra.mxu0 %v11075_v11  ;;  %10492 = vmatprep.subr.bf16.mxu1 %v11932_v1  ;;  %s12166_s1 = scalar_lea.vmem %s15360_s29, %s11017_s21  ;;  %v11102_v50 = vld [vmem:[%s15359_s26 + $0x64] ss:$12 sps:$4 sm:$0x1f]   ;;  %v11098_v53 = vld [vmem:[%s15359_s26 + $0x4c] ss:$12 sps:$4 sm:$0xff]   ;;  %s11016_s25 = smul.u32 88, %s12152_s19 }
  0x26   : > { %778 = vmatprep.subr.bf16.mxu0 %v11076_v12  ;;  %v605_v24 = vld [vmem:[%s12166_s1] sm:$0xff]  ;;  %v606_v25 = vld [vmem:[%s12166_s1 + $0x8] sm:$0xff]  ;;  %v607_v26 = vld [vmem:[%s12166_s1 + $0x10] sm:$0xff]  ;;  %v1024_v61 = vand.u32 %v11102_v50, %v12145_v16  ;;  %s15361_s21 = sld [smem:[#allocation14_spill]]  ;;  %s15346_s19 = smov 16  }
  0x27   : > { %v640_v27 = vpack.c.bf16 %v606_v25, %v605_v24  ;;  %v608_v28 = vld [vmem:[%s12166_s1 + $0x18] sm:$0xff]  ;;  %v609_v35 = vld [vmem:[%s12166_s1 + $0x20] sm:$0xff]  ;;  %v610_v38 = vld [vmem:[%s12166_s1 + $0x28] sm:$0xff]  ;;  %s581_s29 = sand.u32 1, %s11922_s28  }
  0x28   : > { %10493 = vmatpush3.bf16.msra.mxu1 %v11078_v13  ;;  %v641_v31 = vpack.c.bf16 %v608_v28, %v607_v26  ;;  %v642_v44 = vpack.c.bf16 %v610_v38, %v609_v35  ;;  %v611_v48 = vld [vmem:[%s12166_s1 + $0x30] sm:$0xff]  ;;  %v612_v49 = vld [vmem:[%s12166_s1 + $0x38] sm:$0xff]  ;;  %v11100_v55 = vld [vmem:[%s15359_s26 + $0x60] ss:$12 sps:$4 sm:$0x1f]   ;;  %s582_s23 = scalar_lea.vmem [#allocation6], %s581_s29 }
  0x29   : > { %779 = vmatpush1.bf16.msra.mxu0 %v11079_v14  ;;  %10494 = vmatprep.subr.bf16.mxu1 %v11932_v1  ;;  %v1551_v34 = vshll.u32 %v640_v27, 16  ;;  %v1549_v36 = vshrl.u32 %v640_v27, 16  ;;  %v643_v58 = vpack.c.bf16 %v612_v49, %v611_v48  ;;  %v11096_v59 = vld [vmem:[%s15359_s26 + $0x48] ss:$12 sps:$4 sm:$0xff]   ;;  %v11099_v60 = vld [vmem:[%s15359_s26 + $0x50] ss:$12 sps:$4 sm:$0xff]   ;;  %v1021_v3 = vand.u32 %v11100_v55, %v12145_v16 }
  0x2a   : > { %780 = vmatprep.subr.bf16.mxu0 %v767_v20  ;;  %v1555_v37 = vshll.u32 %v641_v31, 16  ;;  %v1559_v43 = vshrl.u32 %v641_v31, 16  ;;  %v1562_v52 = vshll.u32 %v642_v44, 16  ;;  %v1566_v57 = vshrl.u32 %v642_v44, 16  ;;  %v11106_v5 = vld [vmem:[%s15359_s26 + $0xf4] ss:$12 sps:$4 sm:$0xff]  }
  0x2b   : > { %v1553_v40 = vrot.slane %v1551_v34, 1  ;;  %v11103_v62 = vld [vmem:[%s15359_s26 + $0x68] ss:$12 sps:$4 sm:$0x1f]   ;;  %v1569_v0 = vshll.u32 %v643_v58, 16  ;;  %v613_v8 = vld [vmem:[%s12166_s1 + $0x40] sm:$0xff] }
  0x2c   : > { %10495 = vmatpush3.bf16.msra.mxu1 %v770_v21  ;;  %v1557_v41 = vrot.slane %v1555_v37, 1  ;;  %v1564_v56 = vrot.slane %v1562_v52, 1  ;;  %v1027_v4 = vand.u32 %v11103_v62, %v12145_v16  ;;  %v614_v9 = vld [vmem:[%s12166_s1 + $0x48] sm:$0xff]  ;;  %v1573_v11 = vshrl.u32 %v643_v58, 16  ;;  %s12270_s27 = scalar_lea.vmem %s15361_s21, %s11016_s25  ;;  %v11107_v26 = vld [vmem:[%s15359_s26 + $0xf8] ss:$12 sps:$4 sm:$0xff]  }
  0x2d   : > { %781 = vmatpush1.bf16.msra.mxu0 %v764_v22  ;;  %10516 = vmatprep.subr.bf16.mxu1 %v11932_v1  ;;  %v1554_v46 = vor.u32 %v1553_v40, %v1549_v36  ;;  %v1571_v6 = vrot.slane %v1569_v0, 1  ;;  %v12265_v10 = vpack.c.bf16 %v614_v9, %v613_v8  ;;  %v594_v13 = vld [vmem:[%s12270_s27] sm:$0xff]  ;;  %v595_v15 = vld [vmem:[%s12270_s27 + $0x8] sm:$0xff]  ;;  %v596_v18 = vld [vmem:[%s12270_s27 + $0x10] sm:$0xff]  ;;  %s11937_s21 = smov 8   ;;  %s8938_s20 = sshll.u32 %s582_s23, 4  ;;  %s15277_s20 = int_to_ptr.vmem [resolvable:$true] %s8938_s20 }
  0x2e   : > { %1029 = vmatprep.subr.bf16.mxu0 %v11086_v23  ;;  %v1561_v54 = vor.u32 %v1559_v43, %v1557_v41  ;;  %v1568_v2 = vor.u32 %v1566_v57, %v1564_v56  ;;  %v597_v19 = vld [vmem:[%s12270_s27 + $0x18] sm:$0xff]  ;;  %v598_v21 = vld [vmem:[%s12270_s27 + $0x20] sm:$0xff]  ;;  %v12287_v22 = vpack.c.bf16 %v595_v15, %v594_v13  ;;  %v599_v24 = vld [vmem:[%s12270_s27 + $0x28] sm:$0xff]  ;;  %s11872_s25 = sshll.u32 %s11939_s22, 4  ;;  %s11873_s25 = int_to_ptr.vmem [resolvable:$false] %s11872_s25 }
  0x2f   : > { %10497 = vmatmul.mubr.msk.bf16.vlgmr.msra.gmra.mrb[0].mxu1 %vm743_vm3, %v640_v27  ;;  %v12215_v51 = vsel %vm1206_vm4, %v1554_v46, %v1557_v41  ;;  %v1576_v12 = vshll.u32 %v12265_v10, 16  ;;  %v1575_v14 = vor.u32 %v1573_v11, %v1571_v6  ;;  %v11104_v23 = vld [vmem:[%s15359_s26 + $0xf0] ss:$12 sps:$4 sm:$0xff]   ;;  %v11108_v38 = vld [vmem:[%s15359_s26 + $0x108] ss:$12 sps:$4 sm:$0xff]   ;;  %v602_v40 = vld [vmem:[%s12270_s27 + $0x40] sm:$0xff]  ;;  %p11875_p0 = scmp.lt.s32.totalorder %s15277_s20, %s11873_s25 }
  0x30   : > { %9046 = vmatmul.mubr.msk.bf16.vlgmr.msra.gmra.mrb[0].mxu0 %vm743_vm3, %v640_v27  ;;  %10517 = vmatpush3.bf16.msra.mxu1 %v11087_v29  ;;  %v12239_v63 = vsel %vm1206_vm4, %v1561_v54, %v1564_v56  ;;  %v12253_v7 = vsel %vm1206_vm4, %v1568_v2, %v1571_v6  ;;  %v12300_v27 = vpack.c.bf16 %v597_v19, %v596_v18  ;;  %v600_v28 = vld [vmem:[%s12270_s27 + $0x30] sm:$0xff]  ;;  %v601_v29 = vld [vmem:[%s12270_s27 + $0x38] sm:$0xff]  ;;  %v11112_v43 = vld [vmem:[%s15359_s26 + $0x120] ss:$12 sps:$4 sm:$0xff]  }
  0x31   : > { %1030 = vmatpush1.bf16.msra.mxu0 %v11084_v30  ;;  %10500 = vmatprep.mubr.msk.bf16.mxu1 %vm11934_vm2, %v11932_v1  ;;  %v12284_v20 = vrot.slane %v1576_v12, 1  ;;  %v11110_v30 = vld [vmem:[%s15359_s26 + $0x10c] ss:$12 sps:$4 sm:$0xff]   ;;  %v11111_v34 = vld [vmem:[%s15359_s26 + $0x110] ss:$12 sps:$4 sm:$0xff]   ;;  %v12318_v35 = vpack.c.bf16 %v601_v29, %v600_v28 }
  0x32   : > { %814 = vmatprep.mubr.bf16.mxu0 %v15342_v17  ;;  %1031 = vmatprep.subr.bf16.mxu0 %v11090_v32  ;;  %v1899_v32 = vrot.slane %v12287_v22, 1  ;;  %v11118_v46 = vld [vmem:[%s15359_s26 + $0x13c] ss:$12 sps:$4 sm:$0xff]   ;;  %v11116_v49 = vld [vmem:[%s15359_s26 + $0x138] ss:$12 sps:$4 sm:$0xff]   ;;  %v1213_v6 = vshll.u32 %v12300_v27, 16 }
  0x33   : > { %10518 = vmatprep.subr.bf16.mxu1 %v11932_v1  ;;  %v12295_v25 = vsel %vm1206_vm4, %v1575_v14, %v12284_v20  ;;  %v11120_v52 = vld [vmem:[%s15359_s26 + $0x150] ss:$12 sps:$4 sm:$0x1f]   ;;  %v11123_v54 = vld [vmem:[%s15359_s26 + $0x158] ss:$12 sps:$4 sm:$0x1f]  }
  0x34   : > { %10519 = vmatpush3.bf16.msra.mxu1 %v11091_v33  ;;  %v1900_v33 = vrot.slane %v12300_v27, 1  ;;  %v1215_v9 = vrot.slane %v1213_v6, 1  ;;  %v11127_v11 = vld [vmem:[%s15359_s26 + $0x170] ss:$12 sps:$4 sm:$0xff]   ;;  %v11124_v12 = vld [vmem:[%s15359_s26 + $0x168] ss:$12 sps:$4 sm:$0xff]  }
  0x35   : > { %1032 = vmatpush1.bf16.msra.mxu0 %v11088_v39  ;;  %10520 = vmatprep.subr.bf16.mxu1 %v11932_v1  ;;  %v11114_v39 = vld [vmem:[%s15359_s26 + $0x124] ss:$12 sps:$4 sm:$0xff]   ;;  %v1217_v13 = vshrl.u32 %v12300_v27, 16  ;;  %v11131_v19 = vld [vmem:[%s15359_s26 + $0x188] ss:$12 sps:$4 sm:$0xff]   ;;  %v1227_v29 = vshll.u32 %v12318_v35, 16 }
  0x36   : > { %1033 = vmatprep.subr.bf16.mxu0 %v11094_v42  ;;  %v12321_v36 = vsel %vm1898_vm5, %v1899_v32, %v1900_v33  ;;  %v1904_v42 = vrot.slane %v12318_v35, 1  ;;  %v11130_v18 = vld [vmem:[%s15359_s26 + $0x184] ss:$12 sps:$4 sm:$0xff]   ;;  %v11138_v32 = vld [vmem:[%s15359_s26 + $0x1b4] ss:$12 sps:$4 sm:$0xff]  }
  0x37   : > { %10501 = vmatmul.mubr.msk.bf16.gmra.mrb[4].mxu1 %vm743_vm3, %v641_v31  ;;  %v11159_v6 = vld [vmem:[%s15359_s26 + $0x230] ss:$12 sps:$4 sm:$0xff]  }
  0x38   : > { %9047 = vmatmul.mubr.msk.bf16.gmra.mrb[4].mxu0 %vm743_vm3, %v641_v31  ;;  %10504 = vmatprep.mubr.msk.bf16.mxu1 %vm11934_vm2, %v11932_v1  ;;  %v12307_v31 = vpack.c.bf16 %v599_v24, %v598_v21  ;;  %v11128_v21 = vld [vmem:[%s15359_s26 + $0x180] ss:$12 sps:$4 sm:$0xff]   ;;  %v11134_v24 = vld [vmem:[%s15359_s26 + $0x19c] ss:$12 sps:$4 sm:$0xff]  }
  0x39   : > { %824 = vmatprep.mubr.bf16.mxu0 %v15342_v17  ;;  %1034 = vmatpush1.bf16.msra.mxu0 %v11092_v45  ;;  %v11115_v45 = vld [vmem:[%s15359_s26 + $0x128] ss:$12 sps:$4 sm:$0xff]  }
  0x3a   : > { %10521 = vmatpush3.bf16.msra.mxu1 %v11095_v47  ;;  %1035 = vmatprep.subr.bf16.mxu0 %v11098_v53  ;;  %v1902_v37 = vrot.slane %v12307_v31, 1  ;;  %v11122_v47 = vld [vmem:[%s15359_s26 + $0x154] ss:$12 sps:$4 sm:$0x1f]   ;;  %v1220_v15 = vshll.u32 %v12307_v31, 16 }
  0x3b   : > { %10522 = vmatprep.subr.bf16.mxu1 %v11932_v1  ;;  %v11119_v53 = vld [vmem:[%s15359_s26 + $0x140] ss:$12 sps:$4 sm:$0xff]   ;;  %v1337_v56 = vand.u32 %v11122_v47, %v12145_v16 }
  0x3c   : > { %v12335_v41 = vsel %vm1898_vm5, %v1900_v33, %v1902_v37  ;;  %v12353_v48 = vsel %vm1898_vm5, %v1902_v37, %v1904_v42  ;;  %v11136_v33 = vld [vmem:[%s15359_s26 + $0x1b0] ss:$12 sps:$4 sm:$0xff]   ;;  %v12469_v37 = vld [vmem:[#allocation2] sm:$0xff] }
  0x3d   : > { %1036 = vmatpush1.bf16.msra.mxu0 %v11096_v59  ;;  %v1334_v59 = vand.u32 %v11120_v52, %v12145_v16 }
  0x3e   : > { %10523 = vmatpush3.bf16.msra.mxu1 %v11099_v60  ;;  %1037 = vmatprep.subr.bf16.mxu0 %v1024_v61  ;;  %v1340_v60 = vand.u32 %v11123_v54, %v12145_v16  ;;  %v604_v61 = vld [vmem:[%s12270_s27 + $0x50] sm:$0x1] }
  0x3f   : > { %10505 = vmatmul.mubr.msk.bf16.gmra.mrb[8].mxu1 %vm743_vm3, %v642_v44  ;;  %10524 = vmatprep.subr.bf16.mxu1 %v11932_v1  ;;  %v1870_v62 = vpack.c.bf16 %v604_v61, %v604_v61  ;;  %v11154_v61 = vld [vmem:[%s15359_s26 + $0x214] ss:$12 sps:$4 sm:$0xff]  }
  0x40   : > { %9048 = vmatmul.mubr.msk.bf16.gmra.mrb[8].mxu0 %vm743_vm3, %v642_v44  ;;  %10508 = vmatprep.mubr.msk.bf16.mxu1 %vm11934_vm2, %v11932_v1  ;;  %v603_v44 = vld [vmem:[%s12270_s27 + $0x48] sm:$0xff] }
  0x41   : > { %834 = vmatprep.mubr.bf16.mxu0 %v15342_v17  ;;  %1038 = vmatpush1.bf16.msra.mxu0 %v1021_v3  ;;  %v12361_v50 = vpack.c.bf16 %v603_v44, %v602_v40  ;;  %v1908_v0 = vrot.slane %v1870_v62, 1  ;;  %v1209_v3 = vshll.u32 %v12287_v22, 16  ;;  %v11143_v40 = vld [vmem:[%s15359_s26 + $0x1d0] ss:$12 sps:$4 sm:$0x1f]  }
  0x42   : > { %10525 = vmatpush3.bf16.msra.mxu1 %v1027_v4  ;;  %1342 = vmatprep.subr.bf16.mxu0 %v11106_v5  ;;  %v1207_v4 = vshrl.u32 %v12287_v22, 16  ;;  %v11152_v62 = vld [vmem:[%s15359_s26 + $0x210] ss:$12 sps:$4 sm:$0xff]  }
  0x43   : > { %10546 = vmatprep.subr.bf16.mxu1 %v11932_v1  ;;  %v1906_v55 = vrot.slane %v12361_v50, 1  ;;  %v1211_v5 = vrot.slane %v1209_v3, 1  ;;  %v1238_v54 = vshrl.u32 %v12361_v50, 16  ;;  %v11162_v3 = vld [vmem:[%s15359_s26 + $0x244] ss:$12 sps:$4 sm:$0x1f]  }
  0x45   : > { %v12381_v57 = vsel %vm1898_vm5, %v1904_v42, %v1906_v55  ;;  %v12399_v2 = vsel %vm1898_vm5, %v1906_v55, %v1908_v0  ;;  %v1212_v8 = vor.u32 %v1211_v5, %v1207_v4  ;;  %v11158_v0 = vld [vmem:[%s15359_s26 + $0x22c] ss:$12 sps:$4 sm:$0xff]   ;;  %v11156_v4 = vld [vmem:[%s15359_s26 + $0x228] ss:$12 sps:$4 sm:$0xff]  }
  0x46   : > { %v11160_v5 = vld [vmem:[%s15359_s26 + $0x240] ss:$12 sps:$4 sm:$0x1f]  }
  0x47   : > { %10509 = vmatmul.mubr.msk.bf16.gmra.mrb[12].mxu1 %vm743_vm3, %v643_v58  ;;  %v1216_v14 = vsel %vm1206_vm4, %v1212_v8, %v1215_v9  ;;  %v11163_v8 = vld [vmem:[%s15359_s26 + $0x248] ss:$12 sps:$4 sm:$0x1f]  }
  0x48   : > { %9049 = vmatmul.mubr.msk.bf16.gmra.mrb[12].mxu0 %vm743_vm3, %v643_v58  ;;  %10512 = vmatprep.mubr.msk.bf16.mxu1 %vm11934_vm2, %v11932_v1  ;;  %v11126_v58 = vld [vmem:[%s15359_s26 + $0x16c] ss:$12 sps:$4 sm:$0xff]  }
  0x49   : > { %844 = vmatprep.mubr.bf16.mxu0 %v15342_v17 }
  0x4f   : > { %10513 = vmatmul.mubr.msk.bf16.gmra.mrb[16].mxu1 %vm743_vm3, %v12265_v10 }
  0x50   : > { %9050 = vmatmul.mubr.msk.bf16.gmra.mrb[16].mxu0 %vm743_vm3, %v12265_v10  ;;  %10526 = vmatprep.mubr.msk.bf16.mxu1 %vm11934_vm2, %v11932_v1 }
  0x51   : > { %1061 = vmatprep.mubr.bf16.mxu0 %v15342_v17 }
  0x57   : > { %10527 = vmatmul.mubr.msk.bf16.vlgmr.msra.gmra.mrb[0].mxu1 %vm743_vm3, %v12287_v22 }
  0x58   : > { %9071 = vmatmul.mubr.msk.bf16.vlgmr.msra.gmra.mrb[0].mxu0 %vm743_vm3, %v12287_v22  ;;  %10547 = vmatpush3.bf16.msra.mxu1 %v11107_v26  ;;  %v1219_v22 = vor.u32 %v1217_v13, %v1215_v9  ;;  %v1224_v26 = vshrl.u32 %v12307_v31, 16  ;;  %v2006_v9 = vand.u32 %v11162_v3, %v12145_v16 }
  0x59   : > { %1343 = vmatpush1.bf16.msra.mxu0 %v11104_v23  ;;  %10530 = vmatprep.mubr.msk.bf16.mxu1 %vm11934_vm2, %v11932_v1  ;;  %v1222_v23 = vrot.slane %v1220_v15, 1  ;;  %v12646_v15 = vld [vmem:[#allocation2] sm:$0xff] }
  0x5a   : > { %1071 = vmatprep.mubr.bf16.mxu0 %v15342_v17  ;;  %1344 = vmatprep.subr.bf16.mxu0 %v11110_v30  ;;  %v11135_v30 = vld [vmem:[%s15359_s26 + $0x1a0] ss:$12 sps:$4 sm:$0xff]   ;;  %2482 = vst.msk [vmem:[#allocation3 + $0x10] sm:$0xff] %vm2471_vm6, %v12646_v15  ;;  %2472 = vst.msk [vmem:[#allocation2 + $0x10] sm:$0xff] %vm2471_vm6, %v12646_v15 }
  0x5b   : > { %10548 = vmatprep.subr.bf16.mxu1 %v11932_v1  ;;  %v1223_v28 = vsel %vm1206_vm4, %v1219_v22, %v1222_v23  ;;  %2475 = vst.msk [vmem:[#allocation2 + $0x28] sm:$0xff] %vm2471_vm6, %v12646_v15  ;;  %2485 = vst.msk [vmem:[#allocation3 + $0x28] sm:$0xff] %vm2471_vm6, %v12646_v15  ;;  %v11169_v22 = vld [vmem:[%s15322_s5 + $0x1d8] ss:$12 sps:$4 sm:$0xff]  }
  0x5c   : > { %10549 = vmatpush3.bf16.msra.mxu1 %v11111_v34  ;;  %v11140_v34 = vld [vmem:[%s15359_s26 + $0x1c8] ss:$12 sps:$4 sm:$0x1f]   ;;  %2489 = vst.msk [vmem:[#allocation3 + $0x40] sm:$0xf] %vm2488_vm7, %v12646_v15 }
  0x5d   : > { %1345 = vmatpush1.bf16.msra.mxu0 %v11108_v38  ;;  %10550 = vmatprep.subr.bf16.mxu1 %v11932_v1  ;;  %v1226_v38 = vor.u32 %v1224_v26, %v1222_v23  ;;  %v1676_v47 = vand.u32 %v11140_v34, %v12145_v16  ;;  %2479 = vst.msk [vmem:[#allocation2 + $0x40] sm:$0x1f] %vm2478_vm8, %v12646_v15 }
  0x5e   : > { %1346 = vmatprep.subr.bf16.mxu0 %v11114_v39  ;;  %v11139_v39 = vld [vmem:[%s15359_s26 + $0x1b8] ss:$12 sps:$4 sm:$0xff]   ;;  %6524 = vst.msk [vmem:[#allocation5 + $0x10] sm:$0x1f] %vm6523_vm13, %v12646_v15 }
  0x5f   : > { %10531 = vmatmul.mubr.msk.bf16.gmra.mrb[4].mxu1 %vm743_vm3, %v12300_v27  ;;  %6520 = vst.msk [vmem:[#allocation4 + $0x10] sm:$0x3f] %vm6519_vm14, %v12646_v15 }
  0x60   : > { %9072 = vmatmul.mubr.msk.bf16.gmra.mrb[4].mxu0 %vm743_vm3, %v12300_v27  ;;  %10534 = vmatprep.mubr.msk.bf16.mxu1 %vm11934_vm2, %v11932_v1  ;;  %v11132_v27 = vld [vmem:[%s15359_s26 + $0x198] ss:$12 sps:$4 sm:$0xff]  }
  0x61   : > { %1081 = vmatprep.mubr.bf16.mxu0 %v15342_v17  ;;  %1347 = vmatpush1.bf16.msra.mxu0 %v11112_v43  ;;  %v1231_v43 = vshrl.u32 %v12318_v35, 16 }
  0x62   : > { %10551 = vmatpush3.bf16.msra.mxu1 %v11115_v45  ;;  %1348 = vmatprep.subr.bf16.mxu0 %v11118_v46  ;;  %v1234_v45 = vshll.u32 %v12361_v50, 16  ;;  %v11146_v46 = vld [vmem:[%s15359_s26 + $0x1e4] ss:$12 sps:$4 sm:$0xff]  }
  0x63   : > { %10552 = vmatprep.subr.bf16.mxu1 %v11932_v1 }
  0x64   : > { %v1236_v52 = vrot.slane %v1234_v45, 1 }
  0x65   : > { %1349 = vmatpush1.bf16.msra.mxu0 %v11116_v49  ;;  %v1682_v49 = vand.u32 %v11143_v40, %v12145_v16 }
  0x66   : > { %10553 = vmatpush3.bf16.msra.mxu1 %v11119_v53  ;;  %1350 = vmatprep.subr.bf16.mxu0 %v1337_v56  ;;  %v1240_v55 = vor.u32 %v1238_v54, %v1236_v52  ;;  %v11144_v56 = vld [vmem:[%s15359_s26 + $0x1e0] ss:$12 sps:$4 sm:$0xff]   ;;  %v11175_v54 = vld [vmem:[%s15322_s5 + $0x208] ss:$12 sps:$4 sm:$0xff]  }
  0x67   : > { %10535 = vmatmul.mubr.msk.bf16.gmra.mrb[8].mxu1 %vm743_vm3, %v12307_v31  ;;  %10554 = vmatprep.subr.bf16.mxu1 %v11932_v1 }
  0x68   : > { %9073 = vmatmul.mubr.msk.bf16.gmra.mrb[8].mxu0 %vm743_vm3, %v12307_v31  ;;  %10538 = vmatprep.mubr.msk.bf16.mxu1 %vm11934_vm2, %v11932_v1  ;;  %v11142_v31 = vld [vmem:[%s15359_s26 + $0x1cc] ss:$12 sps:$4 sm:$0x1f]  }
  0x69   : > { %1091 = vmatprep.mubr.bf16.mxu0 %v15342_v17  ;;  %1351 = vmatpush1.bf16.msra.mxu0 %v1334_v59  ;;  %v1679_v42 = vand.u32 %v11142_v31, %v12145_v16  ;;  %v11151_v59 = vld [vmem:[%s15359_s26 + $0x200] ss:$12 sps:$4 sm:$0xff]  }
  0x6a   : > { %10555 = vmatpush3.bf16.msra.mxu1 %v1340_v60  ;;  %1684 = vmatprep.subr.bf16.mxu0 %v11126_v58  ;;  %v11150_v58 = vld [vmem:[%s15359_s26 + $0x1fc] ss:$12 sps:$4 sm:$0xff]   ;;  %v11148_v60 = vld [vmem:[%s15359_s26 + $0x1f8] ss:$12 sps:$4 sm:$0xff]  }
  0x6b   : > { %10576 = vmatprep.subr.bf16.mxu1 %v11932_v1 }
  0x6f   : > { %10539 = vmatmul.mubr.msk.bf16.gmra.mrb[12].mxu1 %vm743_vm3, %v12318_v35 }
  0x70   : > { %9074 = vmatmul.mubr.msk.bf16.gmra.mrb[12].mxu0 %vm743_vm3, %v12318_v35  ;;  %10542 = vmatprep.mubr.msk.bf16.mxu1 %vm11934_vm2, %v11932_v1 }
  0x71   : > { %1101 = vmatprep.mubr.bf16.mxu0 %v15342_v17 }
  0x77   : > { %10543 = vmatmul.mubr.msk.bf16.gmra.mrb[16].mxu1 %vm743_vm3, %v12361_v50 }
  0x78   : > { %9075 = vmatmul.mubr.msk.bf16.gmra.mrb[16].mxu0 %vm743_vm3, %v12361_v50  ;;  %10556 = vmatprep.mubr.msk.bf16.mxu1 %vm11934_vm2, %v11932_v1  ;;  %v11147_v50 = vld [vmem:[%s15359_s26 + $0x1e8] ss:$12 sps:$4 sm:$0xff]  }
  0x79   : > { %1374 = vmatprep.mubr.bf16.mxu0 %v15342_v17 }
  0x7f   : > { %10557 = vmatmul.mubr.msk.bf16.vlgmr.msra.gmra.mrb[0].mxu1 %vm743_vm3, %v1216_v14 }
  0x80   : > { %9116 = vmatmul.mubr.msk.bf16.vlgmr.msra.gmra.mrb[0].mxu0 %vm743_vm3, %v1216_v14  ;;  %10577 = vmatpush3.bf16.msra.mxu1 %v11127_v11  ;;  %v2009_v11 = vand.u32 %v11163_v8, %v12145_v16 }
  0x81   : > { %1685 = vmatpush1.bf16.msra.mxu0 %v11124_v12  ;;  %10560 = vmatprep.mubr.msk.bf16.mxu1 %vm11934_vm2, %v11932_v1 }
  0x82   : > { %1384 = vmatprep.mubr.bf16.mxu0 %v15342_v17  ;;  %1686 = vmatprep.subr.bf16.mxu0 %v11130_v18 }
  0x83   : > { %10578 = vmatprep.subr.bf16.mxu1 %v11932_v1 }
  0x84   : > { %10579 = vmatpush3.bf16.msra.mxu1 %v11131_v19 }
  0x85   : > { %1687 = vmatpush1.bf16.msra.mxu0 %v11128_v21  ;;  %10580 = vmatprep.subr.bf16.mxu1 %v11932_v1  ;;  %v1229_v1 = vrot.slane %v1227_v29, 1  ;;  %v2392_v21 = vld [vmem:[%s15321_s4] sm:$0x7] }
  0x86   : > { %1688 = vmatprep.subr.bf16.mxu0 %v11134_v24 }
  0x87   : > { %10561 = vmatmul.mubr.msk.bf16.gmra.mrb[4].mxu1 %vm743_vm3, %v1223_v28  ;;  %v1230_v44 = vsel %vm1206_vm4, %v1226_v38, %v1229_v1  ;;  %v1233_v35 = vor.u32 %v1231_v43, %v1229_v1  ;;  %v11936_v38 = vmov 1966171168  }
  0x88   : > { %9117 = vmatmul.mubr.msk.bf16.gmra.mrb[4].mxu0 %vm743_vm3, %v1223_v28  ;;  %10564 = vmatprep.mubr.msk.bf16.mxu1 %vm11934_vm2, %v12469_v37  ;;  %v11167_v28 = vld [vmem:[%s15322_s5 + $0x1d4] ss:$12 sps:$4 sm:$0xff]   ;;  %v2495_v1 = vunpack.c.l.s4 %v11936_v38 }
  0x89   : > { %1394 = vmatprep.mubr.bf16.mxu0 %v15342_v17  ;;  %1689 = vmatpush1.bf16.msra.mxu0 %v11132_v27  ;;  %v1237_v53 = vsel %vm1206_vm4, %v1233_v35, %v1236_v52 }
  0x8a   : > { %10581 = vmatpush3.bf16.msra.mxu1 %v11135_v30  ;;  %1690 = vmatprep.subr.bf16.mxu0 %v11138_v32 }
  0x8b   : > { %10582 = vmatprep.subr.bf16.mxu1 %v12469_v37 }
  0x8d   : > { %1691 = vmatpush1.bf16.msra.mxu0 %v11136_v33  ;;  %v11172_v33 = vld [vmem:[%s15322_s5 + $0x1f0] ss:$12 sps:$4 sm:$0xff]  }
  0x8e   : > { %10583 = vmatpush3.bf16.msra.mxu1 %v11139_v39  ;;  %1692 = vmatprep.subr.bf16.mxu0 %v1679_v42 }
  0x8f   : > { %10565 = vmatmul.mubr.msk.bf16.gmra.mrb[8].mxu1 %vm743_vm3, %v1230_v44  ;;  %10584 = vmatprep.subr.bf16.mxu1 %v12469_v37 }
  0x90   : > { %9118 = vmatmul.mubr.msk.bf16.gmra.mrb[8].mxu0 %vm743_vm3, %v1230_v44  ;;  %10568 = vmatprep.mubr.msk.bf16.mxu1 %vm11934_vm2, %v12469_v37 }
  0x91   : > { %1404 = vmatprep.mubr.bf16.mxu0 %v15342_v17  ;;  %1693 = vmatpush1.bf16.msra.mxu0 %v1676_v47 }
  0x92   : > { %10585 = vmatpush3.bf16.msra.mxu1 %v1682_v49  ;;  %2011 = vmatprep.subr.bf16.mxu0 %v11146_v46  ;;  %v11170_v49 = vld [vmem:[%s15322_s5 + $0x1ec] ss:$12 sps:$4 sm:$0xff]  }
  0x93   : > { %10606 = vmatprep.subr.bf16.mxu1 %v12469_v37 }
  0x97   : > { %10569 = vmatmul.mubr.msk.bf16.gmra.mrb[12].mxu1 %vm743_vm3, %v1237_v53 }
  0x98   : > { %9119 = vmatmul.mubr.msk.bf16.gmra.mrb[12].mxu0 %vm743_vm3, %v1237_v53  ;;  %10572 = vmatprep.mubr.msk.bf16.mxu1 %vm11934_vm2, %v12469_v37 }
  0x99   : > { %1414 = vmatprep.mubr.bf16.mxu0 %v15342_v17 }
  0x9f   : > { %10573 = vmatmul.mubr.msk.bf16.gmra.mrb[16].mxu1 %vm743_vm3, %v1240_v55 }
  0xa0   : > { %9120 = vmatmul.mubr.msk.bf16.gmra.mrb[16].mxu0 %vm743_vm3, %v1240_v55  ;;  %10586 = vmatprep.mubr.msk.bf16.mxu1 %vm11934_vm2, %v12469_v37  ;;  %v2496_v55 = vunpack.c.0.s8 %v2495_v1 }
  0xa1   : > { %1716 = vmatprep.mubr.bf16.mxu0 %v15342_v17 }
  0xa7   : > { %10587 = vmatmul.mubr.msk.bf16.vlgmr.msra.gmra.mrb[0].mxu1 %vm743_vm3, %v12215_v51 }
  0xa8   : > { %9161 = vmatmul.mubr.msk.bf16.vlgmr.msra.gmra.mrb[0].mxu0 %vm743_vm3, %v12215_v51  ;;  %10607 = vmatpush3.bf16.msra.mxu1 %v11147_v50  ;;  %v11155_v51 = vld [vmem:[%s15359_s26 + $0x218] ss:$12 sps:$4 sm:$0xff]  }
  0xa9   : > { %2012 = vmatpush1.bf16.msra.mxu0 %v11144_v56  ;;  %10590 = vmatprep.mubr.msk.bf16.mxu1 %vm11934_vm2, %v12469_v37 }
  0xaa   : > { %1726 = vmatprep.mubr.bf16.mxu0 %v15342_v17  ;;  %2013 = vmatprep.subr.bf16.mxu0 %v11150_v58 }
  0xab   : > { %10608 = vmatprep.subr.bf16.mxu1 %v12469_v37 }
  0xac   : > { %10609 = vmatpush3.bf16.msra.mxu1 %v11151_v59 }
  0xad   : > { %2014 = vmatpush1.bf16.msra.mxu0 %v11148_v60  ;;  %10610 = vmatprep.subr.bf16.mxu1 %v12469_v37 }
  0xae   : > { %2015 = vmatprep.subr.bf16.mxu0 %v11154_v61 }
  0xaf   : > { %10591 = vmatmul.mubr.msk.bf16.gmra.mrb[4].mxu1 %vm743_vm3, %v12239_v63 }
  0xb0   : > { %9162 = vmatmul.mubr.msk.bf16.gmra.mrb[4].mxu0 %vm743_vm3, %v12239_v63  ;;  %10594 = vmatprep.mubr.msk.bf16.mxu1 %vm11934_vm2, %v12469_v37  ;;  %v2003_v63 = vand.u32 %v11160_v5, %v12145_v16  ;;  %v1580_v16 = vshrl.u32 %v12265_v10, 16  ;;  %v15344_v10 = vlaneseq }
  0xb1   : > { %1736 = vmatprep.mubr.bf16.mxu0 %v15342_v17  ;;  %2016 = vmatpush1.bf16.msra.mxu0 %v11152_v62 }
  0xb2   : > { %10611 = vmatpush3.bf16.msra.mxu1 %v11155_v51  ;;  %2017 = vmatprep.subr.bf16.mxu0 %v11158_v0 }
  0xb3   : > { %10612 = vmatprep.subr.bf16.mxu1 %v12469_v37 }
  0xb5   : > { %2018 = vmatpush1.bf16.msra.mxu0 %v11156_v4 }
  0xb6   : > { %10613 = vmatpush3.bf16.msra.mxu1 %v11159_v6  ;;  %2019 = vmatprep.subr.bf16.mxu0 %v2006_v9 }
  0xb7   : > { %10595 = vmatmul.mubr.msk.bf16.gmra.mrb[8].mxu1 %vm743_vm3, %v12253_v7  ;;  %10614 = vmatprep.subr.bf16.mxu1 %v12469_v37 }
  0xb8   : > { %9163 = vmatmul.mubr.msk.bf16.gmra.mrb[8].mxu0 %vm743_vm3, %v12253_v7  ;;  %10598 = vmatprep.mubr.msk.bf16.mxu1 %vm11934_vm2, %v12469_v37  ;;  %v1582_v7 = vor.u32 %v1580_v16, %v12284_v20  ;;  %v12626_v20 = vshrl.u32 %v15344_v10, 7 }
  0xb9   : > { %1746 = vmatprep.mubr.bf16.mxu0 %v15342_v17  ;;  %2020 = vmatpush1.bf16.msra.mxu0 %v2003_v63 }
  0xba   : > { %10615 = vmatpush3.bf16.msra.mxu1 %v2009_v11  ;;  %v12641_v13 = vsub.s32 2, %v12626_v20  ;;  %v12644_v14 = vsub.s32 1, %v12626_v20  ;;  %v11173_v11 = vld [vmem:[%s15322_s5 + $0x204] ss:$12 sps:$4 sm:$0xff]  }
  0xbc   : > { %v12698_v53 = vrot.slane %v2392_v21, %v12644_v14  ;;  %v12710_v3 = vrot.slane %v2392_v21, %v12641_v13 }
  0xbf   : > { %10599 = vmatmul.mubr.msk.bf16.gmra.mrb[12].mxu1 %vm743_vm3, %v12295_v25 }
  0xc0   : > { %9164 = vmatmul.mubr.msk.bf16.gmra.mrb[12].mxu0 %vm743_vm3, %v12295_v25  ;;  %10602 = vmatprep.mubr.msk.bf16.mxu1 %vm11934_vm2, %v12469_v37  ;;  %v2345_v25 = vld [vmem:[%s15362_s3] sm:$0x7]  ;;  %s15381_s3 = smov 16  }
  0xc1   : > { %1756 = vmatprep.mubr.bf16.mxu0 %v15342_v17  ;;  %v12682_v42 = vrot.slane %v2345_v25, %v12641_v13  ;;  %v12686_v44 = vrot.slane %v2345_v25, %v12644_v14 }
  0xc7   : > { %10603 = vmatmul.mubr.msk.bf16.gmra.mrb[16].mxu1 %vm743_vm3, %v1582_v7 }
  0xc8   : > { %9165 = vmatmul.mubr.msk.bf16.gmra.mrb[16].mxu0 %vm743_vm3, %v1582_v7  ;;  %10616 = vmatprep.mubr.msk.bf16.mxu1 %vm11934_vm2, %v12469_v37 }
  0xc9   : > { %2043 = vmatprep.mubr.bf16.mxu0 %v15342_v17 }
  0xcf   : > { %10617 = vmatmul.mubr.msk.bf16.vlgmr.msra.gmra.mrb[0].mxu1 %vm743_vm3, %v12321_v36 }
  0xd0   : > { %9206 = vmatmul.mubr.msk.bf16.vlgmr.msra.gmra.mrb[0].mxu0 %vm743_vm3, %v12321_v36  ;;  %10620 = vmatprep.mubr.msk.bf16.mxu1 %vm11934_vm2, %v12469_v37  ;;  %v12632_v36 = vsub.s32 0, %v12626_v20 }
  0xd1   : > { %2053 = vmatprep.mubr.bf16.mxu0 %v15342_v17 }
  0xd2   : > { %v12672_v32 = vrot.slane %v2345_v25, %v12632_v36  ;;  %v12690_v47 = vrot.slane %v2392_v21, %v12632_v36 }
  0xd7   : > { %10621 = vmatmul.mubr.msk.bf16.gmra.mrb[4].mxu1 %vm743_vm3, %v12335_v41 }
  0xd8   : > { %9207 = vmatmul.mubr.msk.bf16.gmra.mrb[4].mxu0 %vm743_vm3, %v12335_v41  ;;  %10624 = vmatprep.mubr.msk.bf16.mxu1 %vm11934_vm2, %v12469_v37 }
  0xd9   : > { %2063 = vmatprep.mubr.bf16.mxu0 %v15342_v17 }
  0xdf   : > { %10625 = vmatmul.mubr.msk.bf16.gmra.mrb[8].mxu1 %vm743_vm3, %v12353_v48 }
  0xe0   : > { %9208 = vmatmul.mubr.msk.bf16.gmra.mrb[8].mxu0 %vm743_vm3, %v12353_v48  ;;  %10628 = vmatprep.mubr.msk.bf16.mxu1 %vm11934_vm2, %v12469_v37  ;;  %v11164_v48 = vld [vmem:[%s15322_s5 + $0x1bc] ss:$12 sps:$4 sm:$0xff]  }
  0xe1   : > { %2073 = vmatprep.mubr.bf16.mxu0 %v15342_v17 }
  0xe7   : > { %10629 = vmatmul.mubr.msk.bf16.gmra.mrb[12].mxu1 %vm743_vm3, %v12381_v57 }
  0xe8   : > { %9209 = vmatmul.mubr.msk.bf16.gmra.mrb[12].mxu0 %vm743_vm3, %v12381_v57  ;;  %10632 = vmatprep.mubr.msk.bf16.mxu1 %vm11934_vm2, %v12469_v37  ;;  %v11166_v57 = vld [vmem:[%s15322_s5 + $0x1c0] ss:$12 sps:$4 sm:$0xff]  }
  0xe9   : > { %2083 = vmatprep.mubr.bf16.mxu0 %v15342_v17  ;;  %3815 = vmatprep.subr.bf16.mxu0 %v11166_v57 }
  0xea   : > { %3816 = vmatpush1.bf16.msra.mxu0 %v11164_v48 }
  0xeb   : > { %3817 = vmatprep.subr.bf16.mxu0 %v11169_v22 }
  0xee   : > { %3818 = vmatpush1.bf16.msra.mxu0 %v11167_v28 }
  0xef   : > { %10633 = vmatmul.mubr.msk.bf16.gmra.mrb[16].mxu1 %vm743_vm3, %v12399_v2  ;;  %3819 = vmatprep.subr.bf16.mxu0 %v11172_v33 }
  0xf0   : > { %9210 = vmatmul.mubr.msk.bf16.gmra.mrb[16].mxu0 %vm743_vm3, %v12399_v2  ;;  %vm7008_vm3 = vcmask 392192  }
  0xf2   : > { %3820 = vmatpush1.bf16.msra.mxu0 %v11170_v49 }
  0xf3   : > { %3821 = vmatprep.subr.bf16.mxu0 %v11175_v54 }
  0xf6   : > { %3822 = vmatpush1.bf16.msra.mxu0 %v11173_v11 }
 0x1a2   : > { %v2128_v41 = vpop.f32.mrb[0].mxu1 }
 0x1a3   : > { %v2045_v2 = vpop.f32.mrb[0].mxu0  ;;  %v10618_v12 = vpop.f32.mrb[1].mxu1  ;;  %v2234_v23 = vrot.slane %v2128_v41, 1 }
 0x1a4   : > { %v2047_v18 = vpop.f32.mrb[1].mxu0  ;;  %v12656_v19 = vpop.f32.mrb[2].mxu1  ;;  %v2228_v29 = vrot.slane %v2045_v2, 1 }
 0x1a5   : > { %v2235_v24 = vrot.slane %v12656_v19, 1  ;;  %v12665_v26 = vpop.f32.mrb[2].mxu0  ;;  %v10619_v27 = vpop.f32.mrb[3].mxu1  ;;  %v2231_v34 = vrot.slane %v2047_v18, 1 }
 0x1a6   : > { %v2229_v30 = vrot.slane %v12665_v26, 1  ;;  %v12674_v31 = vpop.f32.mrb[3].mxu0 }
 0x1a7   : > { %v2236_v37 = vsel %vm1898_vm5, %v2234_v23, %v2235_v24  ;;  %v2232_v39 = vrot.slane %v12674_v31, 1 }
 0x1a8   : > { %v2317_v40 = vmax.f32 %v2128_v41, %v2236_v37  ;;  %v2230_v43 = vsel %vm1898_vm5, %v2228_v29, %v2229_v30 }
 0x1a9   : > { %v2315_v45 = vmax.f32 %v2045_v2, %v2230_v43  ;;  %v2233_v46 = vsel %vm1898_vm5, %v2231_v34, %v2232_v39 }
 0x1aa   : > { %v2316_v35 = vmax.f32 %v2047_v18, %v2233_v46  ;;  %v12695_v52 = vpop.f32.mrb[4].mxu1  ;;  %v2364_v60 = vmul.f32 %v12682_v42, %v2317_v40 }
 0x1ab   : > { %v2362_v50 = vmul.f32 %v12672_v32, %v2315_v45  ;;  %v2241_v56 = vrot.slane %v12695_v52, 1  ;;  %v2055_v58 = vpop.f32.mrb[4].mxu0  ;;  %v10622_v59 = vpop.f32.mrb[5].mxu1 }
 0x1ac   : > { %v2363_v61 = vmul.f32 %v12686_v44, %v2316_v35  ;;  %v2237_v62 = vrot.slane %v2055_v58, 1  ;;  %v2057_v51 = vpop.f32.mrb[5].mxu0  ;;  %v12707_v0 = vpop.f32.mrb[6].mxu1  ;;  %v2411_v27 = vadd.f32 %v12710_v3, %v2364_v60 }
 0x1ad   : > { %v2242_v4 = vsel %vm1898_vm5, %v2235_v24, %v2241_v56  ;;  %v2239_v5 = vrot.slane %v2057_v51, 1  ;;  %v2247_v6 = vrot.slane %v12707_v0, 1  ;;  %v2059_v8 = vpop.f32.mrb[6].mxu0  ;;  %v10623_v9 = vpop.f32.mrb[7].mxu1  ;;  %v2409_v63 = vadd.f32 %v12690_v47, %v2362_v50 }
 0x1ae   : > { %v2320_v16 = vmax.f32 %v12656_v19, %v2242_v4  ;;  %v2238_v7 = vsel %vm1898_vm5, %v2229_v30, %v2237_v62  ;;  %v2243_v25 = vrot.slane %v2059_v8, 1  ;;  %v2061_v41 = vpop.f32.mrb[7].mxu0  ;;  %v2410_v48 = vadd.f32 %v12698_v53, %v2363_v61 }
 0x1af   : > { %v2318_v57 = vmax.f32 %v12665_v26, %v2238_v7  ;;  %v2240_v2 = vsel %vm1898_vm5, %v2232_v39, %v2239_v5  ;;  %v2248_v12 = vsel %vm1898_vm5, %v2241_v56, %v2247_v6  ;;  %v2245_v18 = vrot.slane %v2061_v41, 1 }
 0x1b0   : > { %v2319_v21 = vmax.f32 %v12674_v31, %v2240_v2  ;;  %v2323_v22 = vmax.f32 %v12695_v52, %v2248_v12  ;;  %v2244_v19 = vsel %vm1898_vm5, %v2237_v62, %v2243_v25  ;;  %v2439_v28 = vmax.f32 %v2409_v63, 0.0  ;;  %v11176_v63 = vld [vmem:[%s15322_s5 + $0x21c] ss:$12 sps:$4 sm:$0xff]  }
 0x1b1   : > { %v2321_v23 = vmax.f32 %v2055_v58, %v2244_v19  ;;  %v2246_v24 = vsel %vm1898_vm5, %v2239_v5, %v2245_v18  ;;  %v12730_v26 = vsub.s32 %v2496_v55, %v12626_v20  ;;  %v12733_v29 = vmul.f32 %v12682_v42, %v2320_v16 }
 0x1b2   : > { %v2322_v30 = vmax.f32 %v2057_v51, %v2246_v24  ;;  %v12735_v33 = vpop.f32.mrb[8].mxu1  ;;  %v2440_v31 = vmax.f32 %v2410_v48, 0.0  ;;  %v2365_v34 = vmul.f32 %v12672_v32, %v2318_v57  ;;  %v12739_v37 = vmul.f32 %v12686_v44, %v2319_v21 }
 0x1b3   : > { %v2368_v38 = vmul.f32 %v12672_v32, %v2321_v23  ;;  %v2253_v1 = vrot.slane %v12735_v33, 1  ;;  %v2065_v39 = vpop.f32.mrb[8].mxu0  ;;  %v10626_v40 = vpop.f32.mrb[9].mxu1  ;;  %v12752_v58 = vmax.f32 %v2411_v27, 0.0  ;;  %v12774_v11 = vmul.f32 %v12682_v42, %v2323_v22 }
 0x1b4   : > { %v2369_v20 = vmul.f32 %v12686_v44, %v2322_v30  ;;  %v2249_v43 = vrot.slane %v2065_v39, 1  ;;  %v2067_v45 = vpop.f32.mrb[9].mxu0  ;;  %v12744_v46 = vpop.f32.mrb[10].mxu1  ;;  %v2493_v49 = vcombine.low %v2439_v28, %v2440_v31  ;;  %v12746_v35 = vcombine.high %v2439_v28, %v2440_v31 }
 0x1b5   : > { %v2254_v52 = vsel %vm1898_vm5, %v2247_v6, %v2253_v1  ;;  %v2251_v54 = vrot.slane %v2067_v45, 1  ;;  %v2259_v55 = vrot.slane %v12744_v46, 1  ;;  %v12750_v50 = vpop.f32.mrb[10].mxu0  ;;  %v10627_v56 = vpop.f32.mrb[11].mxu1  ;;  %v12755_v59 = vadd.f32 %v12690_v47, %v2368_v38 }
 0x1b6   : > { %v2326_v60 = vmax.f32 %v12707_v0, %v2254_v52  ;;  %v2250_v61 = vsel %vm1898_vm5, %v2243_v25, %v2249_v43  ;;  %v2255_v62 = vrot.slane %v12750_v50, 1  ;;  %v12760_v51 = vpop.f32.mrb[11].mxu0  ;;  %v12763_v4 = vadd.f32 %v12698_v53, %v2369_v20  ;;  %v11178_v0 = vld [vmem:[%s15322_s5 + $0x220] ss:$12 sps:$4 sm:$0xff]  }
 0x1b7   : > { %v2324_v5 = vmax.f32 %v2059_v8, %v2250_v61  ;;  %v2252_v6 = vsel %vm1898_vm5, %v2245_v18, %v2251_v54  ;;  %v2260_v9 = vsel %vm1898_vm5, %v2253_v1, %v2259_v55  ;;  %v12778_v8 = vadd.f32 %v12690_v47, %v2365_v34  ;;  %3823 = vmatprep.subr.bf16.mxu0 %v11178_v0  ;;  %v11179_v0 = vld [vmem:[%s15322_s5 + $0x234] ss:$12 sps:$4 sm:$0xff]  }
 0x1b8   : > { %v2325_v16 = vmax.f32 %v2061_v41, %v2252_v6  ;;  %v2329_v7 = vmax.f32 %v12735_v33, %v2260_v9  ;;  %v2256_v48 = vsel %vm1898_vm5, %v2249_v43, %v2255_v62  ;;  %v2257_v57 = vrot.slane %v12760_v51, 1  ;;  %3824 = vmatpush1.bf16.msra.mxu0 %v11176_v63 }
 0x1b9   : > { %v2371_v25 = vmul.f32 %v12672_v32, %v2324_v5  ;;  %v2500_v2 = vrot.slane %v2493_v49, %v12730_v26  ;;  %v2445_v12 = vmax.f32 %v12755_v59, 0.0  ;;  %v2327_v21 = vmax.f32 %v2065_v39, %v2256_v48 }
 0x1ba   : > { %v2372_v18 = vmul.f32 %v12686_v44, %v2325_v16  ;;  %v12786_v41 = vpop.f32.mrb[12].mxu1  ;;  %v2507_v22 = vrot.slane %v12752_v58, %v12730_v26  ;;  %v2446_v19 = vmax.f32 %v12763_v4, 0.0  ;;  %v2258_v24 = vsel %vm1898_vm5, %v2251_v54, %v2257_v57 }
 0x1bb   : > { %v12792_v23 = vadd.f32 %v12690_v47, %v2371_v25  ;;  %v2265_v27 = vrot.slane %v12786_v41, 1  ;;  %v2075_v28 = vpop.f32.mrb[12].mxu0  ;;  %v10630_v30 = vpop.f32.mrb[13].mxu1  ;;  %v2374_v31 = vmul.f32 %v12672_v32, %v2327_v21  ;;  %v2328_v34 = vmax.f32 %v2067_v45, %v2258_v24 }
 0x1bc   : > { %v12797_v33 = vadd.f32 %v12698_v53, %v2372_v18  ;;  %v2508_v38 = vcombine.low %v2500_v2, %v2507_v22  ;;  %v12800_v1 = vpop.f32.mrb[13].mxu0  ;;  %v12802_v39 = vpop.f32.mrb[14].mxu1  ;;  %v12805_v40 = vmul.f32 %v12682_v42, %v2326_v60  ;;  %v2261_v43 = vrot.slane %v2075_v28, 1 }
 0x1bd   : > { %v2266_v20 = vsel %vm1898_vm5, %v2259_v55, %v2265_v27  ;;  %v2263_v49 = vrot.slane %v12800_v1, 1  ;;  %v12809_v52 = vpop.f32.mrb[14].mxu0  ;;  %v10631_v54 = vpop.f32.mrb[15].mxu1  ;;  %v12812_v56 = vadd.f32 %v12690_v47, %v2374_v31  ;;  %v2375_v45 = vmul.f32 %v12686_v44, %v2328_v34 }
 0x1be   : > { %v2332_v61 = vmax.f32 %v12744_v46, %v2266_v20  ;;  %v2529_v5 = vcombine.high %v12752_v58, %v12752_v58  ;;  %v12818_v60 = vpop.f32.mrb[15].mxu0  ;;  %v12821_v55 = vrot.slane %v2508_v38, %v12730_v26  ;;  %v2262_v6 = vsel %vm1898_vm5, %v2255_v62, %v2261_v43  ;;  %v11181_v46 = vld [vmem:[%s15322_s5 + $0x238] ss:$12 sps:$4 sm:$0xff]  }
 0x1bf   : > { %v2264_v9 = vsel %vm1898_vm5, %v2257_v57, %v2263_v49  ;;  %v2271_v63 = vrot.slane %v12802_v39, 1  ;;  %v2449_v16 = vmax.f32 %v12797_v33, 0.0  ;;  %v12835_v25 = vmul.f32 %v12682_v42, %v2329_v7  ;;  %3825 = vmatprep.subr.bf16.mxu0 %v11181_v46 }
 0x1c0   : > { %v2330_v62 = vmax.f32 %v12750_v50, %v2262_v6  ;;  %v12839_v48 = vadd.f32 %v12698_v53, %v2375_v45  ;;  %2516 = vrot.lane.b32.xlu0 %v12821_v55, %s11937_s21  ;;  %v2331_v57 = vmax.f32 %v12760_v51, %v2264_v9  ;;  %v2267_v18 = vrot.slane %v12809_v52, 1  ;;  %3826 = vmatpush1.bf16.msra.mxu0 %v11179_v0 }
 0x1c1   : > { %v2272_v2 = vsel %vm1898_vm5, %v2265_v27, %v2271_v63  ;;  %v2536_v22 = vrot.slane %v12746_v35, %v12730_v26  ;;  %v2543_v27 = vrot.slane %v2529_v5, %v12730_v26  ;;  %v2269_v31 = vrot.slane %v12818_v60, 1 }
 0x1c2   : > { %v2377_v7 = vmul.f32 %v12672_v32, %v2330_v62  ;;  %v2335_v50 = vmax.f32 %v12786_v41, %v2272_v2  ;;  %v12851_v24 = vpop.f32.mrb[16].mxu1  ;;  %v2378_v30 = vmul.f32 %v12686_v44, %v2331_v57  ;;  %v2268_v51 = vsel %vm1898_vm5, %v2261_v43, %v2267_v18 }
 0x1c3   : > { %v12859_v34 = vpop.f32.mrb[16].mxu0  ;;  %v10634_v38 = vpop.f32.mrb[17].mxu1  ;;  %v12862_v41 = vmul.f32 %v12682_v42, %v2332_v61  ;;  %v2333_v20 = vmax.f32 %v2075_v28, %v2268_v51  ;;  %v2413_v54 = vadd.f32 %v12698_v53, %v12739_v37  ;;  %v2544_v5 = vcombine.low %v2536_v22, %v2543_v27  ;;  %v11185_v51 = vld [vmem:[%s15322_s5 + $0x264] ss:$12 sps:$4 sm:$0xff]  }
 0x1c4   : > { %v12865_v35 = vadd.f32 %v12690_v47, %v2377_v7  ;;  %v2163_v45 = vpop.f32.mrb[18].mxu1  ;;  %v12869_v6 = vpop.f32.mrb[17].mxu0  ;;  %v2270_v9 = vsel %vm1898_vm5, %v2263_v49, %v2269_v31  ;;  %v2414_v61 = vadd.f32 %v12710_v3, %v12733_v29  ;;  %v12880_v28 = vadd.f32 %v12698_v53, %v2378_v30 }
 0x1c5   : > { %v12877_v0 = vpop.f32.mrb[18].mxu0  ;;  %v10635_v46 = vpop.f32.mrb[19].mxu1  ;;  %v2380_v37 = vmul.f32 %v12672_v32, %v2333_v20  ;;  %v2334_v62 = vmax.f32 %v12800_v1, %v2270_v9  ;;  %v2442_v57 = vmax.f32 %v12778_v8, 0.0  ;;  %v12888_v7 = vmul.f32 %v12682_v42, %v2335_v50  ;;  %v11182_v1 = vld [vmem:[%s15322_s5 + $0x24c] ss:$12 sps:$4 sm:$0xff]  }
 0x1c6   : > { %v12885_v2 = vpop.f32.mrb[19].mxu0  ;;  %v12891_v49 = vrot.slane %v2544_v5, %v12730_v26  ;;  %v2443_v29 = vmax.f32 %v2413_v54, 0.0  ;;  %v2444_v22 = vmax.f32 %v2414_v61, 0.0  ;;  %v2277_v27 = vrot.slane %v12851_v24, 1  ;;  %v11184_v50 = vld [vmem:[%s15322_s5 + $0x250] ss:$12 sps:$4 sm:$0xff]  }
 0x1c7   : > { %v12895_v30 = vadd.f32 %v12690_v47, %v2380_v37  ;;  %v2417_v8 = vadd.f32 %v12710_v3, %v12774_v11  ;;  %v2381_v38 = vmul.f32 %v12686_v44, %v2334_v62  ;;  %v2629_v11 = vcombine.low %v2445_v12, %v2446_v19  ;;  %3827 = vmatprep.subr.bf16.mxu0 %v11184_v50 }
 0x1c8   : > { %2552 = vrot.lane.b32.xlu0 %v12891_v49, %s11937_s21  ;;  %v2563_v20 = vcombine.low %v2442_v57, %v2443_v29  ;;  %v2595_v54 = vcombine.high %v2444_v22, %v2444_v22  ;;  %v2577_v9 = vrot.slane %v2444_v22, %v12730_v26  ;;  %v2278_v61 = vsel %vm1898_vm5, %v2271_v63, %v2277_v27  ;;  %v11187_v63 = vld [vmem:[%s15322_s5 + $0x268] ss:$12 sps:$4 sm:$0xff]  }
 0x1c9   : > { %v12916_v46 = vmax.f32 %v2417_v8, 0.0  ;;  %v2338_v62 = vmax.f32 %v12802_v39, %v2278_v61  ;;  %v2636_v17 = vrot.slane %v2629_v11, %v12730_v26  ;;  %v2273_v10 = vrot.slane %v12859_v34, 1  ;;  %3828 = vmatpush1.bf16.msra.mxu0 %v11182_v1 }
 0x1ca   : > { %v2570_v37 = vrot.slane %v2563_v20, %v12730_v26  ;;  %v2283_v50 = vrot.slane %v2163_v45, 1  ;;  %v2594_v39 = vcombine.high %v2442_v57, %v2443_v29  ;;  %v12932_v20 = vadd.f32 %v12698_v53, %v2381_v38  ;;  %3829 = vmatprep.subr.bf16.mxu0 %v11187_v63 }
 0x1cb   : > { %v2643_v8 = vrot.slane %v12916_v46, %v12730_v26  ;;  %v2274_v1 = vsel %vm1898_vm5, %v2267_v18, %v2273_v10  ;;  %v2609_v61 = vrot.slane %v2595_v54, %v12730_v26  ;;  %v2275_v38 = vrot.slane %v12869_v6, 1 }
 0x1cc   : > { %v2578_v11 = vcombine.low %v2570_v37, %v2577_v9  ;;  %v2336_v21 = vmax.f32 %v12809_v52, %v2274_v1  ;;  %v2284_v22 = vsel %vm1898_vm5, %v2277_v27, %v2283_v50  ;;  %v2344_v43 = vmax.f32 %v2163_v45, %v2283_v50 }
 0x1cd   : > { %v2644_v5 = vcombine.low %v2636_v17, %v2643_v8  ;;  %v2341_v57 = vmax.f32 %v12851_v24, %v2284_v22  ;;  %v2602_v29 = vrot.slane %v2594_v39, %v12730_v26  ;;  %3830 = vmatpush1.bf16.msra.mxu0 %v11185_v51  ;;  %v2279_v27 = vrot.slane %v12877_v0, 1 }
 0x1ce   : > { %v12941_v58 = vrot.slane %v2578_v11, %v12730_v26  ;;  %v2383_v17 = vmul.f32 %v12672_v32, %v2336_v21  ;;  %v2391_v52 = vmul.f32 %v12682_v42, %v2344_v43  ;;  %v2458_v45 = vmax.f32 %v12932_v20, 0.0  ;;  %v11206_v20 = vld [vmem:[%s15322_s5 + $0x2cc] ss:$12 sps:$4 sm:$0xff]  }
 0x1cf   : > { %v12947_v18 = vrot.slane %v2644_v5, %v12730_v26  ;;  %v12956_v24 = vmul.f32 %v12682_v42, %v2338_v62  ;;  %v2610_v54 = vcombine.low %v2602_v29, %v2609_v61  ;;  %v2276_v51 = vsel %vm1898_vm5, %v2269_v31, %v2275_v38 }
 0x1d0   : > { %2586 = vrot.lane.b32.xlu1 %v12941_v58, %s11937_s21  ;;  %v12964_v21 = vadd.f32 %v12690_v47, %v2383_v17  ;;  %v2438_v43 = vadd.f32 %v12710_v3, %v2391_v52  ;;  %v2337_v5 = vmax.f32 %v12818_v60, %v2276_v51  ;;  %v2280_v9 = vsel %vm1898_vm5, %v2273_v10, %v2279_v27 }
 0x1d1   : > { %2652 = vrot.lane.b32.xlu0 %v12947_v18, %s11937_s21  ;;  %v12970_v37 = vrot.slane %v2610_v54, %v12730_v26  ;;  %v2339_v62 = vmax.f32 %v12859_v34, %v2280_v9  ;;  %v2342_v63 = vmax.f32 %v12877_v0, %v2279_v27  ;;  %v2281_v31 = vrot.slane %v12885_v2, 1  ;;  %v11192_v27 = vld [vmem:[%s15322_s5 + $0x1c4] ss:$12 sps:$4 sm:$0xff]  }
 0x1d2   : > { %v2460_v22 = vmax.f32 %v12964_v21, 0.0  ;;  %v12977_v8 = vmul.f32 %v12682_v42, %v2341_v57  ;;  %v2384_v50 = vmul.f32 %v12686_v44, %v2337_v5  ;;  %v2660_v10 = vcombine.high %v2445_v12, %v2446_v19 }
 0x1d3   : > { %v2386_v60 = vmul.f32 %v12672_v32, %v2339_v62  ;;  %v2389_v34 = vmul.f32 %v12672_v32, %v2342_v63  ;;  %v2282_v0 = vsel %vm1898_vm5, %v2275_v38, %v2281_v31  ;;  %v2343_v39 = vmax.f32 %v12885_v2, %v2281_v31 }
 0x1d4   : > { %2618 = vrot.lane.b32.xlu1 %v12970_v37, %s11937_s21  ;;  %v12990_v42 = vmax.f32 %v2438_v43, 0.0  ;;  %v12993_v11 = vadd.f32 %v12698_v53, %v2384_v50  ;;  %v2340_v4 = vmax.f32 %v12869_v6, %v2282_v0  ;;  %v2661_v59 = vcombine.high %v12916_v46, %v12916_v46  ;;  %v11188_v46 = vld [vmem:[%s15322_s5 + $0x27c] ss:$12 sps:$4 sm:$0xff]  }
 0x1d5   : > { %v12999_v12 = vadd.f32 %v12690_v47, %v2386_v60  ;;  %v2436_v19 = vadd.f32 %v12690_v47, %v2389_v34  ;;  %v2390_v32 = vmul.f32 %v12686_v44, %v2343_v39  ;;  %v2668_v1 = vrot.slane %v2660_v10, %v12730_v26  ;;  %v11190_v47 = vld [vmem:[%s15322_s5 + $0x280] ss:$12 sps:$4 sm:$0xff]   ;;  %v11195_v34 = vld [vmem:[%s15322_s5 + $0x298] ss:$12 sps:$4 sm:$0xff]  }
 0x1d6   : > { %v2461_v2 = vmax.f32 %v12993_v11, 0.0  ;;  %v2387_v61 = vmul.f32 %v12686_v44, %v2340_v4  ;;  %v2675_v57 = vrot.slane %v2661_v59, %v12730_v26  ;;  %v2420_v6 = vadd.f32 %v12710_v3, %v12805_v40  ;;  %v11191_v40 = vld [vmem:[%s15322_s5 + $0x284] ss:$12 sps:$4 sm:$0xff]   ;;  %3831 = vmatprep.subr.bf16.mxu0 %v11190_v47 }
 0x1d7   : > { %v2463_v29 = vmax.f32 %v12999_v12, 0.0  ;;  %v2466_v38 = vmax.f32 %v2436_v19, 0.0  ;;  %v2437_v17 = vadd.f32 %v12698_v53, %v2390_v32  ;;  %v15363_v44 = vmax.f32 %v12792_v23, 0.0  ;;  %10265 = vmatprep.subr.bf16.mxu1 %v11191_v40  ;;  %3832 = vmatpush1.bf16.msra.mxu0 %v11188_v46  ;;  %v11196_v19 = vld [vmem:[%s15322_s5 + $0x29c] ss:$12 sps:$4 sm:$0xff]  }
 0x1d8   : > { %v13028_v54 = vadd.f32 %v12698_v53, %v2387_v61  ;;  %v2676_v51 = vcombine.low %v2668_v1, %v2675_v57  ;;  %v2450_v43 = vmax.f32 %v2420_v6, 0.0  ;;  %v2423_v31 = vadd.f32 %v12710_v3, %v12835_v25  ;;  %10266 = vmatpush3.bf16.msra.mxu1 %v11192_v27  ;;  %v11193_v25 = vld [vmem:[%s15322_s5 + $0x294] ss:$12 sps:$4 sm:$0xff]   ;;  %v11197_v32 = vld [vmem:[%s15322_s5 + $0x1dc] ss:$12 sps:$4 sm:$0xff]   ;;  %3833 = vmatprep.subr.bf16.mxu0 %v11195_v34 }
 0x1d9   : > { %v2695_v52 = vcombine.low %v15363_v44, %v2449_v16  ;;  %v15364_v5 = vmov %v15363_v44  ;;  %v2467_v62 = vmax.f32 %v2437_v17, 0.0  ;;  %v15365_v50 = vmax.f32 %v12839_v48, 0.0  ;;  %10267 = vmatprep.subr.bf16.mxu1 %v11196_v19  ;;  %v11202_v34 = vld [vmem:[%s15322_s5 + $0x1f4] ss:$12 sps:$4 sm:$0xff]  }
 0x1da   : > { %v2726_v9 = vcombine.high %v15364_v5, %v2449_v16  ;;  %v15366_v10 = vmax.f32 %v12812_v56, 0.0  ;;  %v2464_v60 = vmax.f32 %v13028_v54, 0.0  ;;  %v13043_v33 = vrot.slane %v2676_v51, %v12730_v26 }
 0x1db   : > { %v2702_v63 = vrot.slane %v2695_v52, %v12730_v26  ;;  %v2709_v23 = vrot.slane %v2450_v43, %v12730_v26  ;;  %v2727_v16 = vcombine.high %v2450_v43, %v2450_v43  ;;  %v13052_v0 = vcombine.low %v2466_v38, %v2467_v62  ;;  %3834 = vmatpush1.bf16.msra.mxu0 %v11193_v25 }
 0x1dc   : > { %v2761_v53 = vcombine.low %v15366_v10, %v15365_v50  ;;  %v13054_v39 = vcombine.high %v2466_v38, %v2467_v62  ;;  %v2734_v4 = vrot.slane %v2726_v9, %v12730_v26  ;;  %v2453_v59 = vmax.f32 %v2423_v31, 0.0  ;;  %2684 = vrot.lane.b32.xlu1 %v13043_v33, %s11937_s21  ;;  %v11201_v62 = vld [vmem:[%s15322_s5 + $0x2b4] ss:$12 sps:$4 sm:$0xff]   ;;  %10268 = vmatpush3.bf16.msra.mxu1 %v11197_v32 }
 0x1dd   : > { %v2710_v1 = vcombine.low %v2702_v63, %v2709_v23  ;;  %v2741_v61 = vrot.slane %v2727_v16, %v12730_v26  ;;  %v15367_v6 = vmov %v15365_v50  ;;  %v15368_v46 = vmov %v15366_v10  ;;  %10269 = vmatprep.subr.bf16.mxu1 %v11201_v62 }
 0x1de   : > { %v2768_v57 = vrot.slane %v2761_v53, %v12730_v26  ;;  %v2792_v47 = vcombine.high %v15368_v46, %v15367_v6  ;;  %v2775_v38 = vrot.slane %v2453_v59, %v12730_v26  ;;  %v2793_v17 = vcombine.high %v2453_v59, %v2453_v59  ;;  %v11205_v46 = vld [vmem:[%s15322_s5 + $0x2c8] ss:$12 sps:$4 sm:$0xff]  }
 0x1df   : > { %v2426_v44 = vadd.f32 %v12710_v3, %v12862_v41  ;;  %v15369_v52 = vmax.f32 %v12880_v28, 0.0  ;;  %v15370_v40 = vmax.f32 %v12865_v35, 0.0  ;;  %v13079_v51 = vrot.slane %v2710_v1, %v12730_v26  ;;  %v11200_v41 = vld [vmem:[%s15322_s5 + $0x2b0] ss:$12 sps:$4 sm:$0xff]   ;;  %v11198_v35 = vld [vmem:[%s15322_s5 + $0x2ac] ss:$12 sps:$4 sm:$0xff]  }
 0x1e0   : > { %v2742_v43 = vcombine.low %v2734_v4, %v2741_v61  ;;  %v2800_v48 = vrot.slane %v2792_v47, %v12730_v26  ;;  %v2776_v63 = vcombine.low %v2768_v57, %v2775_v38  ;;  %v2807_v31 = vrot.slane %v2793_v17, %v12730_v26  ;;  %3835 = vmatprep.subr.bf16.mxu0 %v11200_v41 }
 0x1e1   : > { %v2827_v27 = vcombine.low %v15370_v40, %v15369_v52  ;;  %v15371_v56 = vmov %v15369_v52  ;;  %v15372_v5 = vmov %v15370_v40  ;;  %v2456_v50 = vmax.f32 %v2426_v44, 0.0  ;;  %2718 = vrot.lane.b32.xlu0 %v13079_v51, %s11937_s21  ;;  %3836 = vmatpush1.bf16.msra.mxu0 %v11198_v35 }
 0x1e2   : > { %v2858_v9 = vcombine.high %v15372_v5, %v15371_v56  ;;  %v13100_v28 = vrot.slane %v2742_v43, %v12730_v26  ;;  %v2429_v23 = vadd.f32 %v12710_v3, %v12888_v7  ;;  %v15373_v16 = vmax.f32 %v12895_v30, 0.0  ;;  %10270 = vmatpush3.bf16.msra.mxu1 %v11202_v34  ;;  %v11203_v56 = vld [vmem:[%s15322_s5 + $0x2c4] ss:$12 sps:$4 sm:$0xff]   ;;  %3837 = vmatprep.subr.bf16.mxu0 %v11205_v46  ;;  %v11207_v5 = vld [vmem:[%s15322_s5 + $0x20c] ss:$12 sps:$4 sm:$0xff]  }
 0x1e3   : > { %v2834_v10 = vrot.slane %v2827_v27, %v12730_v26  ;;  %v13113_v4 = vrot.slane %v2776_v63, %v12730_v26  ;;  %v2808_v59 = vcombine.low %v2800_v48, %v2807_v31  ;;  %v2841_v19 = vrot.slane %v2456_v50, %v12730_v26  ;;  %10271 = vmatprep.subr.bf16.mxu1 %v11206_v20  ;;  %v11210_v31 = vld [vmem:[%s15322_s5 + $0x2e0] ss:$12 sps:$4 sm:$0xff]   ;;  %v11215_v46 = vld [vmem:[%s15322_s5 + $0x2f8] ss:$12 sps:$4 sm:$0xff]  }
 0x1e4   : > { %v2866_v53 = vrot.slane %v2858_v9, %v12730_v26  ;;  %v2893_v25 = vcombine.low %v15373_v16, %v2458_v45  ;;  %v2859_v32 = vcombine.high %v2456_v50, %v2456_v50  ;;  %2750 = vrot.lane.b32.xlu1 %v13100_v28, %s11937_s21  ;;  %v2459_v7 = vmax.f32 %v2429_v23, 0.0 }
 0x1e5   : > { %v15374_v61 = vmov %v15373_v16  ;;  %v2432_v6 = vadd.f32 %v12710_v3, %v12956_v24  ;;  %v13129_v47 = vrot.slane %v2808_v59, %v12730_v26  ;;  %v2842_v38 = vcombine.low %v2834_v10, %v2841_v19  ;;  %2784 = vrot.lane.b32.xlu0 %v13113_v4, %s11937_s21  ;;  %3838 = vmatpush1.bf16.msra.mxu0 %v11203_v56  ;;  %v11208_v19 = vld [vmem:[%s15322_s5 + $0x2dc] ss:$12 sps:$4 sm:$0xff]   ;;  %v11222_v56 = vld [vmem:[%s15322_s5 + $0x254] ss:$12 sps:$4 sm:$0xff]  }
 0x1e6   : > { %v2900_v1 = vrot.slane %v2893_v25, %v12730_v26  ;;  %v2924_v57 = vcombine.high %v15374_v61, %v2458_v45  ;;  %v2873_v17 = vrot.slane %v2859_v32, %v12730_v26  ;;  %v2959_v30 = vcombine.low %v2460_v22, %v2461_v2  ;;  %10272 = vmatpush3.bf16.msra.mxu1 %v11207_v5  ;;  %v11211_v25 = vld [vmem:[%s15322_s5 + $0x2e4] ss:$12 sps:$4 sm:$0xff]  }
 0x1e7   : > { %v2907_v45 = vrot.slane %v2459_v7, %v12730_v26  ;;  %v2925_v24 = vcombine.high %v2459_v7, %v2459_v7  ;;  %v2462_v52 = vmax.f32 %v2432_v6, 0.0  ;;  %v13144_v40 = vrot.slane %v2842_v38, %v12730_v26  ;;  %3839 = vmatprep.subr.bf16.mxu0 %v11210_v31  ;;  %10273 = vmatprep.subr.bf16.mxu1 %v11211_v25  ;;  %v11269_v25 = vld [vmem:[%s15322_s5 + $0x90] ss:$12 sps:$4 sm:$0xff]  }
 0x1e8   : > { %v2932_v44 = vrot.slane %v2924_v57, %v12730_v26  ;;  %v2874_v27 = vcombine.low %v2866_v53, %v2873_v17  ;;  %v2966_v43 = vrot.slane %v2959_v30, %v12730_v26  ;;  %v2990_v48 = vcombine.high %v2460_v22, %v2461_v2  ;;  %2816 = vrot.lane.b32.xlu1 %v13129_v47, %s11937_s21  ;;  %v11212_v57 = vld [vmem:[%s15322_s5 + $0x224] ss:$12 sps:$4 sm:$0xff]   ;;  %v11213_v17 = vld [vmem:[%s15322_s5 + $0x2f4] ss:$12 sps:$4 sm:$0xff]   ;;  %v11216_v30 = vld [vmem:[%s15322_s5 + $0x2fc] ss:$12 sps:$4 sm:$0xff]  }
 0x1e9   : > { %v2908_v9 = vcombine.low %v2900_v1, %v2907_v45  ;;  %v2939_v41 = vrot.slane %v2925_v24, %v12730_v26  ;;  %v2973_v11 = vrot.slane %v2462_v52, %v12730_v26  ;;  %v2991_v62 = vcombine.high %v2462_v52, %v2462_v52  ;;  %2850 = vrot.lane.b32.xlu0 %v13144_v40, %s11937_s21  ;;  %v11220_v45 = vld [vmem:[%s15322_s5 + $0x310] ss:$12 sps:$4 sm:$0xff]   ;;  %v11221_v52 = vld [vmem:[%s15322_s5 + $0x314] ss:$12 sps:$4 sm:$0xff]  }
 0x1ea   : > { %v3123_v21 = vcombine.high %v12990_v42, %v12990_v42  ;;  %v2998_v22 = vrot.slane %v2990_v48, %v12730_v26  ;;  %v2435_v2 = vadd.f32 %v12710_v3, %v12977_v8  ;;  %v3025_v63 = vcombine.low %v2463_v29, %v2464_v60  ;;  %3840 = vmatpush1.bf16.msra.mxu0 %v11208_v19  ;;  %v11217_v24 = vld [vmem:[%s15322_s5 + $0x23c] ss:$12 sps:$4 sm:$0xff]  }
 0x1eb   : > { %v13176_v50 = vrot.slane %v2874_v27, %v12730_v26  ;;  %v2940_v10 = vcombine.low %v2932_v44, %v2939_v41  ;;  %v2974_v35 = vcombine.low %v2966_v43, %v2973_v11  ;;  %v3005_v3 = vrot.slane %v2991_v62, %v12730_v26  ;;  %10274 = vmatpush3.bf16.msra.mxu1 %v11212_v57  ;;  %v11218_v27 = vld [vmem:[%s15322_s5 + $0x30c] ss:$12 sps:$4 sm:$0xff]   ;;  %v11225_v48 = vld [vmem:[%s15322_s5 + $0x328] ss:$12 sps:$4 sm:$0xff]   ;;  %v11223_v41 = vld [vmem:[%s15322_s5 + $0x324] ss:$12 sps:$4 sm:$0xff]  }
 0x1ec   : > { %v2465_v8 = vmax.f32 %v2435_v2, 0.0  ;;  %v3032_v53 = vrot.slane %v3025_v63, %v12730_v26  ;;  %v3056_v23 = vcombine.high %v2463_v29, %v2464_v60  ;;  %v3098_v16 = vrot.slane %v13052_v0, %v12730_v26  ;;  %3841 = vmatprep.subr.bf16.mxu0 %v11215_v46  ;;  %10275 = vmatprep.subr.bf16.mxu1 %v11216_v30  ;;  %v11230_v62 = vld [vmem:[%s15322_s5 + $0x340] ss:$12 sps:$4 sm:$0xff]   ;;  %v13281_v2 = vld [vmem:[%s15322_s5 + $0x344] ss:$12 sps:$4 sm:$0xff]  }
 0x1ed   : > { %2882 = vrot.lane.b32.xlu1 %v13176_v50, %s11937_s21  ;;  %v13192_v34 = vrot.slane %v2908_v9, %v12730_v26  ;;  %v3006_v59 = vcombine.low %v2998_v22, %v3005_v3  ;;  %v3105_v12 = vrot.slane %v12990_v42, %v12730_v26  ;;  %v3130_v0 = vrot.slane %v13054_v39, %v12730_v26  ;;  %v11226_v9 = vld [vmem:[%s15322_s5 + $0x32c] ss:$12 sps:$4 sm:$0xff]  }
 0x1ee   : > { %v3039_v29 = vrot.slane %v2465_v8, %v12730_v26  ;;  %v3057_v54 = vcombine.high %v2465_v8, %v2465_v8  ;;  %v3064_v60 = vrot.slane %v3056_v23, %v12730_v26  ;;  %v13206_v32 = vrot.slane %v2940_v10, %v12730_v26  ;;  %3842 = vmatpush1.bf16.msra.mxu0 %v11213_v17 }
 0x1ef   : > { %2916 = vrot.lane.b32.xlu0 %v13192_v34, %s11937_s21  ;;  %v13209_v42 = vrot.slane %v2974_v35, %v12730_v26  ;;  %v3106_v7 = vcombine.low %v3098_v16, %v3105_v12  ;;  %v3137_v1 = vrot.slane %v3123_v21, %v12730_v26  ;;  %v13230_v20 = vrot.slane %v3006_v59, %v12730_v26  ;;  %v11227_v21 = vld [vmem:[%s15322_s5 + $0x26c] ss:$12 sps:$4 sm:$0xff]  }
 0x1f0   : > { %v3040_v61 = vcombine.low %v3032_v53, %v3039_v29  ;;  %v3071_v39 = vrot.slane %v3057_v54, %v12730_v26  ;;  %3843 = vmatprep.subr.bf16.mxu0 %v11220_v45  ;;  %10276 = vmatpush3.bf16.msra.mxu1 %v11217_v24  ;;  %v3154_v22 = vcombine.high %v12821_v55, %v12821_v55  ;;  %v15375_v53 = vlaneseq }
 0x1f1   : > { %2948 = vrot.lane.b32.xlu1 %v13206_v32, %s11937_s21  ;;  %v3138_v6 = vcombine.low %v3130_v0, %v3137_v1  ;;  %v3113_v5 = vrot.slane %v3106_v7, %v12730_v26  ;;  %10277 = vmatprep.subr.bf16.mxu1 %v11221_v52  ;;  %v3163_v63 = vcombine.high %v12891_v49, %v12891_v49 }
 0x1f2   : > { %v3072_v38 = vcombine.low %v3064_v60, %v3071_v39  ;;  %v13241_v44 = vrot.slane %v3040_v61, %v12730_v26  ;;  %3844 = vmatpush1.bf16.msra.mxu0 %v11218_v27  ;;  %v3172_v31 = vcombine.high %v12941_v58, %v12941_v58  ;;  %v3181_v55 = vcombine.high %v12970_v37, %v12970_v37 }
 0x1f3   : > { %2982 = vrot.lane.b32.xlu0 %v13209_v42, %s11937_s21  ;;  %v3145_v11 = vrot.slane %v3138_v6, %v12730_v26  ;;  %3845 = vmatprep.subr.bf16.mxu0 %v11225_v48  ;;  %v3190_v10 = vcombine.high %v12947_v18, %v12947_v18  ;;  %v3199_v49 = vcombine.high %v13043_v33, %v13043_v33  ;;  %vm2523_vm9 = vcmp.ge.s32.totalorder %v15375_v53, 8 }
 0x1f4   : > { %v3079_v43 = vrot.slane %v3072_v38, %v12730_v26  ;;  %10278 = vmatpush3.bf16.msra.mxu1 %v11222_v56  ;;  %v3208_v58 = vcombine.high %v13079_v51, %v13079_v51  ;;  %v3217_v37 = vcombine.high %v13100_v28, %v13100_v28  ;;  %v3226_v18 = vcombine.high %v13113_v4, %v13113_v4 }
 0x1f5   : > { %3014 = vrot.lane.b32.xlu1 %v13230_v20, %s11937_s21  ;;  %10279 = vmatprep.subr.bf16.mxu1 %v11226_v9  ;;  %v3235_v33 = vcombine.high %v13129_v47, %v13129_v47  ;;  %v3244_v51 = vcombine.high %v13144_v40, %v13144_v40  ;;  %v3253_v28 = vcombine.high %v13176_v50, %v13176_v50  ;;  %vm13338_vm10 = vcmp.lt.s32.totalorder %v15375_v53, 288 }
 0x1f6   : > { %3846 = vmatpush1.bf16.msra.mxu0 %v11223_v41  ;;  %v3262_v4 = vcombine.high %v13192_v34, %v13192_v34  ;;  %v3271_v47 = vcombine.high %v13206_v32, %v13206_v32  ;;  %v3280_v40 = vcombine.high %v13209_v42, %v13209_v42  ;;  %v3289_v50 = vcombine.high %v13230_v20, %v13230_v20  ;;  %vm13344_vm12 = vmand %vm2523_vm9, %vm13338_vm10 }
 0x1f7   : > { %3048 = vrot.lane.b32.xlu0 %v13241_v44, %s11937_s21  ;;  %3866 = vmatprep.subr.bf16.mxu0 %v11230_v62  ;;  %v3298_v35 = vcombine.high %v13241_v44, %v13241_v44  ;;  %v3307_v3 = vcombine.high %v3079_v43, %v3079_v43  ;;  %v3316_v8 = vcombine.high %v3113_v5, %v3113_v5  ;;  %vm6557_vm15 = vcmp.ge.s32.totalorder %v15375_v53, 16 }
 0x1f8   : > { %10280 = vmatpush3.bf16.msra.mxu1 %v11227_v21  ;;  %vm14579_vm1 = vmand %vm6557_vm15, %vm13338_vm10 }
 0x1f9   : > { %3080 = vrot.lane.b32.xlu1 %v3079_v43, %s11937_s21  ;;  %10636 = vmatprep.subr.bf16.mxu1 %v13281_v2 }
 0x1fb   : > { %3114 = vrot.lane.b32.xlu0 %v3113_v5, %s11937_s21 }
 0x1fd   : > { %3146 = vrot.lane.b32.xlu1 %v3145_v11, %s11937_s21 }
 0x1ff   : > { %3155 = vrot.lane.b32.xlu0 %v3154_v22, %s11937_s21 }
 0x201   : > { %3164 = vrot.lane.b32.xlu1 %v3163_v63, %s11937_s21 }
 0x203   : > { %3173 = vrot.lane.b32.xlu0 %v3172_v31, %s11937_s21 }
 0x205   : > { %3182 = vrot.lane.b32.xlu1 %v3181_v55, %s11937_s21 }
 0x207   : > { %3191 = vrot.lane.b32.xlu0 %v3190_v10, %s11937_s21 }
 0x209   : > { %3200 = vrot.lane.b32.xlu1 %v3199_v49, %s11937_s21 }
 0x20b   : > { %3209 = vrot.lane.b32.xlu0 %v3208_v58, %s11937_s21 }
 0x20d   : > { %3218 = vrot.lane.b32.xlu1 %v3217_v37, %s11937_s21 }
 0x20f   : > { %3227 = vrot.lane.b32.xlu0 %v3226_v18, %s11937_s21 }
 0x211   : > { %3236 = vrot.lane.b32.xlu1 %v3235_v33, %s11937_s21 }
 0x213   : > { %3245 = vrot.lane.b32.xlu0 %v3244_v51, %s11937_s21 }
 0x215   : > { %3254 = vrot.lane.b32.xlu1 %v3253_v28, %s11937_s21 }
 0x217   : > { %3263 = vrot.lane.b32.xlu0 %v3262_v4, %s11937_s21 }
 0x219   : > { %3272 = vrot.lane.b32.xlu1 %v3271_v47, %s11937_s21 }
 0x21b   : > { %3281 = vrot.lane.b32.xlu0 %v3280_v40, %s11937_s21 }
 0x21d   : > { %3290 = vrot.lane.b32.xlu1 %v3289_v50, %s11937_s21 }
 0x21f   : > { %3299 = vrot.lane.b32.xlu0 %v3298_v35, %s11937_s21 }
 0x221   : > { %3308 = vrot.lane.b32.xlu1 %v3307_v3, %s11937_s21 }
 0x223   : > { %3317 = vrot.lane.b32.xlu0 %v3316_v8, %s11937_s21  ;;  %s11868_s21 = scalar_lea.vmem %s15277_s20, 16 }
 0x224   : > { %p11869_p11 = scmp.ne.s32.totalorder %s15277_s20, %s11868_s21 }
 0x226   : > { %p11870_p12 = pnand %p11869_p11, %p12073_p5 }
 0x228   : > { %p11871_p13 = pneg %p11870_p12 }
 0x232   : > { %v2517_v16 = vpop.permute.xlu0 %2516 }
 0x233   : > { %v2518_v34 = vrot.slane %v2517_v16, 7 }
 0x235   : > { %v2520_v59 = vsel %vm2519_vm11, %v2518_v34, %v2517_v16 }
 0x236   : > { %2526 = vst.msk [vmem:[#allocation3] ss:$8 sm:$0x7] %vm13344_vm12, %v2520_v59 }
 0x23a   : > { %v2553_v12 = vpop.permute.xlu0 %2552 }
 0x23b   : > { %v2554_v29 = vrot.slane %v2553_v12, 7 }
 0x23d   : > { %v2555_v54 = vsel %vm2519_vm11, %v2554_v29, %v2553_v12 }
 0x23e   : > { %2558 = vst.msk [vmem:[#allocation3 + $0x1] ss:$8 sm:$0x7] %vm13344_vm12, %v2555_v54 }
 0x242   : > { %v2587_v60 = vpop.permute.xlu1 %2586 }
 0x243   : > { %v2588_v0 = vrot.slane %v2587_v60, 7  ;;  %v2653_v19 = vpop.permute.xlu0 %2652 }
 0x244   : > { %v2654_v32 = vrot.slane %v2653_v19, 7 }
 0x245   : > { %v2589_v42 = vsel %vm2519_vm11, %v2588_v0, %v2587_v60 }
 0x246   : > { %2592 = vst.msk [vmem:[#allocation3 + $0x2] ss:$8 sm:$0x7] %vm13344_vm12, %v2589_v42  ;;  %v2655_v7 = vsel %vm2519_vm11, %v2654_v32, %v2653_v19  ;;  %v2619_v1 = vpop.permute.xlu1 %2618 }
 0x247   : > { %2658 = vst.msk [vmem:[#allocation3 + $0x4] ss:$8 sm:$0x7] %vm13344_vm12, %v2655_v7  ;;  %v2620_v61 = vrot.slane %v2619_v1, 7 }
 0x249   : > { %v2621_v39 = vsel %vm2519_vm11, %v2620_v61, %v2619_v1 }
 0x24a   : > { %2624 = vst.msk [vmem:[#allocation3 + $0x3] ss:$8 sm:$0x7] %vm13344_vm12, %v2621_v39  ;;  %v11228_v39 = vld [vmem:[%s15322_s5 + $0x33c] ss:$12 sps:$4 sm:$0xff]  }
 0x24e   : > { %v2685_v57 = vpop.permute.xlu1 %2684 }
 0x24f   : > { %v2686_v6 = vrot.slane %v2685_v57, 7 }
 0x251   : > { %v2687_v46 = vsel %vm2519_vm11, %v2686_v6, %v2685_v57 }
 0x252   : > { %2690 = vst.msk [vmem:[#allocation3 + $0x5] ss:$8 sm:$0x7] %vm13344_vm12, %v2687_v46 }
 0x253   : > { %v2719_v38 = vpop.permute.xlu0 %2718 }
 0x254   : > { %v2720_v17 = vrot.slane %v2719_v38, 7 }
 0x256   : > { %v2751_v30 = vpop.permute.xlu1 %2750  ;;  %v2721_v20 = vsel %vm2519_vm11, %v2720_v17, %v2719_v38  ;;  %v11234_v38 = vld [vmem:[%s15322_s5 + $0x358] ss:$12 sps:$4 sm:$0xff]   ;;  %v11235_v17 = vld [vmem:[%s15322_s5 + $0x35c] ss:$12 sps:$4 sm:$0xff]  }
 0x257   : > { %v2752_v45 = vrot.slane %v2751_v30, 7  ;;  %2724 = vst.msk [vmem:[#allocation3 + $0x6] ss:$8 sm:$0x7] %vm13344_vm12, %v2721_v20  ;;  %v2785_v24 = vpop.permute.xlu0 %2784 }
 0x258   : > { %v2786_v52 = vrot.slane %v2785_v24, 7 }
 0x259   : > { %v2753_v44 = vsel %vm2519_vm11, %v2752_v45, %v2751_v30  ;;  %v9288_v30 = vld [vmem:[%s15322_s5 + $0x36c] sm:$0xff] }
 0x25a   : > { %2756 = vst.msk [vmem:[#allocation3 + $0x7] ss:$8 sm:$0x7] %vm13344_vm12, %v2753_v44  ;;  %v2817_v27 = vpop.permute.xlu1 %2816  ;;  %v2787_v43 = vsel %vm2519_vm11, %v2786_v52, %v2785_v24 }
 0x25b   : > { %v2818_v48 = vrot.slane %v2817_v27, 7  ;;  %2790 = vst.msk [vmem:[#allocation3 + $0x18] ss:$8 sm:$0x7] %vm13344_vm12, %v2787_v43  ;;  %v2851_v56 = vpop.permute.xlu0 %2850 }
 0x25c   : > { %v2852_v9 = vrot.slane %v2851_v56, 7 }
 0x25d   : > { %v2819_v5 = vsel %vm2519_vm11, %v2818_v48, %v2817_v27  ;;  %v11232_v48 = vld [vmem:[%s15322_s5 + $0x354] ss:$12 sps:$4 sm:$0xff]  }
 0x25e   : > { %2822 = vst.msk [vmem:[#allocation3 + $0x19] ss:$8 sm:$0x7] %vm13344_vm12, %v2819_v5  ;;  %v2853_v11 = vsel %vm2519_vm11, %v2852_v9, %v2851_v56  ;;  %v9344_v56 = vcombine.low %v9288_v30, %v9288_v30 }
 0x25f   : > { %v2883_v41 = vpop.permute.xlu1 %2882  ;;  %2856 = vst.msk [vmem:[#allocation3 + $0x1a] ss:$8 sm:$0x7] %vm13344_vm12, %v2853_v11  ;;  %v9345_v11 = vcombine.high %v9288_v30, %v9288_v30 }
 0x260   : > { %v2884_v62 = vrot.slane %v2883_v41, 7 }
 0x261   : > { %v2917_v21 = vpop.permute.xlu0 %2916  ;;  %v3335_v54 = vld [vmem:[#allocation3 + $0x8] sm:$0xff]  ;;  %v3334_v32 = vld [vmem:[#allocation3] sm:$0xff]  ;;  %v3336_v45 = vld [vmem:[#allocation3 + $0x10] sm:$0xff] }
 0x262   : > { %v2885_v22 = vsel %vm2519_vm11, %v2884_v62, %v2883_v41  ;;  %v2918_v63 = vrot.slane %v2917_v21, 7  ;;  %v11237_v62 = vld [vmem:[%s15322_s5 + $0x374] ss:$0 sps:$4 sm:$0xff]  }
 0x263   : > { %2888 = vst.msk [vmem:[#allocation3 + $0x1b] ss:$8 sm:$0x7] %vm13344_vm12, %v2885_v22  ;;  %v2949_v31 = vpop.permute.xlu1 %2948 }
 0x264   : > { %v2919_v55 = vsel %vm2519_vm11, %v2918_v63, %v2917_v21  ;;  %v2950_v10 = vrot.slane %v2949_v31, 7 }
 0x265   : > { %2922 = vst.msk [vmem:[#allocation3 + $0x1c] ss:$8 sm:$0x7] %vm13344_vm12, %v2919_v55  ;;  %v2983_v49 = vpop.permute.xlu0 %2982 }
 0x266   : > { %v2951_v58 = vsel %vm2519_vm11, %v2950_v10, %v2949_v31  ;;  %v2984_v37 = vrot.slane %v2983_v49, 7 }
 0x267   : > { %2954 = vst.msk [vmem:[#allocation3 + $0x1d] ss:$8 sm:$0x7] %vm13344_vm12, %v2951_v58  ;;  %v3015_v18 = vpop.permute.xlu1 %3014 }
 0x268   : > { %v2985_v33 = vsel %vm2519_vm11, %v2984_v37, %v2983_v49  ;;  %v3016_v51 = vrot.slane %v3015_v18, 7 }
 0x269   : > { %2988 = vst.msk [vmem:[#allocation3 + $0x1e] ss:$8 sm:$0x7] %vm13344_vm12, %v2985_v33  ;;  %v3049_v28 = vpop.permute.xlu0 %3048 }
 0x26a   : > { %v3017_v4 = vsel %vm2519_vm11, %v3016_v51, %v3015_v18  ;;  %v3050_v47 = vrot.slane %v3049_v28, 7  ;;  %v3807_v18 = vsel %vm759_vm0, %v9344_v56, 0  ;;  %v11246_v56 = vld [vmem:[%s15322_s5 + $0x1c] ss:$12 sps:$4 sm:$0xff]  }
 0x26b   : > { %3020 = vst.msk [vmem:[#allocation3 + $0x1f] ss:$8 sm:$0x7] %vm13344_vm12, %v3017_v4  ;;  %v3081_v40 = vpop.permute.xlu1 %3080 }
 0x26c   : > { %v3051_v50 = vsel %vm2519_vm11, %v3050_v47, %v3049_v28  ;;  %v3082_v35 = vrot.slane %v3081_v40, 7  ;;  %v11241_v47 = vld [vmem:[%s15322_s5 + $0x4] ss:$12 sps:$4 sm:$0xff]  }
 0x26d   : > { %3054 = vst.msk [vmem:[#allocation3 + $0x30] ss:$8 sm:$0x7] %vm13344_vm12, %v3051_v50  ;;  %v3115_v3 = vpop.permute.xlu0 %3114 }
 0x26e   : > { %v3083_v8 = vsel %vm2519_vm11, %v3082_v35, %v3081_v40  ;;  %v3116_v16 = vrot.slane %v3115_v3, 7 }
 0x26f   : > { %3086 = vst.msk [vmem:[#allocation3 + $0x31] ss:$8 sm:$0x7] %vm13344_vm12, %v3083_v8  ;;  %v3147_v34 = vpop.permute.xlu1 %3146  ;;  %v11242_v8 = vld [vmem:[%s15322_s5 + $0xc8] ss:$12 sps:$4 sm:$0xff]  }
 0x270   : > { %v3117_v59 = vsel %vm2519_vm11, %v3116_v16, %v3115_v3  ;;  %v3148_v12 = vrot.slane %v3147_v34, 7  ;;  %v3813_v3 = vsel %vm759_vm0, %v11237_v62, 0 }
 0x271   : > { %3120 = vst.msk [vmem:[#allocation3 + $0x32] ss:$8 sm:$0x7] %vm13344_vm12, %v3117_v59  ;;  %v3156_v29 = vpop.permute.xlu0 %3155 }
 0x272   : > { %v3149_v60 = vsel %vm2519_vm11, %v3148_v12, %v3147_v34  ;;  %v3157_v0 = vrot.slane %v3156_v29, 7  ;;  %v3338_v19 = vld [vmem:[#allocation3 + $0x20] sm:$0xff]  ;;  %v3337_v42 = vld [vmem:[#allocation3 + $0x18] sm:$0xff]  ;;  %v3339_v57 = vld [vmem:[#allocation3 + $0x28] sm:$0xff] }
 0x273   : > { %3152 = vst.msk [vmem:[#allocation3 + $0x33] ss:$8 sm:$0x7] %vm13344_vm12, %v3149_v60  ;;  %v3165_v7 = vpop.permute.xlu1 %3164  ;;  %v13408_v1 = vpack.c.bf16 %v3338_v19, %v3335_v54  ;;  %v13410_v61 = vpack.c.bf16 %v3337_v42, %v3334_v32  ;;  %v13433_v27 = vpack.c.bf16 %v3339_v57, %v3336_v45 }
 0x274   : > { %v3158_v6 = vsel %vm2519_vm11, %v3157_v0, %v3156_v29  ;;  %v3166_v46 = vrot.slane %v3165_v7, 7 }
 0x275   : > { %3161 = vst.msk [vmem:[#allocation2 + $0x1] ss:$8 sm:$0x7] %vm13344_vm12, %v3158_v6  ;;  %v3174_v20 = vpop.permute.xlu0 %3173  ;;  %3847 = vmatprep.mubr.bf16.mxu0 %v13408_v1  ;;  %3949 = vmatprep.mubr.bf16.mxu1 %v13408_v1  ;;  %v5252_v24 = vshll.u32 %v13408_v1, 16  ;;  %v5240_v5 = vshll.u32 %v13410_v61, 16  ;;  %v5263_v10 = vshll.u32 %v13433_v27, 16 }
 0x276   : > { %v3167_v44 = vsel %vm2519_vm11, %v3166_v46, %v3165_v7  ;;  %v3175_v52 = vrot.slane %v3174_v20, 7  ;;  %3848 = vmatmul.mubr.bf16.vlgmr.msra.gmra.mrb[20].mxu0 %v13410_v61  ;;  %3950 = vmatmul.mubr.bf16.vlgmr.msra.gmra.mrb[20].mxu1 %v13410_v61  ;;  %v5250_v50 = vshrl.u32 %v13408_v1, 16  ;;  %v5238_v34 = vshrl.u32 %v13410_v61, 16 }
 0x277   : > { %3170 = vst.msk [vmem:[#allocation2 + $0x2] ss:$8 sm:$0x7] %vm13344_vm12, %v3167_v44  ;;  %3867 = vmatpush1.bf16.msra.mxu0 %v11228_v39  ;;  %v3183_v43 = vpop.permute.xlu1 %3182  ;;  %10637 = vmatpush3.bf16.msra.mxu1 %v13281_v2  ;;  %v5254_v21 = vrot.slane %v5252_v24, 1  ;;  %v5242_v51 = vrot.slane %v5240_v5, 1  ;;  %v5265_v60 = vrot.slane %v5263_v10, 1 }
 0x278   : > { %v3176_v9 = vsel %vm2519_vm11, %v3175_v52, %v3174_v20  ;;  %v3184_v41 = vrot.slane %v3183_v43, 7  ;;  %3868 = vmatprep.subr.bf16.mxu0 %v11234_v38  ;;  %10638 = vmatprep.subr.bf16.mxu1 %v11235_v17  ;;  %v15380_v39 = vmov 0   ;;  %v5261_v57 = vshrl.u32 %v13433_v27, 16  ;;  %v11239_v44 = vld [vmem:[%s15322_s5] ss:$12 sps:$4 sm:$0xff]  }
 0x279   : > { %3179 = vst.msk [vmem:[#allocation2 + $0x3] ss:$8 sm:$0x7] %vm13344_vm12, %v3176_v9  ;;  %v3192_v2 = vpop.permute.xlu0 %3191  ;;  %v5255_v54 = vor.u32 %v5254_v21, %v5250_v50  ;;  %v5243_v32 = vor.u32 %v5242_v51, %v5238_v34  ;;  %v11243_v52 = vld [vmem:[%s15322_s5 + $0x8] ss:$12 sps:$4 sm:$0xff]  }
 0x27a   : > { %v3185_v22 = vsel %vm2519_vm11, %v3184_v41, %v3183_v43  ;;  %v3193_v63 = vrot.slane %v3192_v2, 7  ;;  %v3341_v31 = vld [vmem:[#allocation3 + $0x38] sm:$0xf]  ;;  %v3340_v55 = vld [vmem:[#allocation3 + $0x30] sm:$0xf]  ;;  %v5266_v20 = vor.u32 %v5265_v60, %v5261_v57 }
 0x27b   : > { %3188 = vst.msk [vmem:[#allocation2 + $0x4] ss:$8 sm:$0x7] %vm13344_vm12, %v3185_v22  ;;  %v3201_v49 = vpop.permute.xlu1 %3200  ;;  %v13452_v58 = vpack.c.bf16 %v3341_v31, %v3341_v31  ;;  %3869 = vmatpush1.bf16.msra.mxu0 %v11232_v48  ;;  %v13454_v37 = vpack.c.bf16 %v3340_v55, %v3340_v55  ;;  %10639 = vmatpush3.bf16.msra.mxu1 %v11235_v17  ;;  %v3342_v33 = vld [vmem:[#allocation3 + $0x40] sm:$0xf] }
 0x27c   : > { %v3194_v28 = vsel %vm2519_vm11, %v3193_v63, %v3192_v2  ;;  %v3202_v4 = vrot.slane %v3201_v49, 7  ;;  %9347 = vmatprep.subr.msk.bf16.mxu0 %vm759_vm0, %v9345_v11  ;;  %11011 = vmatprep.subr.msk.bf16.mxu1 %vm759_vm0, %v11237_v62  ;;  %v13463_v40 = vpack.c.bf16 %v3342_v33, %v3342_v33  ;;  %v11247_v5 = vld [vmem:[%s15322_s5 + $0xe0] ss:$12 sps:$4 sm:$0xff]   ;;  %v11244_v21 = vld [vmem:[%s15322_s5 + $0x18] ss:$12 sps:$4 sm:$0xff]  }
 0x27d   : > { %3197 = vst.msk [vmem:[#allocation2 + $0x5] ss:$8 sm:$0x7] %vm13344_vm12, %v3194_v28  ;;  %v3210_v35 = vpop.permute.xlu0 %3209  ;;  %3857 = vmatprep.mubr.bf16.mxu0 %v13452_v58  ;;  %3957 = vmatprep.mubr.bf16.mxu1 %v13452_v58  ;;  %v5257_v16 = vshll.u32 %v13452_v58, 16  ;;  %v5245_v59 = vshll.u32 %v13454_v37, 16 }
 0x27e   : > { %v3203_v12 = vsel %vm2519_vm11, %v3202_v4, %v3201_v49  ;;  %v3211_v29 = vrot.slane %v3210_v35, 7  ;;  %3858 = vmatmul.mubr.bf16.gmra.mrb[24].mxu0 %v13454_v37  ;;  %3958 = vmatmul.mubr.bf16.gmra.mrb[24].mxu1 %v13454_v37  ;;  %v5267_v7 = vshll.u32 %v13463_v40, 16  ;;  %v11248_v22 = vld [vmem:[%s15322_s5 + $0x20] ss:$12 sps:$4 sm:$0xff]   ;;  %v11252_v55 = vld [vmem:[%s15322_s5 + $0xf8] ss:$12 sps:$4 sm:$0xff]  }
 0x27f   : > { %3206 = vst.msk [vmem:[#allocation2 + $0x6] ss:$8 sm:$0x7] %vm13344_vm12, %v3203_v12  ;;  %v3219_v0 = vpop.permute.xlu1 %3218  ;;  %10642 = vmatprep.mubr.msk.bf16.mxu1 %vm2471_vm6, %v13433_v27  ;;  %3871 = vmatpush1.bf16.msra.mxu0 %v3807_v18  ;;  %v13484_v19 = vrot.slane %v5257_v16, 1  ;;  %v13486_v42 = vrot.slane %v5245_v59, 1 }
 0x280   : > { %v3212_v1 = vsel %vm2519_vm11, %v3211_v29, %v3210_v35  ;;  %v3220_v61 = vrot.slane %v3219_v0, 7  ;;  %10641 = vmatpush3.bf16.msra.mxu1 %v3813_v3  ;;  %3898 = vmatprep.mubr.bf16.mxu0 %v15380_v39  ;;  %v13503_v45 = vrot.slane %v5267_v7, 1  ;;  %v11251_v31 = vld [vmem:[%s15322_s5 + $0x34] ss:$12 sps:$4 sm:$0xff]   ;;  %v11249_v51 = vld [vmem:[%s15322_s5 + $0x30] ss:$12 sps:$4 sm:$0xff]  }
 0x281   : > { %3215 = vst.msk [vmem:[#allocation2 + $0x7] ss:$8 sm:$0x7] %vm13344_vm12, %v3212_v1  ;;  %v3228_v6 = vpop.permute.xlu0 %3227  ;;  %4324 = vmatprep.subr.bf16.mxu0 %v11241_v47  ;;  %10298 = vmatprep.subr.bf16.mxu1 %v11242_v8  ;;  %v13496_v46 = vsel %vm1206_vm4, %v5255_v54, %v13484_v19  ;;  %v13500_v38 = vsel %vm1206_vm4, %v5243_v32, %v13486_v42  ;;  %v11253_v28 = vld [vmem:[%s15322_s5 + $0x38] ss:$12 sps:$4 sm:$0xff]  }
 0x282   : > { %v3221_v17 = vsel %vm2519_vm11, %v3220_v61, %v3219_v0  ;;  %v3229_v30 = vrot.slane %v3228_v6, 7  ;;  %v13522_v9 = vsel %vm1206_vm4, %v5266_v20, %v13503_v45  ;;  %v11256_v50 = vld [vmem:[%s15322_s5 + $0x4c] ss:$12 sps:$4 sm:$0xff]   ;;  %v11257_v35 = vld [vmem:[%s15322_s5 + $0x110] ss:$12 sps:$4 sm:$0xff]  }
 0x283   : > { %3224 = vst.msk [vmem:[#allocation2 + $0x18] ss:$8 sm:$0x7] %vm13344_vm12, %v3221_v17  ;;  %v3237_v24 = vpop.permute.xlu1 %3236  ;;  %v11254_v59 = vld [vmem:[%s15322_s5 + $0x48] ss:$12 sps:$4 sm:$0xff]  }
 0x284   : > { %v3230_v43 = vsel %vm2519_vm11, %v3229_v30, %v3228_v6  ;;  %v3238_v48 = vrot.slane %v3237_v24, 7  ;;  %v11258_v12 = vld [vmem:[%s15322_s5 + $0x50] ss:$12 sps:$4 sm:$0xff]   ;;  %v11262_v0 = vld [vmem:[%s15322_s5 + $0x128] ss:$12 sps:$4 sm:$0xff]  }
 0x285   : > { %3233 = vst.msk [vmem:[#allocation2 + $0x19] ss:$8 sm:$0x7] %vm13344_vm12, %v3230_v43  ;;  %v3246_v41 = vpop.permute.xlu0 %3245  ;;  %v11261_v60 = vld [vmem:[%s15322_s5 + $0x64] ss:$12 sps:$4 sm:$0xff]  }
 0x286   : > { %v3239_v11 = vsel %vm2519_vm11, %v3238_v48, %v3237_v24  ;;  %v3247_v62 = vrot.slane %v3246_v41, 7  ;;  %9348 = vmatmul.mubr.msk.bf16.vlgmr.msra.gmra.mrb[20].mxu0 %vm2471_vm6, %v13433_v27  ;;  %10643 = vmatmul.mubr.msk.bf16.vlgmr.msra.gmra.mrb[28].mxu1 %vm2471_vm6, %v13463_v40  ;;  %v11259_v57 = vld [vmem:[%s15322_s5 + $0x60] ss:$12 sps:$4 sm:$0xff]   ;;  %v11263_v6 = vld [vmem:[%s15322_s5 + $0x68] ss:$12 sps:$4 sm:$0xff]  }
 0x287   : > { %3242 = vst.msk [vmem:[#allocation2 + $0x1a] ss:$8 sm:$0x7] %vm13344_vm12, %v3239_v11  ;;  %4325 = vmatpush1.bf16.msra.mxu0 %v11239_v44  ;;  %10299 = vmatpush3.bf16.msra.mxu1 %v11243_v52  ;;  %v3255_v2 = vpop.permute.xlu1 %3254  ;;  %v11266_v20 = vld [vmem:[%s15322_s5 + $0x7c] ss:$12 sps:$4 sm:$0xff]  }
 0x288   : > { %v3248_v63 = vsel %vm2519_vm11, %v3247_v62, %v3246_v41  ;;  %v3256_v27 = vrot.slane %v3255_v2, 7  ;;  %4326 = vmatprep.subr.bf16.mxu0 %v11246_v56  ;;  %10300 = vmatprep.subr.bf16.mxu1 %v11247_v5  ;;  %v11267_v24 = vld [vmem:[%s15322_s5 + $0x140] ss:$12 sps:$4 sm:$0xff]   ;;  %v11264_v48 = vld [vmem:[%s15322_s5 + $0x78] ss:$12 sps:$4 sm:$0xff]  }
 0x289   : > { %3251 = vst.msk [vmem:[#allocation2 + $0x1b] ss:$8 sm:$0x7] %vm13344_vm12, %v3248_v63  ;;  %v3264_v10 = vpop.permute.xlu0 %3263  ;;  %3908 = vmatprep.mubr.bf16.mxu0 %v15380_v39  ;;  %v3326_v5 = vld [vmem:[#allocation2 + $0x8] sm:$0xff] }
 0x28a   : > { %v3257_v49 = vsel %vm2519_vm11, %v3256_v27, %v3255_v2  ;;  %v3265_v18 = vrot.slane %v3264_v10, 7  ;;  %v11268_v11 = vld [vmem:[%s15322_s5 + $0x80] ss:$12 sps:$4 sm:$0xff]   ;;  %v11277_v27 = vld [vmem:[%s15322_s5 + $0x170] ss:$12 sps:$4 sm:$0xff]  }
 0x28b   : > { %3260 = vst.msk [vmem:[#allocation2 + $0x1c] ss:$8 sm:$0x7] %vm13344_vm12, %v3257_v49  ;;  %4327 = vmatpush1.bf16.msra.mxu0 %v11244_v21  ;;  %10301 = vmatpush3.bf16.msra.mxu1 %v11248_v22  ;;  %v3273_v33 = vpop.permute.xlu1 %3272  ;;  %v11271_v2 = vld [vmem:[%s15322_s5 + $0x94] ss:$12 sps:$4 sm:$0xff]  }
 0x28c   : > { %v3266_v4 = vsel %vm2519_vm11, %v3265_v18, %v3264_v10  ;;  %v3274_v47 = vrot.slane %v3273_v33, 7  ;;  %4328 = vmatprep.subr.bf16.mxu0 %v11251_v31  ;;  %10302 = vmatprep.subr.bf16.mxu1 %v11252_v55  ;;  %v11272_v21 = vld [vmem:[%s15322_s5 + $0x158] ss:$12 sps:$4 sm:$0xff]   ;;  %v11274_v31 = vld [vmem:[%s15322_s5 + $0xa8] ss:$12 sps:$4 sm:$0xff]  }
 0x28d   : > { %3269 = vst.msk [vmem:[#allocation2 + $0x1d] ss:$8 sm:$0x7] %vm13344_vm12, %v3266_v4  ;;  %v3282_v3 = vpop.permute.xlu0 %3281  ;;  %v11273_v22 = vld [vmem:[%s15322_s5 + $0x98] ss:$12 sps:$4 sm:$0xff]  }
 0x28e   : > { %v3275_v8 = vsel %vm2519_vm11, %v3274_v47, %v3273_v33  ;;  %v3283_v16 = vrot.slane %v3282_v3, 7  ;;  %9349 = vmatmul.mubr.msk.bf16.gmra.mrb[24].mxu0 %vm2471_vm6, %v13463_v40  ;;  %v11276_v63 = vld [vmem:[%s15322_s5 + $0xac] ss:$12 sps:$4 sm:$0xff]   ;;  %v11278_v55 = vld [vmem:[%s15322_s5 + $0xb0] ss:$12 sps:$4 sm:$0xff]  }
 0x28f   : > { %3278 = vst.msk [vmem:[#allocation2 + $0x1e] ss:$8 sm:$0x7] %vm13344_vm12, %v3275_v8  ;;  %4329 = vmatpush1.bf16.msra.mxu0 %v11249_v51  ;;  %10303 = vmatpush3.bf16.msra.mxu1 %v11253_v28  ;;  %v3291_v34 = vpop.permute.xlu1 %3290  ;;  %v11281_v10 = vld [vmem:[%s15322_s5 + $0xc4] ss:$12 sps:$4 sm:$0xff]  }
 0x290   : > { %v3284_v29 = vsel %vm2519_vm11, %v3283_v16, %v3282_v3  ;;  %v3292_v54 = vrot.slane %v3291_v34, 7  ;;  %4330 = vmatprep.subr.bf16.mxu0 %v11256_v50  ;;  %10304 = vmatprep.subr.bf16.mxu1 %v11257_v35  ;;  %v11282_v49 = vld [vmem:[%s15322_s5 + $0x188] ss:$12 sps:$4 sm:$0xff]   ;;  %v11279_v51 = vld [vmem:[%s15322_s5 + $0xc0] ss:$12 sps:$4 sm:$0xff]  }
 0x291   : > { %3287 = vst.msk [vmem:[#allocation2 + $0x1f] ss:$8 sm:$0x7] %vm13344_vm12, %v3284_v29  ;;  %v3300_v32 = vpop.permute.xlu0 %3299  ;;  %v3325_v28 = vld [vmem:[#allocation2] sm:$0xff]  ;;  %v11285_v47 = vld [vmem:[%s15322_s5 + $0xdc] ss:$12 sps:$4 sm:$0xff]  }
 0x292   : > { %v3293_v7 = vsel %vm2519_vm11, %v3292_v54, %v3291_v34  ;;  %v3301_v1 = vrot.slane %v3300_v32, 7  ;;  %v11286_v35 = vld [vmem:[%s15322_s5 + $0x1a0] ss:$12 sps:$4 sm:$0xff]   ;;  %v11283_v3 = vld [vmem:[%s15322_s5 + $0xd8] ss:$12 sps:$4 sm:$0xff]   ;;  %v3327_v54 = vld [vmem:[#allocation2 + $0x10] sm:$0xff] }
 0x293   : > { %3296 = vst.msk [vmem:[#allocation2 + $0x30] ss:$8 sm:$0x7] %vm13344_vm12, %v3293_v7  ;;  %4331 = vmatpush1.bf16.msra.mxu0 %v11254_v59  ;;  %10305 = vmatpush3.bf16.msra.mxu1 %v11258_v12  ;;  %v3309_v61 = vpop.permute.xlu1 %3308  ;;  %v11289_v8 = vld [vmem:[%s15322_s5 + $0xf4] ss:$12 sps:$4 sm:$0xff]  }
 0x294   : > { %v3302_v17 = vsel %vm2519_vm11, %v3301_v1, %v3300_v32  ;;  %v3310_v30 = vrot.slane %v3309_v61, 7  ;;  %4332 = vmatprep.subr.bf16.mxu0 %v11261_v60  ;;  %10306 = vmatprep.subr.bf16.mxu1 %v11262_v0  ;;  %v11290_v34 = vld [vmem:[%s15322_s5 + $0x1b8] ss:$0 sps:$4 sm:$0xff]   ;;  %v11287_v12 = vld [vmem:[%s15322_s5 + $0xf0] ss:$12 sps:$4 sm:$0xff]  }
 0x295   : > { %3305 = vst.msk [vmem:[#allocation2 + $0x31] ss:$8 sm:$0x7] %vm13344_vm12, %v3302_v17  ;;  %v3318_v44 = vpop.permute.xlu0 %3317  ;;  %v11293_v60 = vld [vmem:[%s15322_s5 + $0x10c] ss:$12 sps:$4 sm:$0xff]   ;;  %v4322_v32 = vsel %vm759_vm0, %v11290_v34, 0 }
 0x296   : > { %v3311_v52 = vsel %vm2519_vm11, %v3310_v30, %v3309_v61  ;;  %v3319_v43 = vrot.slane %v3318_v44, 7  ;;  %v11294_v7 = vld [vmem:[%s15322_s5 + $0x440] ss:$12 sps:$4 sm:$0xff]   ;;  %v11291_v61 = vld [vmem:[%s15322_s5 + $0x108] ss:$12 sps:$4 sm:$0xff]  }
 0x297   : > { %3314 = vst.msk [vmem:[#allocation2 + $0x32] ss:$8 sm:$0x7] %vm13344_vm12, %v3311_v52  ;;  %4333 = vmatpush1.bf16.msra.mxu0 %v11259_v57  ;;  %10307 = vmatpush3.bf16.msra.mxu1 %v11263_v6  ;;  %v11297_v6 = vld [vmem:[%s15322_s5 + $0x124] ss:$12 sps:$4 sm:$0xff]  }
 0x298   : > { %v3320_v56 = vsel %vm2519_vm11, %v3319_v43, %v3318_v44  ;;  %4334 = vmatprep.subr.bf16.mxu0 %v11266_v20  ;;  %v3329_v41 = vld [vmem:[#allocation2 + $0x20] sm:$0xff]  ;;  %10308 = vmatprep.subr.bf16.mxu1 %v11267_v24  ;;  %v3328_v18 = vld [vmem:[#allocation2 + $0x18] sm:$0xff]  ;;  %v3330_v59 = vld [vmem:[#allocation2 + $0x28] sm:$0xff] }
 0x299   : > { %3323 = vst.msk [vmem:[#allocation2 + $0x33] ss:$8 sm:$0x7] %vm13344_vm12, %v3320_v56  ;;  %v13617_v62 = vpack.c.bf16 %v3329_v41, %v3326_v5  ;;  %v13654_v4 = vpack.c.bf16 %v3328_v18, %v3325_v28  ;;  %v13683_v0 = vpack.c.bf16 %v3330_v59, %v3327_v54  ;;  %v11295_v20 = vld [vmem:[%s15322_s5 + $0x120] ss:$12 sps:$4 sm:$0xff]  }
 0x29a   : > { %v11298_v24 = vld [vmem:[%s15322_s5 + $0x380] ss:$12 sps:$4 sm:$0xff]   ;;  %v11302_v5 = vld [vmem:[%s15322_s5 + $0x13c] ss:$12 sps:$4 sm:$0xff]   ;;  %v11317_v18 = vld [vmem:[%s15322_s5 + $0x184] ss:$12 sps:$4 sm:$0xff]  }
 0x29b   : > { %4356 = vmatprep.mubr.bf16.mxu0 %v13617_v62  ;;  %4458 = vmatprep.mubr.bf16.mxu1 %v13617_v62  ;;  %v4612_v1 = vshll.u32 %v13617_v62, 16  ;;  %v4610_v44 = vshrl.u32 %v13617_v62, 16  ;;  %v11319_v28 = vld [vmem:[%s15322_s5 + $0x4b8] ss:$12 sps:$4 sm:$0xff]   ;;  %v4600_v54 = vshll.u32 %v13654_v4, 16 }
 0x29c   : > { %4335 = vmatpush1.bf16.msra.mxu0 %v11264_v48  ;;  %10309 = vmatpush3.bf16.msra.mxu1 %v11268_v11  ;;  %v11299_v48 = vld [vmem:[%s15322_s5 + $0x458] ss:$12 sps:$4 sm:$0xff]  }
 0x29d   : > { %4336 = vmatprep.subr.bf16.mxu0 %v11271_v2  ;;  %10310 = vmatprep.subr.bf16.mxu1 %v11272_v21  ;;  %v4614_v30 = vrot.slane %v4612_v1, 1  ;;  %v11300_v11 = vld [vmem:[%s15322_s5 + $0x138] ss:$12 sps:$4 sm:$0xff]   ;;  %v11304_v21 = vld [vmem:[%s15322_s5 + $0x470] ss:$12 sps:$4 sm:$0xff]  }
 0x29e   : > { %v11303_v2 = vld [vmem:[%s15322_s5 + $0x398] ss:$12 sps:$4 sm:$0xff]  }
 0x29f   : > { %v4615_v56 = vor.u32 %v4614_v30, %v4610_v44 }
 0x2a0   : > { %4337 = vmatpush1.bf16.msra.mxu0 %v11269_v25  ;;  %10311 = vmatpush3.bf16.msra.mxu1 %v11273_v22  ;;  %v3332_v33 = vld [vmem:[#allocation2 + $0x38] sm:$0x1f]  ;;  %v3331_v16 = vld [vmem:[#allocation2 + $0x30] sm:$0x1f]  ;;  %v3333_v17 = vld [vmem:[#allocation2 + $0x40] sm:$0x1f] }
 0x2a1   : > { %4338 = vmatprep.subr.bf16.mxu0 %v11276_v63  ;;  %10312 = vmatprep.subr.bf16.mxu1 %v11277_v27  ;;  %v13659_v50 = vpack.c.bf16 %v3332_v33, %v3332_v33  ;;  %v13678_v29 = vpack.c.bf16 %v3331_v16, %v3331_v16  ;;  %v13710_v43 = vpack.c.bf16 %v3333_v17, %v3333_v17  ;;  %v11307_v25 = vld [vmem:[%s15322_s5 + $0x154] ss:$12 sps:$4 sm:$0xff]   ;;  %v11305_v22 = vld [vmem:[%s15322_s5 + $0x150] ss:$12 sps:$4 sm:$0xff]   ;;  %v4598_v17 = vshrl.u32 %v13654_v4, 16 }
 0x2a2   : > { %v11308_v63 = vld [vmem:[%s15322_s5 + $0x3b0] ss:$12 sps:$4 sm:$0xff]   ;;  %v11309_v27 = vld [vmem:[%s15322_s5 + $0x488] ss:$12 sps:$4 sm:$0xff]   ;;  %v11318_v33 = vld [vmem:[%s15322_s5 + $0x3e0] ss:$12 sps:$4 sm:$0xff]  }
 0x2a3   : > { %v4617_v57 = vshll.u32 %v13659_v50, 16  ;;  %v11324_v16 = vld [vmem:[%s15322_s5 + $0x4d0] ss:$12 sps:$4 sm:$0xff]   ;;  %v4605_v1 = vshll.u32 %v13678_v29, 16  ;;  %v4634_v44 = vshrl.u32 %v13659_v50, 16 }
 0x2a4   : > { %4339 = vmatpush1.bf16.msra.mxu0 %v11274_v31  ;;  %10313 = vmatpush3.bf16.msra.mxu1 %v11278_v55  ;;  %v11312_v31 = vld [vmem:[%s15322_s5 + $0x16c] ss:$12 sps:$4 sm:$0xff]   ;;  %v11310_v55 = vld [vmem:[%s15322_s5 + $0x168] ss:$12 sps:$4 sm:$0xff]  }
 0x2a5   : > { %4340 = vmatprep.subr.bf16.mxu0 %v11281_v10  ;;  %10646 = vmatprep.subr.bf16.mxu1 %v11282_v49  ;;  %v13708_v52 = vrot.slane %v4617_v57, 1  ;;  %v11313_v10 = vld [vmem:[%s15322_s5 + $0x3c8] ss:$12 sps:$4 sm:$0xff]   ;;  %v4602_v57 = vrot.slane %v4600_v54, 1  ;;  %v4607_v30 = vrot.slane %v4605_v1, 1 }
 0x2a6   : > { %v11351_v54 = vld [vmem:[%s15322_s5 + $0x3f0] ss:$12 sps:$4 sm:$0xff]   ;;  %v11356_v1 = vld [vmem:[%s15322_s5 + $0x408] ss:$12 sps:$4 sm:$0xff]  }
 0x2a7   : > { %4459 = vmatmul.mubr.bf16.vlgmr.msra.gmra.mrb[32].mxu1 %v13654_v4  ;;  %v13722_v41 = vsel %vm1206_vm4, %v4615_v56, %v13708_v52  ;;  %v4623_v56 = vshll.u32 %v13683_v0, 16 }
 0x2a8   : > { %4341 = vmatpush1.bf16.msra.mxu0 %v11279_v51  ;;  %4466 = vmatprep.mubr.bf16.mxu1 %v13659_v50  ;;  %v11315_v51 = vld [vmem:[%s15322_s5 + $0x180] ss:$12 sps:$4 sm:$0xff]  }
 0x2a9   : > { %4342 = vmatprep.subr.bf16.mxu0 %v11285_v47  ;;  %10647 = vmatpush3.bf16.msra.mxu1 %v11282_v49  ;;  %v11314_v49 = vld [vmem:[%s15322_s5 + $0x4a0] ss:$12 sps:$4 sm:$0xff]   ;;  %v11323_v47 = vld [vmem:[%s15322_s5 + $0x19c] ss:$12 sps:$4 sm:$0xff]  }
 0x2aa   : > { %10648 = vmatprep.subr.bf16.mxu1 %v11286_v35 }
 0x2ac   : > { %4343 = vmatpush1.bf16.msra.mxu0 %v11283_v3  ;;  %v11320_v3 = vld [vmem:[%s15322_s5 + $0x3f8] ss:$12 sps:$4 sm:$0xff]  }
 0x2ad   : > { %4344 = vmatprep.subr.bf16.mxu0 %v11289_v8  ;;  %10649 = vmatpush3.bf16.msra.mxu1 %v11286_v35  ;;  %v3421_v35 = vld [vmem:[%s15322_s5 + $0x1b0] sm:$0xff]  ;;  %v11321_v8 = vld [vmem:[%s15322_s5 + $0x198] ss:$12 sps:$4 sm:$0xff]  }
 0x2ae   : > { %11012 = vmatprep.subr.msk.bf16.mxu1 %vm759_vm0, %v11290_v34  ;;  %v9407_v34 = vcombine.high %v3421_v35, %v3421_v35  ;;  %v9406_v59 = vcombine.low %v3421_v35, %v3421_v35  ;;  %v11342_v35 = vld [vmem:[%s15322_s5 + $0x3c0] ss:$12 sps:$4 sm:$0xff]  }
 0x2af   : > { %4467 = vmatmul.mubr.bf16.gmra.mrb[36].mxu1 %v13678_v29 }
 0x2b0   : > { %4345 = vmatpush1.bf16.msra.mxu0 %v11287_v12  ;;  %10652 = vmatprep.mubr.msk.bf16.mxu1 %vm2471_vm6, %v13683_v0  ;;  %v11325_v12 = vld [vmem:[%s15322_s5 + $0x410] ss:$12 sps:$4 sm:$0xff]  }
 0x2b1   : > { %4346 = vmatprep.subr.bf16.mxu0 %v11293_v60  ;;  %10651 = vmatpush3.bf16.msra.mxu1 %v4322_v32  ;;  %v11327_v60 = vld [vmem:[%s15322_s5 + $0x4e8] ss:$12 sps:$4 sm:$0xff]   ;;  %v4316_v32 = vsel %vm759_vm0, %v9406_v59, 0 }
 0x2b2   : > { %10331 = vmatprep.subr.bf16.mxu1 %v11294_v7  ;;  %v11332_v7 = vld [vmem:[%s15322_s5 + $0x37c] ss:$12 sps:$4 sm:$0xff]  }
 0x2b4   : > { %4347 = vmatpush1.bf16.msra.mxu0 %v11291_v61  ;;  %v11329_v61 = vld [vmem:[%s15322_s5 + $0x428] ss:$12 sps:$4 sm:$0xff]  }
 0x2b5   : > { %4348 = vmatprep.subr.bf16.mxu0 %v11297_v6  ;;  %v11333_v6 = vld [vmem:[%s15322_s5 + $0x500] ss:$12 sps:$4 sm:$0xff]  }
 0x2b7   : > { %10653 = vmatmul.mubr.msk.bf16.vlgmr.msra.gmra.mrb[28].mxu1 %vm2471_vm6, %v13710_v43 }
 0x2b8   : > { %10332 = vmatpush3.bf16.msra.mxu1 %v11298_v24  ;;  %4349 = vmatpush1.bf16.msra.mxu0 %v11295_v20  ;;  %v11330_v20 = vld [vmem:[%s15322_s5 + $0x378] ss:$12 sps:$4 sm:$0xff]   ;;  %v4603_v24 = vor.u32 %v4602_v57, %v4598_v17  ;;  %v11361_v17 = vld [vmem:[%s15322_s5 + $0x420] ss:$12 sps:$4 sm:$0xff]  }
 0x2b9   : > { %5089 = vmatprep.mubr.bf16.mxu1 %v13722_v41  ;;  %10333 = vmatprep.subr.bf16.mxu1 %v11299_v48  ;;  %v11336_v48 = vld [vmem:[%s15322_s5 + $0x394] ss:$12 sps:$4 sm:$0xff]   ;;  %v11360_v57 = vld [vmem:[%s15322_s5 + $0x644] ss:$12 sps:$4 sm:$0xff]  }
 0x2ba   : > { %4350 = vmatprep.subr.bf16.mxu0 %v11302_v5  ;;  %v13818_v5 = vsel %vm1206_vm4, %v4603_v24, %v4607_v30  ;;  %v11368_v24 = vld [vmem:[%s15322_s5 + $0x43c] ss:$12 sps:$4 sm:$0xff]  }
 0x2bc   : > { %10334 = vmatpush3.bf16.msra.mxu1 %v11303_v2  ;;  %4351 = vmatpush1.bf16.msra.mxu0 %v11300_v11  ;;  %v13821_v11 = vor.u32 %v4634_v44, %v13708_v52  ;;  %v11337_v2 = vld [vmem:[%s15322_s5 + $0x518] ss:$12 sps:$4 sm:$0xff]  }
 0x2bd   : > { %10335 = vmatprep.subr.bf16.mxu1 %v11304_v21  ;;  %4352 = vmatprep.subr.bf16.mxu0 %v11307_v25  ;;  %v4627_v21 = vshll.u32 %v13710_v43, 16  ;;  %v11334_v25 = vld [vmem:[%s15322_s5 + $0x390] ss:$12 sps:$4 sm:$0xff]   ;;  %v11340_v52 = vld [vmem:[%s15322_s5 + $0x3ac] ss:$12 sps:$4 sm:$0xff]  }
 0x2be   : > { %v11366_v44 = vld [vmem:[%s15322_s5 + $0x438] ss:$12 sps:$4 sm:$0xff]  }
 0x2c0   : > { %10336 = vmatpush3.bf16.msra.mxu1 %v11308_v63  ;;  %4353 = vmatpush1.bf16.msra.mxu0 %v11305_v22  ;;  %v4625_v22 = vrot.slane %v4623_v56, 1  ;;  %v11341_v63 = vld [vmem:[%s15322_s5 + $0x530] ss:$0 sps:$4 sm:$0xff]   ;;  %v11370_v56 = vld [vmem:[%s15322_s5 + $0x674] ss:$12 sps:$4 sm:$0xff]  }
 0x2c1   : > { %10337 = vmatprep.subr.bf16.mxu1 %v11309_v27  ;;  %4354 = vmatprep.subr.bf16.mxu0 %v11312_v31  ;;  %v4631_v27 = vshrl.u32 %v13678_v29, 16  ;;  %v4621_v31 = vshrl.u32 %v13683_v0, 16 }
 0x2c4   : > { %10338 = vmatpush3.bf16.msra.mxu1 %v11313_v10  ;;  %4355 = vmatpush1.bf16.msra.mxu0 %v11310_v55  ;;  %v4629_v55 = vrot.slane %v4627_v21, 1  ;;  %v11338_v10 = vld [vmem:[%s15322_s5 + $0x3a8] ss:$12 sps:$4 sm:$0xff]   ;;  %v11371_v21 = vld [vmem:[%s15322_s5 + $0x450] ss:$12 sps:$4 sm:$0xff]  }
 0x2c5   : > { %10339 = vmatprep.subr.bf16.mxu1 %v11314_v49  ;;  %4375 = vmatprep.subr.bf16.mxu0 %v11317_v18  ;;  %v13846_v49 = vor.u32 %v4631_v27, %v4607_v30  ;;  %v4626_v18 = vor.u32 %v4625_v22, %v4621_v31  ;;  %v11364_v30 = vld [vmem:[%s15322_s5 + $0x584] ss:$12 sps:$4 sm:$0xff]   ;;  %v11378_v22 = vld [vmem:[%s15322_s5 + $0x46c] ss:$12 sps:$4 sm:$0xff]  }
 0x2c6   : > { %v11379_v27 = vld [vmem:[%s15322_s5 + $0x5cc] ss:$12 sps:$4 sm:$0xff]   ;;  %v11380_v31 = vld [vmem:[%s15322_s5 + $0x6a4] ss:$12 sps:$4 sm:$0xff]  }
 0x2c7   : > { %4357 = vmatmul.mubr.bf16.vlgmr.msra.gmra.mrb[20].mxu0 %v13654_v4 }
 0x2c8   : > { %10340 = vmatpush3.bf16.msra.mxu1 %v11318_v33  ;;  %4366 = vmatprep.mubr.bf16.mxu0 %v13659_v50  ;;  %v11344_v33 = vld [vmem:[%s15322_s5 + $0x3c4] ss:$12 sps:$4 sm:$0xff]  }
 0x2c9   : > { %4376 = vmatpush1.bf16.msra.mxu0 %v11315_v51  ;;  %10341 = vmatprep.subr.bf16.mxu1 %v11319_v28  ;;  %v13856_v51 = vsel %vm1206_vm4, %v4626_v18, %v4629_v55  ;;  %v4953_v28 = vsel %vm759_vm0, %v11341_v63, 0  ;;  %v11384_v18 = vld [vmem:[%s15322_s5 + $0x5e4] ss:$12 sps:$4 sm:$0xff]   ;;  %vm8923_vm4 = vcmask 57344  }
 0x2ca   : > { %4377 = vmatprep.subr.bf16.mxu0 %v11323_v47  ;;  %v11345_v47 = vld [vmem:[%s15322_s5 + $0x5fc] ss:$12 sps:$4 sm:$0xff]  }
 0x2cc   : > { %10342 = vmatpush3.bf16.msra.mxu1 %v11320_v3  ;;  %v11348_v3 = vld [vmem:[%s15322_s5 + $0x3dc] ss:$12 sps:$4 sm:$0xff]  }
 0x2cd   : > { %4378 = vmatpush1.bf16.msra.mxu0 %v11321_v8  ;;  %10343 = vmatprep.subr.bf16.mxu1 %v11324_v16  ;;  %v4637_v8 = vshrl.u32 %v13710_v43, 16  ;;  %v11346_v16 = vld [vmem:[%s15322_s5 + $0x3d8] ss:$12 sps:$4 sm:$0xff]  }
 0x2ce   : > { %9409 = vmatprep.subr.msk.bf16.mxu0 %vm759_vm0, %v9407_v34  ;;  %v11349_v34 = vld [vmem:[%s15322_s5 + $0x53c] ss:$12 sps:$4 sm:$0xff]  }
 0x2cf   : > { %4367 = vmatmul.mubr.bf16.gmra.mrb[24].mxu0 %v13678_v29  ;;  %v13878_v59 = vor.u32 %v4637_v8, %v4629_v55  ;;  %v11383_v55 = vld [vmem:[%s15322_s5 + $0x484] ss:$12 sps:$4 sm:$0xff]  }
 0x2d0   : > { %10344 = vmatpush3.bf16.msra.mxu1 %v11325_v12  ;;  %4407 = vmatprep.mubr.bf16.mxu0 %v15380_v39  ;;  %v11353_v12 = vld [vmem:[%s15322_s5 + $0x3f4] ss:$12 sps:$4 sm:$0xff]  }
 0x2d1   : > { %10345 = vmatprep.subr.bf16.mxu1 %v11327_v60  ;;  %4380 = vmatpush1.bf16.msra.mxu0 %v4316_v32  ;;  %v11354_v60 = vld [vmem:[%s15322_s5 + $0x554] ss:$12 sps:$4 sm:$0xff]   ;;  %v11355_v32 = vld [vmem:[%s15322_s5 + $0x62c] ss:$12 sps:$4 sm:$0xff]  }
 0x2d2   : > { %4955 = vmatprep.subr.bf16.mxu0 %v11332_v7  ;;  %v11358_v7 = vld [vmem:[%s15322_s5 + $0x40c] ss:$12 sps:$4 sm:$0xff]  }
 0x2d4   : > { %10346 = vmatpush3.bf16.msra.mxu1 %v11329_v61  ;;  %v11359_v61 = vld [vmem:[%s15322_s5 + $0x56c] ss:$12 sps:$4 sm:$0xff]  }
 0x2d5   : > { %10656 = vmatprep.subr.bf16.mxu1 %v11333_v6 }
 0x2d7   : > { %5090 = vmatmul.mubr.bf16.vlgmr.msra.gmra.mrb[40].mxu1 %v13818_v5  ;;  %9410 = vmatmul.mubr.msk.bf16.vlgmr.msra.gmra.mrb[20].mxu0 %vm2471_vm6, %v13683_v0 }
 0x2d8   : > { %4956 = vmatpush1.bf16.msra.mxu0 %v11330_v20  ;;  %5097 = vmatprep.mubr.bf16.mxu1 %v13821_v11  ;;  %v11365_v20 = vld [vmem:[%s15322_s5 + $0x65c] ss:$12 sps:$4 sm:$0xff]  }
 0x2d9   : > { %4957 = vmatprep.subr.bf16.mxu0 %v11336_v48  ;;  %10657 = vmatpush3.bf16.msra.mxu1 %v11333_v6  ;;  %v11363_v6 = vld [vmem:[%s15322_s5 + $0x424] ss:$12 sps:$4 sm:$0xff]   ;;  %v11369_v48 = vld [vmem:[%s15322_s5 + $0x59c] ss:$12 sps:$4 sm:$0xff]  }
 0x2da   : > { %10658 = vmatprep.subr.bf16.mxu1 %v11337_v2  ;;  %4417 = vmatprep.mubr.bf16.mxu0 %v15380_v39 }
 0x2dc   : > { %4958 = vmatpush1.bf16.msra.mxu0 %v11334_v25  ;;  %v11374_v25 = vld [vmem:[%s15322_s5 + $0x5b4] ss:$12 sps:$4 sm:$0xff]  }
 0x2dd   : > { %4959 = vmatprep.subr.bf16.mxu0 %v11340_v52  ;;  %10659 = vmatpush3.bf16.msra.mxu1 %v11337_v2  ;;  %v11373_v2 = vld [vmem:[%s15322_s5 + $0x454] ss:$12 sps:$4 sm:$0xff]   ;;  %v11375_v52 = vld [vmem:[%s15322_s5 + $0x68c] ss:$12 sps:$4 sm:$0xff]  }
 0x2de   : > { %11013 = vmatprep.subr.msk.bf16.mxu1 %vm759_vm0, %v11341_v63  ;;  %v11376_v63 = vld [vmem:[%s15322_s5 + $0x468] ss:$12 sps:$4 sm:$0xff]  }
 0x2df   : > { %5098 = vmatmul.mubr.bf16.gmra.mrb[44].mxu1 %v13846_v49  ;;  %9411 = vmatmul.mubr.msk.bf16.gmra.mrb[24].mxu0 %vm2471_vm6, %v13710_v43 }
 0x2e0   : > { %4960 = vmatpush1.bf16.msra.mxu0 %v11338_v10  ;;  %10662 = vmatprep.mubr.msk.bf16.mxu1 %vm2471_vm6, %v13856_v51  ;;  %v11381_v10 = vld [vmem:[%s15322_s5 + $0x480] ss:$12 sps:$4 sm:$0xff]  }
 0x2e1   : > { %4987 = vmatprep.mubr.bf16.mxu0 %v13722_v41  ;;  %4961 = vmatprep.subr.bf16.mxu0 %v11344_v33  ;;  %v11350_v41 = vld [vmem:[%s15322_s5 + $0x614] ss:$12 sps:$4 sm:$0xff]   ;;  %v11387_v33 = vld [vmem:[%s15322_s5 + $0x49c] ss:$12 sps:$4 sm:$0xff]  }
 0x2e2   : > { %10661 = vmatpush3.bf16.msra.mxu1 %v4953_v28  ;;  %v11388_v28 = vld [vmem:[%s15322_s5 + $0x6bc] ss:$12 sps:$4 sm:$0xff]  }
 0x2e3   : > { %10364 = vmatprep.subr.bf16.mxu1 %v11345_v47  ;;  %v11385_v47 = vld [vmem:[%s15322_s5 + $0x498] ss:$12 sps:$4 sm:$0xff]  }
 0x2e4   : > { %4962 = vmatpush1.bf16.msra.mxu0 %v11342_v35  ;;  %v5274_v35 = vshrl.u32 %v13452_v58, 16  ;;  %v11389_v58 = vld [vmem:[%s15322_s5 + $0x4b0] ss:$12 sps:$4 sm:$0xff]  }
 0x2e5   : > { %4963 = vmatprep.subr.bf16.mxu0 %v11348_v3  ;;  %v11391_v3 = vld [vmem:[%s15322_s5 + $0x4b4] ss:$12 sps:$4 sm:$0xff]  }
 0x2e6   : > { %v13981_v8 = vor.u32 %v5274_v35, %v13484_v19  ;;  %v11395_v19 = vld [vmem:[%s15322_s5 + $0x4cc] ss:$12 sps:$4 sm:$0xff]   ;;  %v11432_v35 = vld [vmem:[%s15322_s5 + $0x57c] ss:$12 sps:$4 sm:$0xff]  }
 0x2e7   : > { %10663 = vmatmul.mubr.msk.bf16.vlgmr.msra.gmra.mrb[28].mxu1 %vm2471_vm6, %v13878_v59 }
 0x2e8   : > { %10365 = vmatpush3.bf16.msra.mxu1 %v11349_v34  ;;  %4964 = vmatpush1.bf16.msra.mxu0 %v11346_v16  ;;  %v11392_v16 = vld [vmem:[%s15322_s5 + $0x6d4] ss:$12 sps:$4 sm:$0xff]   ;;  %v11396_v34 = vld [vmem:[%s15322_s5 + $0x6ec] ss:$0 sps:$4 sm:$0xff]  }
 0x2e9   : > { %5729 = vmatprep.mubr.bf16.mxu1 %v13496_v46  ;;  %10366 = vmatprep.subr.bf16.mxu1 %v11350_v41  ;;  %v5271_v41 = vshrl.u32 %v13454_v37, 16  ;;  %v11400_v37 = vld [vmem:[%s15322_s5 + $0x7b8] ss:$12 sps:$4 sm:$0xff]  }
 0x2ea   : > { %4965 = vmatprep.subr.bf16.mxu0 %v11353_v12  ;;  %v11393_v12 = vld [vmem:[%s15322_s5 + $0x4c8] ss:$12 sps:$4 sm:$0xff]  }
 0x2ec   : > { %10367 = vmatpush3.bf16.msra.mxu1 %v11354_v60  ;;  %4966 = vmatpush1.bf16.msra.mxu0 %v11351_v54  ;;  %v14002_v54 = vor.u32 %v5271_v41, %v13486_v42  ;;  %v11399_v60 = vld [vmem:[%s15322_s5 + $0x4e4] ss:$12 sps:$4 sm:$0xff]   ;;  %v11397_v42 = vld [vmem:[%s15322_s5 + $0x4e0] ss:$12 sps:$4 sm:$0xff]  }
 0x2ed   : > { %10368 = vmatprep.subr.bf16.mxu1 %v11355_v32  ;;  %4967 = vmatprep.subr.bf16.mxu0 %v11358_v7  ;;  %v5593_v32 = vsel %vm759_vm0, %v11396_v34, 0  ;;  %v11404_v7 = vld [vmem:[%s15322_s5 + $0x4fc] ss:$12 sps:$4 sm:$0xff]  }
 0x2f0   : > { %10369 = vmatpush3.bf16.msra.mxu1 %v11359_v61  ;;  %4968 = vmatpush1.bf16.msra.mxu0 %v11356_v1  ;;  %v5277_v1 = vshrl.u32 %v13463_v40, 16  ;;  %v14023_v61 = vrot.slane %v13659_v50, 1  ;;  %v11405_v40 = vld [vmem:[%s15322_s5 + $0x7d0] ss:$12 sps:$4 sm:$0xff]   ;;  %v11409_v50 = vld [vmem:[%s15322_s5 + $0x514] ss:$12 sps:$4 sm:$0xff]  }
 0x2f1   : > { %10370 = vmatprep.subr.bf16.mxu1 %v11360_v57  ;;  %4969 = vmatprep.subr.bf16.mxu0 %v11363_v6  ;;  %v11401_v57 = vld [vmem:[%s15322_s5 + $0x6f8] ss:$12 sps:$4 sm:$0xff]  }
 0x2f2   : > { %v14029_v6 = vor.u32 %v5277_v1, %v13503_v45 }
 0x2f4   : > { %10371 = vmatpush3.bf16.msra.mxu1 %v11364_v30  ;;  %4970 = vmatpush1.bf16.msra.mxu0 %v11361_v17  ;;  %v11402_v17 = vld [vmem:[%s15322_s5 + $0x4f8] ss:$12 sps:$4 sm:$0xff]   ;;  %v5886_v30 = vrot.slane %v13617_v62, 1  ;;  %v9486_v62 = vld [vmem:[%s15322_s5 + $0x528] sm:$0xff] }
 0x2f5   : > { %10372 = vmatprep.subr.bf16.mxu1 %v11365_v20  ;;  %4971 = vmatprep.subr.bf16.mxu0 %v11368_v24  ;;  %v11406_v20 = vld [vmem:[%s15322_s5 + $0x710] ss:$12 sps:$4 sm:$0xff]   ;;  %v11410_v24 = vld [vmem:[%s15322_s5 + $0x7e8] ss:$12 sps:$4 sm:$0xff]  }
 0x2f6   : > { %v14046_v45 = vsel %vm1898_vm5, %v5886_v30, %v14023_v61  ;;  %v11456_v30 = vld [vmem:[%s15322_s5 + $0x610] ss:$12 sps:$4 sm:$0xff]  }
 0x2f8   : > { %10373 = vmatpush3.bf16.msra.mxu1 %v11369_v48  ;;  %4972 = vmatpush1.bf16.msra.mxu0 %v11366_v44  ;;  %v9543_v44 = vcombine.high %v9486_v62, %v9486_v62  ;;  %v9542_v48 = vcombine.low %v9486_v62, %v9486_v62  ;;  %v11459_v62 = vld [vmem:[%s15322_s5 + $0x628] ss:$12 sps:$4 sm:$0xff]  }
 0x2f9   : > { %10374 = vmatprep.subr.bf16.mxu1 %v11370_v56  ;;  %4973 = vmatprep.subr.bf16.mxu0 %v11373_v2  ;;  %v11411_v56 = vld [vmem:[%s15322_s5 + $0x728] ss:$12 sps:$4 sm:$0xff]  }
 0x2fa   : > { %v4947_v2 = vsel %vm759_vm0, %v9542_v48, 0 }
 0x2fc   : > { %10375 = vmatpush3.bf16.msra.mxu1 %v11374_v25  ;;  %4974 = vmatpush1.bf16.msra.mxu0 %v11371_v21  ;;  %v11419_v21 = vld [vmem:[%s15322_s5 + $0x538] ss:$12 sps:$4 sm:$0xff]   ;;  %v11414_v25 = vld [vmem:[%s15322_s5 + $0x740] ss:$12 sps:$4 sm:$0xff]  }
 0x2fd   : > { %10376 = vmatprep.subr.bf16.mxu1 %v11375_v52  ;;  %4975 = vmatprep.subr.bf16.mxu0 %v11378_v22  ;;  %v11416_v52 = vld [vmem:[%s15322_s5 + $0x818] ss:$12 sps:$4 sm:$0xff]   ;;  %v11417_v22 = vld [vmem:[%s15322_s5 + $0x534] ss:$12 sps:$4 sm:$0xff]  }
 0x300   : > { %10377 = vmatpush3.bf16.msra.mxu1 %v11379_v27  ;;  %4976 = vmatpush1.bf16.msra.mxu0 %v11376_v63  ;;  %v11421_v63 = vld [vmem:[%s15322_s5 + $0x830] ss:$12 sps:$4 sm:$0xff]  }
 0x301   : > { %10378 = vmatprep.subr.bf16.mxu1 %v11380_v31  ;;  %4977 = vmatprep.subr.bf16.mxu0 %v11383_v55  ;;  %v11424_v27 = vld [vmem:[%s15322_s5 + $0x550] ss:$12 sps:$4 sm:$0xff]   ;;  %v11422_v31 = vld [vmem:[%s15322_s5 + $0x54c] ss:$12 sps:$4 sm:$0xff]  }
 0x302   : > { %v11425_v55 = vld [vmem:[%s15322_s5 + $0x770] ss:$12 sps:$4 sm:$0xff]  }
 0x304   : > { %10379 = vmatpush3.bf16.msra.mxu1 %v11384_v18  ;;  %4978 = vmatpush1.bf16.msra.mxu0 %v11381_v10  ;;  %v11426_v10 = vld [vmem:[%s15322_s5 + $0x848] ss:$12 sps:$4 sm:$0xff]   ;;  %v11427_v18 = vld [vmem:[%s15322_s5 + $0x564] ss:$12 sps:$4 sm:$0xff]  }
 0x305   : > { %4979 = vmatprep.subr.bf16.mxu0 %v11387_v33  ;;  %10666 = vmatprep.subr.bf16.mxu1 %v11388_v28  ;;  %v11430_v33 = vld [vmem:[%s15322_s5 + $0x788] ss:$12 sps:$4 sm:$0xff]  }
 0x307   : > { %5730 = vmatmul.mubr.bf16.vlgmr.msra.gmra.mrb[48].mxu1 %v13500_v38 }
 0x308   : > { %5737 = vmatprep.mubr.bf16.mxu1 %v13981_v8  ;;  %4980 = vmatpush1.bf16.msra.mxu0 %v11385_v47  ;;  %v11434_v47 = vld [vmem:[%s15322_s5 + $0x580] ss:$12 sps:$4 sm:$0xff]  }
 0x309   : > { %10667 = vmatpush3.bf16.msra.mxu1 %v11388_v28  ;;  %4981 = vmatprep.subr.bf16.mxu0 %v11391_v3  ;;  %v11431_v28 = vld [vmem:[%s15322_s5 + $0x860] ss:$12 sps:$4 sm:$0xff]  }
 0x30a   : > { %10668 = vmatprep.subr.bf16.mxu1 %v11392_v16  ;;  %v11435_v3 = vld [vmem:[%s15322_s5 + $0x7a0] ss:$12 sps:$4 sm:$0xff]  }
 0x30c   : > { %4982 = vmatpush1.bf16.msra.mxu0 %v11389_v58  ;;  %v14136_v58 = vrot.slane %v13678_v29, 1  ;;  %v11443_v29 = vld [vmem:[%s15322_s5 + $0x890] ss:$12 sps:$4 sm:$0xff]  }
 0x30d   : > { %10669 = vmatpush3.bf16.msra.mxu1 %v11392_v16  ;;  %4983 = vmatprep.subr.bf16.mxu0 %v11395_v19  ;;  %v11438_v16 = vld [vmem:[%s15322_s5 + $0x598] ss:$12 sps:$4 sm:$0xff]   ;;  %v5883_v19 = vrot.slane %v13654_v4, 1 }
 0x30e   : > { %11014 = vmatprep.subr.msk.bf16.mxu1 %vm759_vm0, %v11396_v34  ;;  %v11442_v34 = vld [vmem:[%s15322_s5 + $0x5b0] ss:$12 sps:$4 sm:$0xff]   ;;  %v11440_v4 = vld [vmem:[%s15322_s5 + $0x5ac] ss:$12 sps:$4 sm:$0xff]  }
 0x30f   : > { %5738 = vmatmul.mubr.bf16.gmra.mrb[52].mxu1 %v14002_v54  ;;  %v14147_v41 = vsel %vm1898_vm5, %v5883_v19, %v14136_v58 }
 0x310   : > { %10672 = vmatprep.mubr.msk.bf16.mxu1 %vm2471_vm6, %v13522_v9  ;;  %4984 = vmatpush1.bf16.msra.mxu0 %v11393_v12  ;;  %v11446_v12 = vld [vmem:[%s15322_s5 + $0x5c8] ss:$12 sps:$4 sm:$0xff]  }
 0x311   : > { %10671 = vmatpush3.bf16.msra.mxu1 %v5593_v32  ;;  %4985 = vmatprep.subr.bf16.mxu0 %v11399_v60  ;;  %v11447_v60 = vld [vmem:[%s15322_s5 + $0x8a8] ss:$0 sps:$4 sm:$0xff]   ;;  %v14164_v32 = vrot.slane %v13710_v43, 1 }
 0x312   : > { %10397 = vmatprep.subr.bf16.mxu1 %v11400_v37  ;;  %v11444_v37 = vld [vmem:[%s15322_s5 + $0x5c4] ss:$12 sps:$4 sm:$0xff]   ;;  %v6205_v1 = vsel %vm759_vm0, %v11447_v60, 0 }
 0x314   : > { %4986 = vmatpush1.bf16.msra.mxu0 %v11397_v42  ;;  %v5889_v42 = vrot.slane %v13683_v0, 1  ;;  %v11448_v0 = vld [vmem:[%s15322_s5 + $0x5dc] ss:$12 sps:$4 sm:$0xff]  }
 0x315   : > { %5006 = vmatprep.subr.bf16.mxu0 %v11404_v7  ;;  %v11450_v7 = vld [vmem:[%s15322_s5 + $0x5e0] ss:$12 sps:$4 sm:$0xff]  }
 0x316   : > { %v14178_v43 = vsel %vm1898_vm5, %v5889_v42, %v14164_v32 }
 0x317   : > { %10673 = vmatmul.mubr.msk.bf16.vlgmr.msra.gmra.mrb[28].mxu1 %vm2471_vm6, %v14029_v6  ;;  %4988 = vmatmul.mubr.bf16.vlgmr.msra.gmra.mrb[20].mxu0 %v13818_v5  ;;  %v11407_v5 = vld [vmem:[%s15322_s5 + $0x510] ss:$12 sps:$4 sm:$0xff]  }
 0x318   : > { %10398 = vmatpush3.bf16.msra.mxu1 %v11401_v57  ;;  %6341 = vmatprep.mubr.bf16.mxu1 %v14046_v45  ;;  %v11453_v57 = vld [vmem:[%s15322_s5 + $0x5f8] ss:$12 sps:$4 sm:$0xff]  }
 0x319   : > { %4997 = vmatprep.mubr.bf16.mxu0 %v13821_v11  ;;  %5007 = vmatpush1.bf16.msra.mxu0 %v11402_v17  ;;  %v11412_v11 = vld [vmem:[%s15322_s5 + $0x800] ss:$12 sps:$4 sm:$0xff]  }
 0x31a   : > { %10399 = vmatprep.subr.bf16.mxu1 %v11405_v40  ;;  %5008 = vmatprep.subr.bf16.mxu0 %v11409_v50  ;;  %v11451_v17 = vld [vmem:[%s15322_s5 + $0x5f4] ss:$12 sps:$4 sm:$0xff]   ;;  %v11454_v40 = vld [vmem:[%s15322_s5 + $0x60c] ss:$12 sps:$4 sm:$0xff]  }
 0x31c   : > { %10400 = vmatpush3.bf16.msra.mxu1 %v11406_v20 }
 0x31d   : > { %10401 = vmatprep.subr.bf16.mxu1 %v11410_v24  ;;  %5009 = vmatpush1.bf16.msra.mxu0 %v11407_v5 }
 0x31e   : > { %9545 = vmatprep.subr.msk.bf16.mxu0 %vm759_vm0, %v9543_v44  ;;  %v11457_v44 = vld [vmem:[%s15322_s5 + $0x624] ss:$12 sps:$4 sm:$0xff]  }
 0x31f   : > { %4998 = vmatmul.mubr.bf16.gmra.mrb[24].mxu0 %v13846_v49  ;;  %v11420_v49 = vld [vmem:[%s15322_s5 + $0x758] ss:$12 sps:$4 sm:$0xff]  }
 0x320   : > { %10402 = vmatpush3.bf16.msra.mxu1 %v11411_v56  ;;  %5038 = vmatprep.mubr.bf16.mxu0 %v15380_v39 }
 0x321   : > { %10403 = vmatprep.subr.bf16.mxu1 %v11412_v11  ;;  %5011 = vmatpush1.bf16.msra.mxu0 %v4947_v2  ;;  %v11462_v11 = vld [vmem:[%s15322_s5 + $0x640] ss:$12 sps:$4 sm:$0xff]   ;;  %v11460_v2 = vld [vmem:[%s15322_s5 + $0x63c] ss:$12 sps:$4 sm:$0xff]  }
 0x322   : > { %5595 = vmatprep.subr.bf16.mxu0 %v11419_v21 }
 0x324   : > { %10404 = vmatpush3.bf16.msra.mxu1 %v11414_v25  ;;  %v11465_v25 = vld [vmem:[%s15322_s5 + $0x658] ss:$12 sps:$4 sm:$0xff]  }
 0x325   : > { %10405 = vmatprep.subr.bf16.mxu1 %v11416_v52 }
 0x327   : > { %9546 = vmatmul.mubr.msk.bf16.vlgmr.msra.gmra.mrb[20].mxu0 %vm2471_vm6, %v13856_v51  ;;  %v11429_v51 = vld [vmem:[%s15322_s5 + $0x568] ss:$12 sps:$4 sm:$0xff]  }
 0x328   : > { %10406 = vmatpush3.bf16.msra.mxu1 %v11420_v49  ;;  %5596 = vmatpush1.bf16.msra.mxu0 %v11417_v22 }
 0x329   : > { %10407 = vmatprep.subr.bf16.mxu1 %v11421_v63  ;;  %5597 = vmatprep.subr.bf16.mxu0 %v11424_v27  ;;  %v11463_v63 = vld [vmem:[%s15322_s5 + $0x654] ss:$12 sps:$4 sm:$0xff]  }
 0x32a   : > { %5048 = vmatprep.mubr.bf16.mxu0 %v15380_v39 }
 0x32c   : > { %10408 = vmatpush3.bf16.msra.mxu1 %v11425_v55  ;;  %5598 = vmatpush1.bf16.msra.mxu0 %v11422_v31  ;;  %v11468_v31 = vld [vmem:[%s15322_s5 + $0x670] ss:$12 sps:$4 sm:$0xff]   ;;  %v11466_v55 = vld [vmem:[%s15322_s5 + $0x66c] ss:$12 sps:$4 sm:$0xff]  }
 0x32d   : > { %10409 = vmatprep.subr.bf16.mxu1 %v11426_v10  ;;  %5599 = vmatprep.subr.bf16.mxu0 %v11429_v51  ;;  %v11471_v10 = vld [vmem:[%s15322_s5 + $0x688] ss:$12 sps:$4 sm:$0xff]   ;;  %v11469_v51 = vld [vmem:[%s15322_s5 + $0x684] ss:$12 sps:$4 sm:$0xff]  }
 0x32f   : > { %9547 = vmatmul.mubr.msk.bf16.gmra.mrb[24].mxu0 %vm2471_vm6, %v13878_v59  ;;  %v11439_v59 = vld [vmem:[%s15322_s5 + $0x878] ss:$12 sps:$4 sm:$0xff]  }
 0x330   : > { %10410 = vmatpush3.bf16.msra.mxu1 %v11430_v33  ;;  %5600 = vmatpush1.bf16.msra.mxu0 %v11427_v18  ;;  %v11474_v18 = vld [vmem:[%s15322_s5 + $0x6a0] ss:$12 sps:$4 sm:$0xff]   ;;  %v11472_v33 = vld [vmem:[%s15322_s5 + $0x69c] ss:$12 sps:$4 sm:$0xff]  }
 0x331   : > { %5627 = vmatprep.mubr.bf16.mxu0 %v13496_v46  ;;  %10411 = vmatprep.subr.bf16.mxu1 %v11431_v28  ;;  %v11436_v46 = vld [vmem:[%s15322_s5 + $0x594] ss:$12 sps:$4 sm:$0xff]   ;;  %v11477_v28 = vld [vmem:[%s15322_s5 + $0x6b8] ss:$12 sps:$4 sm:$0xff]  }
 0x332   : > { %5601 = vmatprep.subr.bf16.mxu0 %v11434_v47  ;;  %v11475_v47 = vld [vmem:[%s15322_s5 + $0x6b4] ss:$12 sps:$4 sm:$0xff]  }
 0x334   : > { %10412 = vmatpush3.bf16.msra.mxu1 %v11435_v3  ;;  %5602 = vmatpush1.bf16.msra.mxu0 %v11432_v35  ;;  %v11480_v35 = vld [vmem:[%s15322_s5 + $0x6d0] ss:$12 sps:$4 sm:$0xff]   ;;  %v9622_v3 = vld [vmem:[%s15322_s5 + $0x6e4] sm:$0xff] }
 0x335   : > { %5603 = vmatprep.subr.bf16.mxu0 %v11438_v16  ;;  %10676 = vmatprep.subr.bf16.mxu1 %v11439_v59  ;;  %v11478_v16 = vld [vmem:[%s15322_s5 + $0x6cc] ss:$12 sps:$4 sm:$0xff]   ;;  %v9678_v19 = vcombine.low %v9622_v3, %v9622_v3 }
 0x337   : > { %6342 = vmatmul.mubr.bf16.vlgmr.msra.gmra.mrb[56].mxu1 %v14147_v41 }
 0x338   : > { %6349 = vmatprep.mubr.bf16.mxu1 %v14023_v61  ;;  %5604 = vmatpush1.bf16.msra.mxu0 %v11436_v46  ;;  %v5587_v46 = vsel %vm759_vm0, %v9678_v19, 0  ;;  %v11530_v19 = vld [vmem:[%s15322_s5 + $0x85c] ss:$12 sps:$4 sm:$0xff]  }
 0x339   : > { %5605 = vmatprep.subr.bf16.mxu0 %v11442_v34  ;;  %10677 = vmatpush3.bf16.msra.mxu1 %v11439_v59  ;;  %v9679_v59 = vcombine.high %v9622_v3, %v9622_v3  ;;  %v11485_v34 = vld [vmem:[%s15322_s5 + $0x6f4] ss:$12 sps:$4 sm:$0xff]  }
 0x33a   : > { %10678 = vmatprep.subr.bf16.mxu1 %v11443_v29 }
 0x33c   : > { %5606 = vmatpush1.bf16.msra.mxu0 %v11440_v4 }
 0x33d   : > { %5607 = vmatprep.subr.bf16.mxu0 %v11446_v12  ;;  %10679 = vmatpush3.bf16.msra.mxu1 %v11443_v29  ;;  %v11491_v29 = vld [vmem:[%s15322_s5 + $0x724] ss:$12 sps:$4 sm:$0xff]  }
 0x33e   : > { %11015 = vmatprep.subr.msk.bf16.mxu1 %vm759_vm0, %v11447_v60 }
 0x33f   : > { %6350 = vmatmul.mubr.bf16.gmra.mrb[60].mxu1 %v14136_v58 }
 0x340   : > { %10682 = vmatprep.mubr.msk.bf16.mxu1 %vm2471_vm6, %v14178_v43  ;;  %5608 = vmatpush1.bf16.msra.mxu0 %v11444_v37 }
 0x341   : > { %5609 = vmatprep.subr.bf16.mxu0 %v11450_v7  ;;  %10681 = vmatpush3.bf16.msra.mxu1 %v6205_v1  ;;  %v11494_v7 = vld [vmem:[%s15322_s5 + $0x73c] ss:$12 sps:$4 sm:$0xff]  }
 0x344   : > { %5610 = vmatpush1.bf16.msra.mxu0 %v11448_v0 }
 0x345   : > { %5611 = vmatprep.subr.bf16.mxu0 %v11453_v57 }
 0x347   : > { %10683 = vmatmul.mubr.msk.bf16.vlgmr.msra.gmra.mrb[28].mxu1 %vm2471_vm6, %v14164_v32 }
 0x348   : > { %5612 = vmatpush1.bf16.msra.mxu0 %v11451_v17  ;;  %7085 = vmatprep.mubr.bf16.mxu1 %v15380_v39  ;;  %v11492_v17 = vld [vmem:[%s15322_s5 + $0x738] ss:$12 sps:$4 sm:$0xff]  }
 0x349   : > { %5613 = vmatprep.subr.bf16.mxu0 %v11456_v30  ;;  %v10281_v50 = vpop.f32.mrb[20].mxu1  ;;  %v11497_v30 = vld [vmem:[%s15322_s5 + $0x754] ss:$12 sps:$4 sm:$0xff]  }
 0x34a   : > { %v10282_v20 = vpop.f32.mrb[21].mxu1 }
 0x34b   : > { %v14203_v5 = vadd.f32 %v10282_v20, %v10281_v50  ;;  %v10284_v24 = vpop.f32.mrb[22].mxu1  ;;  %v11495_v20 = vld [vmem:[%s15322_s5 + $0x750] ss:$12 sps:$4 sm:$0xff]  }
 0x34c   : > { %5614 = vmatpush1.bf16.msra.mxu0 %v11454_v40  ;;  %v10285_v48 = vpop.f32.mrb[23].mxu1 }
 0x34d   : > { %5615 = vmatprep.subr.bf16.mxu0 %v11459_v62  ;;  %v14208_v56 = vadd.f32 %v10285_v48, %v10284_v24  ;;  %v11503_v48 = vld [vmem:[%s15322_s5 + $0x784] ss:$12 sps:$4 sm:$0xff]  }
 0x350   : > { %5616 = vmatpush1.bf16.msra.mxu0 %v11457_v44  ;;  %v11498_v44 = vld [vmem:[%s15322_s5 + $0x768] ss:$12 sps:$4 sm:$0xff]  }
 0x351   : > { %5617 = vmatprep.subr.bf16.mxu0 %v11462_v11  ;;  %v10287_v21 = vpop.f32.mrb[24].mxu1  ;;  %v11506_v11 = vld [vmem:[%s15322_s5 + $0x79c] ss:$12 sps:$4 sm:$0xff]  }
 0x352   : > { %v10288_v52 = vpop.f32.mrb[25].mxu1 }
 0x353   : > { %v14219_v22 = vadd.f32 %v10288_v52, %v10287_v21  ;;  %v10290_v49 = vpop.f32.mrb[26].mxu1  ;;  %v11509_v21 = vld [vmem:[%s15322_s5 + $0x7b4] ss:$12 sps:$4 sm:$0xff]   ;;  %v11512_v52 = vld [vmem:[%s15322_s5 + $0x7cc] ss:$12 sps:$4 sm:$0xff]  }
 0x354   : > { %5618 = vmatpush1.bf16.msra.mxu0 %v11460_v2  ;;  %v10291_v27 = vpop.f32.mrb[27].mxu1  ;;  %v11504_v2 = vld [vmem:[%s15322_s5 + $0x798] ss:$12 sps:$4 sm:$0xff]  }
 0x355   : > { %5619 = vmatprep.subr.bf16.mxu0 %v11465_v25  ;;  %v11507_v25 = vld [vmem:[%s15322_s5 + $0x7b0] ss:$12 sps:$4 sm:$0xff]  }
 0x356   : > { %v11515_v49 = vld [vmem:[%s15322_s5 + $0x7e4] ss:$12 sps:$4 sm:$0xff]   ;;  %v11518_v27 = vld [vmem:[%s15322_s5 + $0x7fc] ss:$12 sps:$4 sm:$0xff]  }
 0x358   : > { %5620 = vmatpush1.bf16.msra.mxu0 %v11463_v63  ;;  %v11513_v63 = vld [vmem:[%s15322_s5 + $0x7e0] ss:$12 sps:$4 sm:$0xff]  }
 0x359   : > { %5621 = vmatprep.subr.bf16.mxu0 %v11468_v31  ;;  %v11516_v31 = vld [vmem:[%s15322_s5 + $0x7f8] ss:$12 sps:$4 sm:$0xff]  }
 0x35c   : > { %5622 = vmatpush1.bf16.msra.mxu0 %v11466_v55  ;;  %v11521_v55 = vld [vmem:[%s15322_s5 + $0x814] ss:$12 sps:$4 sm:$0xff]  }
 0x35d   : > { %5623 = vmatprep.subr.bf16.mxu0 %v11471_v10  ;;  %v11519_v10 = vld [vmem:[%s15322_s5 + $0x810] ss:$12 sps:$4 sm:$0xff]  }
 0x360   : > { %5624 = vmatpush1.bf16.msra.mxu0 %v11469_v51  ;;  %v11524_v51 = vld [vmem:[%s15322_s5 + $0x82c] ss:$12 sps:$4 sm:$0xff]  }
 0x361   : > { %5625 = vmatprep.subr.bf16.mxu0 %v11474_v18  ;;  %v11522_v18 = vld [vmem:[%s15322_s5 + $0x828] ss:$12 sps:$4 sm:$0xff]  }
 0x364   : > { %5626 = vmatpush1.bf16.msra.mxu0 %v11472_v33  ;;  %v11527_v33 = vld [vmem:[%s15322_s5 + $0x844] ss:$12 sps:$4 sm:$0xff]  }
 0x365   : > { %5646 = vmatprep.subr.bf16.mxu0 %v11477_v28 }
 0x367   : > { %5628 = vmatmul.mubr.bf16.vlgmr.msra.gmra.mrb[20].mxu0 %v13500_v38  ;;  %v11483_v38 = vld [vmem:[%s15322_s5 + $0x6f0] ss:$12 sps:$4 sm:$0xff]  }
 0x368   : > { %5637 = vmatprep.mubr.bf16.mxu0 %v13981_v8  ;;  %5647 = vmatpush1.bf16.msra.mxu0 %v11475_v47  ;;  %v11488_v8 = vld [vmem:[%s15322_s5 + $0x70c] ss:$12 sps:$4 sm:$0xff]  }
 0x369   : > { %5648 = vmatprep.subr.bf16.mxu0 %v11480_v35 }
 0x36c   : > { %5649 = vmatpush1.bf16.msra.mxu0 %v11478_v16  ;;  %v11525_v16 = vld [vmem:[%s15322_s5 + $0x840] ss:$12 sps:$4 sm:$0xff]  }
 0x36d   : > { %9681 = vmatprep.subr.msk.bf16.mxu0 %vm759_vm0, %v9679_v59 }
 0x36f   : > { %5638 = vmatmul.mubr.bf16.gmra.mrb[24].mxu0 %v14002_v54  ;;  %v11486_v54 = vld [vmem:[%s15322_s5 + $0x708] ss:$12 sps:$4 sm:$0xff]  }
 0x370   : > { %5651 = vmatpush1.bf16.msra.mxu0 %v5587_v46  ;;  %5678 = vmatprep.mubr.bf16.mxu0 %v15380_v39 }
 0x371   : > { %6207 = vmatprep.subr.bf16.mxu0 %v11485_v34 }
 0x377   : > { %9682 = vmatmul.mubr.msk.bf16.vlgmr.msra.gmra.mrb[20].mxu0 %vm2471_vm6, %v13522_v9  ;;  %v11489_v9 = vld [vmem:[%s15322_s5 + $0x720] ss:$12 sps:$4 sm:$0xff]  }
 0x378   : > { %6208 = vmatpush1.bf16.msra.mxu0 %v11483_v38  ;;  %5688 = vmatprep.mubr.bf16.mxu0 %v15380_v39 }
 0x379   : > { %6209 = vmatprep.subr.bf16.mxu0 %v11488_v8  ;;  %v11528_v8 = vld [vmem:[%s15322_s5 + $0x858] ss:$12 sps:$4 sm:$0xff]  }
 0x37a   : > { %v10314_v4 = vpop.f32.mrb[32].mxu1 }
 0x37b   : > { %v10315_v12 = vpop.f32.mrb[33].mxu1 }
 0x37c   : > { %6210 = vmatpush1.bf16.msra.mxu0 %v11486_v54  ;;  %v10316_v60 = vadd.f32 %v10315_v12, %v10314_v4  ;;  %v10317_v37 = vpop.f32.mrb[34].mxu1  ;;  %v11533_v54 = vld [vmem:[%s15322_s5 + $0x874] ss:$12 sps:$4 sm:$0xff]  }
 0x37d   : > { %6211 = vmatprep.subr.bf16.mxu0 %v11491_v29  ;;  %v10318_v42 = vpop.f32.mrb[35].mxu1 }
 0x37e   : > { %v14288_v1 = vadd.f32 %v10316_v60, %v14203_v5  ;;  %v10319_v0 = vadd.f32 %v10318_v42, %v10317_v37  ;;  %v11500_v5 = vld [vmem:[%s15322_s5 + $0x76c] ss:$12 sps:$4 sm:$0xff]   ;;  %v11531_v37 = vld [vmem:[%s15322_s5 + $0x870] ss:$12 sps:$4 sm:$0xff]  }
 0x37f   : > { %9683 = vmatmul.mubr.msk.bf16.gmra.mrb[24].mxu0 %vm2471_vm6, %v14029_v6  ;;  %v11536_v42 = vld [vmem:[%s15322_s5 + $0x88c] ss:$12 sps:$4 sm:$0xff]  }
 0x380   : > { %v14293_v57 = vadd.f32 %v10319_v0, %v14208_v56  ;;  %6212 = vmatpush1.bf16.msra.mxu0 %v11489_v9  ;;  %6239 = vmatprep.mubr.bf16.mxu0 %v14046_v45  ;;  %v11501_v56 = vld [vmem:[%s15322_s5 + $0x780] ss:$12 sps:$4 sm:$0xff]   ;;  %v11534_v0 = vld [vmem:[%s15322_s5 + $0x888] ss:$12 sps:$4 sm:$0xff]  }
 0x381   : > { %6213 = vmatprep.subr.bf16.mxu0 %v11494_v7 }
 0x382   : > { %v10320_v40 = vpop.f32.mrb[36].mxu1 }
 0x383   : > { %v10321_v50 = vpop.f32.mrb[37].mxu1 }
 0x384   : > { %6214 = vmatpush1.bf16.msra.mxu0 %v11492_v17  ;;  %v10322_v62 = vadd.f32 %v10321_v50, %v10320_v40  ;;  %v10323_v6 = vpop.f32.mrb[38].mxu1 }
 0x385   : > { %6215 = vmatprep.subr.bf16.mxu0 %v11497_v30  ;;  %v10324_v45 = vpop.f32.mrb[39].mxu1 }
 0x386   : > { %v10714_v24 = vadd.f32 %v10322_v62, %v14219_v22  ;;  %v11510_v22 = vld [vmem:[%s15322_s5 + $0x7c8] ss:$12 sps:$4 sm:$0xff]  }
 0x388   : > { %6216 = vmatpush1.bf16.msra.mxu0 %v11495_v20 }
 0x389   : > { %6217 = vmatprep.subr.bf16.mxu0 %v11500_v5 }
 0x38c   : > { %6218 = vmatpush1.bf16.msra.mxu0 %v11498_v44 }
 0x38d   : > { %6219 = vmatprep.subr.bf16.mxu0 %v11503_v48 }
 0x390   : > { %6220 = vmatpush1.bf16.msra.mxu0 %v11501_v56 }
 0x391   : > { %6221 = vmatprep.subr.bf16.mxu0 %v11506_v11 }
 0x394   : > { %6222 = vmatpush1.bf16.msra.mxu0 %v11504_v2 }
 0x395   : > { %6223 = vmatprep.subr.bf16.mxu0 %v11509_v21 }
 0x398   : > { %6224 = vmatpush1.bf16.msra.mxu0 %v11507_v25 }
 0x399   : > { %6225 = vmatprep.subr.bf16.mxu0 %v11512_v52 }
 0x39c   : > { %6226 = vmatpush1.bf16.msra.mxu0 %v11510_v22 }
 0x39d   : > { %6227 = vmatprep.subr.bf16.mxu0 %v11515_v49 }
 0x3a0   : > { %6228 = vmatpush1.bf16.msra.mxu0 %v11513_v63 }
 0x3a1   : > { %6229 = vmatprep.subr.bf16.mxu0 %v11518_v27 }
 0x3a4   : > { %6230 = vmatpush1.bf16.msra.mxu0 %v11516_v31 }
 0x3a5   : > { %6231 = vmatprep.subr.bf16.mxu0 %v11521_v55 }
 0x3a8   : > { %6232 = vmatpush1.bf16.msra.mxu0 %v11519_v10 }
 0x3a9   : > { %6233 = vmatprep.subr.bf16.mxu0 %v11524_v51 }
 0x3aa   : > { %v10347_v28 = vpop.f32.mrb[40].mxu1 }
 0x3ab   : > { %v10348_v47 = vpop.f32.mrb[41].mxu1 }
 0x3ac   : > { %6234 = vmatpush1.bf16.msra.mxu0 %v11522_v18  ;;  %v10349_v35 = vadd.f32 %v10348_v47, %v10347_v28  ;;  %v10350_v3 = vpop.f32.mrb[42].mxu1 }
 0x3ad   : > { %v10351_v59 = vpop.f32.mrb[43].mxu1  ;;  %6235 = vmatprep.subr.bf16.mxu0 %v11527_v33 }
 0x3ae   : > { %v10720_v46 = vadd.f32 %v14288_v1, %v10349_v35  ;;  %v10352_v34 = vadd.f32 %v10351_v59, %v10350_v3  ;;  %v9758_v1 = vld [vmem:[%s15322_s5 + $0x8a0] sm:$0xff] }
 0x3af   : > { %v9814_v17 = vcombine.low %v9758_v1, %v9758_v1 }
 0x3b0   : > { %v10725_v38 = vadd.f32 %v14293_v57, %v10352_v34  ;;  %6236 = vmatpush1.bf16.msra.mxu0 %v11525_v16  ;;  %v9815_v57 = vcombine.high %v9758_v1, %v9758_v1  ;;  %v11551_v1 = vld [vmem:[%s15325_s8 + $0x170] ss:$8 sps:$4 sm:$0xff]  }
 0x3b1   : > { %6237 = vmatprep.subr.bf16.mxu0 %v11530_v19  ;;  %v6199_v30 = vsel %vm759_vm0, %v9814_v17, 0  ;;  %v11559_v17 = vld [vmem:[%s15325_s8 + $0x194] ss:$8 sps:$4 sm:$0xff]  }
 0x3b2   : > { %v10353_v29 = vpop.f32.mrb[44].mxu1 }
 0x3b3   : > { %v10354_v4 = vpop.f32.mrb[45].mxu1 }
 0x3b4   : > { %6238 = vmatpush1.bf16.msra.mxu0 %v11528_v8  ;;  %v10355_v12 = vadd.f32 %v10354_v4, %v10353_v29  ;;  %v10356_v60 = vpop.f32.mrb[46].mxu1  ;;  %v11541_v29 = vld [vmem:[%s15325_s8 + $0x134] ss:$8 sps:$4 sm:$0xff]   ;;  %v11544_v4 = vld [vmem:[%s15325_s8 + $0x144] ss:$8 sps:$4 sm:$0xff]  }
 0x3b5   : > { %v10357_v9 = vpop.f32.mrb[47].mxu1  ;;  %6258 = vmatprep.subr.bf16.mxu0 %v11533_v54  ;;  %v11539_v54 = vld [vmem:[%s15325_s8 + $0x130] ss:$8 sps:$4 sm:$0xff]   ;;  %v11547_v60 = vld [vmem:[%s15325_s8 + $0x154] ss:$8 sps:$4 sm:$0xff]  }
 0x3b6   : > { %v10715_v7 = vadd.f32 %v10714_v24, %v10355_v12  ;;  %v11542_v12 = vld [vmem:[%s15325_s8 + $0x140] ss:$8 sps:$4 sm:$0xff]   ;;  %v11550_v9 = vld [vmem:[%s15325_s8 + $0x164] ss:$8 sps:$4 sm:$0xff]  }
 0x3b7   : > { %6240 = vmatmul.mubr.bf16.vlgmr.msra.gmra.mrb[20].mxu0 %v14147_v41 }
 0x3b8   : > { %6249 = vmatprep.mubr.bf16.mxu0 %v14023_v61  ;;  %6259 = vmatpush1.bf16.msra.mxu0 %v11531_v37  ;;  %v11545_v37 = vld [vmem:[%s15325_s8 + $0x150] ss:$8 sps:$4 sm:$0xff]  }
 0x3b9   : > { %6260 = vmatprep.subr.bf16.mxu0 %v11536_v42  ;;  %v11548_v42 = vld [vmem:[%s15325_s8 + $0x160] ss:$8 sps:$4 sm:$0xff]  }
 0x3bc   : > { %6261 = vmatpush1.bf16.msra.mxu0 %v11534_v0  ;;  %v11556_v0 = vld [vmem:[%s15325_s8 + $0x184] ss:$8 sps:$4 sm:$0xff]  }
 0x3bd   : > { %9817 = vmatprep.subr.msk.bf16.mxu0 %vm759_vm0, %v9815_v57  ;;  %v11554_v57 = vld [vmem:[%s15325_s8 + $0x180] ss:$8 sps:$4 sm:$0xff]   ;;  %vm6554_vm0 = vcmask 130048  }
 0x3bf   : > { %6250 = vmatmul.mubr.bf16.gmra.mrb[24].mxu0 %v14136_v58 }
 0x3c0   : > { %6263 = vmatpush1.bf16.msra.mxu0 %v6199_v30  ;;  %6290 = vmatprep.mubr.bf16.mxu0 %v15380_v39  ;;  %v11557_v30 = vld [vmem:[%s15325_s8 + $0x190] ss:$8 sps:$4 sm:$0xff]  }
 0x3c1   : > { %7012 = vmatprep.subr.bf16.mxu0 %v11541_v29 }
 0x3c7   : > { %9818 = vmatmul.mubr.msk.bf16.vlgmr.msra.gmra.mrb[20].mxu0 %vm2471_vm6, %v14178_v43 }
 0x3c8   : > { %6300 = vmatprep.mubr.bf16.mxu0 %v15380_v39  ;;  %7013 = vmatpush1.bf16.msra.mxu0 %v11539_v54 }
 0x3c9   : > { %7014 = vmatprep.subr.bf16.mxu0 %v11544_v4 }
 0x3cc   : > { %7015 = vmatpush1.bf16.msra.mxu0 %v11542_v12 }
 0x3cd   : > { %7016 = vmatprep.subr.bf16.mxu0 %v11547_v60 }
 0x3cf   : > { %9819 = vmatmul.mubr.msk.bf16.gmra.mrb[24].mxu0 %vm2471_vm6, %v14164_v32 }
 0x3d0   : > { %7017 = vmatpush1.bf16.msra.mxu0 %v11545_v37 }
 0x3d1   : > { %7018 = vmatprep.subr.bf16.mxu0 %v11550_v9 }
 0x3d4   : > { %7019 = vmatpush1.bf16.msra.mxu0 %v11548_v42 }
 0x3da   : > { %v10380_v61 = vpop.f32.mrb[48].mxu1 }
 0x3db   : > { %v10381_v41 = vpop.f32.mrb[49].mxu1 }
 0x3dc   : > { %v10382_v40 = vadd.f32 %v10381_v41, %v10380_v61  ;;  %v10383_v50 = vpop.f32.mrb[50].mxu1  ;;  %v11562_v61 = vld [vmem:[%s15325_s8 + $0x1a4] ss:$8 sps:$4 sm:$0xff]   ;;  %v11560_v41 = vld [vmem:[%s15325_s8 + $0x1a0] ss:$8 sps:$4 sm:$0xff]  }
 0x3dd   : > { %v10384_v62 = vpop.f32.mrb[51].mxu1 }
 0x3de   : > { %v10721_v6 = vadd.f32 %v10720_v46, %v10382_v40  ;;  %v10385_v20 = vadd.f32 %v10384_v62, %v10383_v50  ;;  %v11565_v40 = vld [vmem:[%s15325_s8 + $0x1b4] ss:$8 sps:$4 sm:$0xff]   ;;  %v11563_v50 = vld [vmem:[%s15325_s8 + $0x1b0] ss:$8 sps:$4 sm:$0xff]   ;;  %v11568_v62 = vld [vmem:[%s15325_s8 + $0x1c4] ss:$8 sps:$4 sm:$0xff]  }
 0x3e0   : > { %v10726_v45 = vadd.f32 %v10725_v38, %v10385_v20  ;;  %v6456_v20 = vld [vmem:[%s15323_s6] sm:$0x7] }
 0x3e2   : > { %v10386_v58 = vpop.f32.mrb[52].mxu1 }
 0x3e3   : > { %v10387_v5 = vpop.f32.mrb[53].mxu1 }
 0x3e4   : > { %v10388_v24 = vadd.f32 %v10387_v5, %v10386_v58  ;;  %v10389_v44 = vpop.f32.mrb[54].mxu1  ;;  %v6482_v58 = vld [vmem:[%s15324_s7] sm:$0x7] }
 0x3e5   : > { %v10390_v48 = vpop.f32.mrb[55].mxu1  ;;  %v6495_v44 = vrot.slane %v6482_v58, %v12641_v13 }
 0x3e6   : > { %v10716_v56 = vadd.f32 %v10715_v7, %v10388_v24  ;;  %v11553_v7 = vld [vmem:[%s15325_s8 + $0x174] ss:$8 sps:$4 sm:$0xff]  }
 0x3e7   : > { %7020 = vmatprep.subr.bf16.mxu0 %v11553_v7 }
 0x3e8   : > { %7021 = vmatpush1.bf16.msra.mxu0 %v11551_v1 }
 0x3e9   : > { %7022 = vmatprep.subr.bf16.mxu0 %v11556_v0  ;;  %v11569_v0 = vld [vmem:[%s15325_s8 + $0x1d0] ss:$8 sps:$4 sm:$0xff]  }
 0x3ec   : > { %7023 = vmatpush1.bf16.msra.mxu0 %v11554_v57  ;;  %v11571_v57 = vld [vmem:[%s15325_s8 + $0x1d4] ss:$8 sps:$4 sm:$0xff]  }
 0x3ed   : > { %7024 = vmatprep.subr.bf16.mxu0 %v11559_v17 }
 0x3f0   : > { %7025 = vmatpush1.bf16.msra.mxu0 %v11557_v30 }
 0x3f1   : > { %7026 = vmatprep.subr.bf16.mxu0 %v11562_v61 }
 0x3f4   : > { %7027 = vmatpush1.bf16.msra.mxu0 %v11560_v41 }
 0x3f5   : > { %7028 = vmatprep.subr.bf16.mxu0 %v11565_v40  ;;  %v11574_v40 = vld [vmem:[%s15325_s8 + $0x1e4] ss:$8 sps:$4 sm:$0xff]  }
 0x3f8   : > { %7029 = vmatpush1.bf16.msra.mxu0 %v11563_v50 }
 0x3f9   : > { %7030 = vmatprep.subr.bf16.mxu0 %v11568_v62 }
 0x40a   : > { %v10413_v43 = vpop.f32.mrb[56].mxu1 }
 0x40b   : > { %v10414_v11 = vpop.f32.mrb[57].mxu1 }
 0x40c   : > { %v10415_v2 = vadd.f32 %v10414_v11, %v10413_v43  ;;  %v10416_v21 = vpop.f32.mrb[58].mxu1 }
 0x40d   : > { %v10417_v25 = vpop.f32.mrb[59].mxu1 }
 0x40e   : > { %v10418_v32 = vadd.f32 %v10417_v25, %v10416_v21  ;;  %v10722_v52 = vadd.f32 %v10721_v6, %v10415_v2  ;;  %v11566_v6 = vld [vmem:[%s15325_s8 + $0x1c0] ss:$8 sps:$4 sm:$0xff]  }
 0x40f   : > { %7031 = vmatpush1.bf16.msra.mxu0 %v11566_v6 }
 0x410   : > { %v10727_v22 = vadd.f32 %v10726_v45, %v10418_v32  ;;  %v6469_v45 = vrot.slane %v6456_v20, %v12641_v13  ;;  %7032 = vmatprep.subr.bf16.mxu0 %v11571_v57  ;;  %v11595_v57 = vld [vmem:[%s15325_s8 + $0x224] ss:$8 sps:$4 sm:$0xff]  }
 0x412   : > { %v10419_v49 = vpop.f32.mrb[60].mxu1 }
 0x413   : > { %v10420_v63 = vpop.f32.mrb[61].mxu1  ;;  %7033 = vmatpush1.bf16.msra.mxu0 %v11569_v0  ;;  %v11593_v0 = vld [vmem:[%s15325_s8 + $0x220] ss:$8 sps:$4 sm:$0xff]  }
 0x414   : > { %v10421_v27 = vadd.f32 %v10420_v63, %v10419_v49  ;;  %v10422_v31 = vpop.f32.mrb[62].mxu1  ;;  %v6465_v63 = vrot.slane %v6456_v20, %v12644_v14  ;;  %7034 = vmatprep.subr.bf16.mxu0 %v11574_v40 }
 0x415   : > { %v10423_v55 = vpop.f32.mrb[63].mxu1 }
 0x416   : > { %v10717_v10 = vadd.f32 %v10716_v56, %v10421_v27  ;;  %v6487_v55 = vrot.slane %v6482_v58, %v12632_v36 }
 0x41a   : > { %v10684_v51 = vpop.f32.mrb[28].mxu1 }
 0x41b   : > { %v14400_v18 = vadd.f32 %v10717_v10, %v10684_v51  ;;  %v6391_v33 = vpop.f32.mrb[29].mxu1  ;;  %v6491_v51 = vrot.slane %v6482_v58, %v12644_v14 }
 0x41c   : > { %v10723_v28 = vadd.f32 %v10722_v52, %v6391_v33  ;;  %v10685_v47 = vpop.f32.mrb[30].mxu1  ;;  %v6461_v52 = vrot.slane %v6456_v20, %v12632_v36 }
 0x41d   : > { %v6394_v35 = vpop.f32.mrb[31].mxu1  ;;  %v6436_v16 = vrot.slane %v14400_v18, 1 }
 0x41e   : > { %v14402_v3 = vadd.f32 %v10727_v22, %v6394_v35  ;;  %v6429_v59 = vrot.slane %v10723_v28, 1 }
 0x41f   : > { %v6455_v22 = vmax.f32 %v14400_v18, %v6436_v16 }
 0x420   : > { %v6430_v19 = vrot.slane %v14402_v3, 1 }
 0x421   : > { %v6481_v18 = vmul.f32 %v6469_v45, %v6455_v22 }
 0x422   : > { %v6431_v46 = vsel %vm1898_vm5, %v6429_v59, %v6430_v19  ;;  %v14410_v34 = vsel %vm1898_vm5, %v6430_v19, %v6436_v16 }
 0x423   : > { %v6449_v38 = vmax.f32 %v10723_v28, %v6431_v46  ;;  %v6452_v8 = vmax.f32 %v14402_v3, %v14410_v34  ;;  %v6507_v17 = vadd.f32 %v6495_v44, %v6481_v18  ;;  %v11578_v18 = vld [vmem:[%s15325_s8 + $0x230] ss:$8 sps:$4 sm:$0xff]  }
 0x425   : > { %v6475_v5 = vmul.f32 %v6469_v45, %v6449_v38  ;;  %v6478_v27 = vmul.f32 %v6469_v45, %v6452_v8 }
 0x427   : > { %v6501_v43 = vadd.f32 %v6495_v44, %v6475_v5  ;;  %v6504_v16 = vadd.f32 %v6495_v44, %v6478_v27  ;;  %v11572_v44 = vld [vmem:[%s15325_s8 + $0x1e0] ss:$8 sps:$4 sm:$0xff]  }
 0x428   : > { %7035 = vmatpush1.bf16.msra.mxu0 %v11572_v44 }
 0x429   : > { %v6510_v33 = vmax.f32 %v6501_v43, 0.0  ;;  %v6513_v30 = vmax.f32 %v6504_v16, 0.0  ;;  %v11580_v16 = vld [vmem:[%s15325_s8 + $0x234] ss:$8 sps:$4 sm:$0xff]  }
 0x42a   : > { %7053 = vmatprep.subr.bf16.mxu1 %v11580_v16  ;;  %v11602_v16 = vld [vmem:[%s15325_s8 + $0x20] ss:$8 sps:$4 sm:$0xff]  }
 0x42b   : > { %v6562_v4 = vcombine.high %v6510_v33, %v6510_v33  ;;  %7054 = vmatpush1.bf16.msra.mxu1 %v11578_v18  ;;  %v11604_v18 = vld [vmem:[%s15325_s8 + $0x24] ss:$8 sps:$4 sm:$0xff]  }
 0x42d   : > { %v6576_v5 = vrot.slane %v6562_v4, %v12730_v26  ;;  %v11584_v4 = vld [vmem:[%s15325_s8 + $0x240] ss:$8 sps:$4 sm:$0xff]  }
 0x49a   : > { %v6292_v24 = vpop.f32.mrb[20].mxu0 }
 0x49b   : > { %v6294_v48 = vpop.f32.mrb[21].mxu0  ;;  %v6423_v11 = vrot.slane %v6292_v24, 1 }
 0x49c   : > { %v6296_v56 = vpop.f32.mrb[22].mxu0  ;;  %v6426_v25 = vrot.slane %v6294_v48, 1 }
 0x49d   : > { %v6424_v2 = vrot.slane %v6296_v56, 1  ;;  %v6298_v21 = vpop.f32.mrb[23].mxu0 }
 0x49e   : > { %v6427_v32 = vrot.slane %v6298_v21, 1 }
 0x49f   : > { %v6425_v49 = vsel %vm1898_vm5, %v6423_v11, %v6424_v2 }
 0x4a0   : > { %v6447_v13 = vmax.f32 %v6292_v24, %v6425_v49  ;;  %v6428_v31 = vsel %vm1898_vm5, %v6426_v25, %v6427_v32  ;;  %v6542_v24 = vrot.slane %v6510_v33, %v12730_v26  ;;  %v6610_v33 = vrot.slane %v6513_v30, %v12730_v26 }
 0x4a1   : > { %v6448_v10 = vmax.f32 %v6294_v48, %v6428_v31 }
 0x4a2   : > { %v6302_v28 = vpop.f32.mrb[24].mxu0  ;;  %v6473_v47 = vmul.f32 %v6461_v52, %v6447_v13  ;;  %v11575_v13 = vld [vmem:[%s15325_s8 + $0x1f0] ss:$8 sps:$4 sm:$0xff]  }
 0x4a3   : > { %v6432_v35 = vrot.slane %v6302_v28, 1  ;;  %v6304_v3 = vpop.f32.mrb[25].mxu0  ;;  %v6474_v59 = vmul.f32 %v6465_v63, %v6448_v10 }
 0x4a4   : > { %v6434_v19 = vrot.slane %v6304_v3, 1  ;;  %v6306_v46 = vpop.f32.mrb[26].mxu0  ;;  %v6499_v34 = vadd.f32 %v6487_v55, %v6473_v47 }
 0x4a5   : > { %v6433_v38 = vsel %vm1898_vm5, %v6424_v2, %v6432_v35  ;;  %v6453_v8 = vmax.f32 %v6302_v28, %v6432_v35  ;;  %v6307_v54 = vpop.f32.mrb[27].mxu0  ;;  %v6500_v29 = vadd.f32 %v6491_v51, %v6474_v59  ;;  %v6516_v2 = vmax.f32 %v6507_v17, 0.0  ;;  %v11581_v46 = vld [vmem:[%s15325_s8 + $0x200] ss:$8 sps:$4 sm:$0xff]  }
 0x4a6   : > { %v6450_v12 = vmax.f32 %v6296_v56, %v6433_v38  ;;  %v6435_v60 = vsel %vm1898_vm5, %v6427_v32, %v6434_v19  ;;  %v6454_v37 = vmax.f32 %v6304_v3, %v6434_v19  ;;  %v6508_v9 = vmax.f32 %v6499_v34, 0.0  ;;  %v11583_v34 = vld [vmem:[%s15325_s8 + $0x204] ss:$8 sps:$4 sm:$0xff]  }
 0x4a7   : > { %v6479_v42 = vmul.f32 %v6461_v52, %v6453_v8  ;;  %v6451_v7 = vmax.f32 %v6298_v21, %v6435_v60  ;;  %v6509_v1 = vmax.f32 %v6500_v29, 0.0  ;;  %v6628_v21 = vcombine.high %v6513_v30, %v6513_v30  ;;  %v11587_v60 = vld [vmem:[%s15325_s8 + $0x210] ss:$8 sps:$4 sm:$0xff]  }
 0x4a8   : > { %v6476_v61 = vmul.f32 %v6461_v52, %v6450_v12  ;;  %v6480_v41 = vmul.f32 %v6465_v63, %v6454_v37  ;;  %v6676_v47 = vrot.slane %v6516_v2, %v12730_v26  ;;  %v11586_v12 = vld [vmem:[%s15325_s8 + $0x244] ss:$8 sps:$4 sm:$0xff]   ;;  %v11589_v37 = vld [vmem:[%s15325_s8 + $0x214] ss:$8 sps:$4 sm:$0xff]  }
 0x4a9   : > { %v6505_v50 = vadd.f32 %v6487_v55, %v6479_v42  ;;  %v6477_v62 = vmul.f32 %v6465_v63, %v6451_v7  ;;  %v6561_v6 = vcombine.high %v6508_v9, %v6509_v1  ;;  %v6528_v20 = vcombine.low %v6508_v9, %v6509_v1  ;;  %v11577_v63 = vld [vmem:[%s15325_s8 + $0x1f4] ss:$8 sps:$4 sm:$0xff]   ;;  %7055 = vmatprep.subr.bf16.mxu1 %v11586_v12  ;;  %v11590_v7 = vld [vmem:[%s15325_s8 + $0x250] ss:$8 sps:$4 sm:$0xff]   ;;  %v11616_v12 = vld [vmem:[%s15325_s8 + $0x64] ss:$8 sps:$4 sm:$0xff]  }
 0x4aa   : > { %v6502_v45 = vadd.f32 %v6487_v55, %v6476_v61  ;;  %v6506_v58 = vadd.f32 %v6491_v51, %v6480_v41  ;;  %7036 = vmatprep.subr.bf16.mxu0 %v11577_v63  ;;  %v6642_v3 = vrot.slane %v6628_v21, %v12730_v26  ;;  %7056 = vmatpush1.bf16.msra.mxu1 %v11584_v4  ;;  %v11592_v1 = vld [vmem:[%s15325_s8 + $0x254] ss:$8 sps:$4 sm:$0xff]   ;;  %v11611_v4 = vld [vmem:[%s15325_s8 + $0x50] ss:$8 sps:$4 sm:$0xff]  }
 0x4ab   : > { %v6514_v48 = vmax.f32 %v6505_v50, 0.0  ;;  %v6503_v56 = vadd.f32 %v6491_v51, %v6477_v62  ;;  %v6569_v43 = vrot.slane %v6561_v6, %v12730_v26  ;;  %v6535_v11 = vrot.slane %v6528_v20, %v12730_v26  ;;  %7037 = vmatpush1.bf16.msra.mxu0 %v11575_v13  ;;  %7057 = vmatprep.subr.bf16.mxu1 %v11592_v1  ;;  %v11625_v1 = vld [vmem:[%s15325_s8 + $0x94] ss:$8 sps:$4 sm:$0xff]   ;;  %v11635_v50 = vld [vmem:[%s15325_s8 + $0xd0] ss:$8 sps:$4 sm:$0xff]  }
 0x4ac   : > { %v6511_v25 = vmax.f32 %v6502_v45, 0.0  ;;  %v6515_v32 = vmax.f32 %v6506_v58, 0.0  ;;  %7038 = vmatprep.subr.bf16.mxu0 %v11583_v34  ;;  %v11607_v34 = vld [vmem:[%s15325_s8 + $0x34] ss:$8 sps:$4 sm:$0xff]  }
 0x4ad   : > { %v6512_v52 = vmax.f32 %v6503_v56, 0.0  ;;  %v6577_v22 = vcombine.low %v6569_v43, %v6576_v5  ;;  %v6543_v49 = vcombine.low %v6535_v11, %v6542_v24 }
 0x4ae   : > { %v6662_v27 = vcombine.low %v6514_v48, %v6515_v32  ;;  %7058 = vmatpush1.bf16.msra.mxu1 %v11590_v7  ;;  %v11620_v7 = vld [vmem:[%s15325_s8 + $0x80] ss:$8 sps:$4 sm:$0xff]  }
 0x4af   : > { %v6584_v31 = vrot.slane %v6577_v22, %v12730_v26  ;;  %v6550_v55 = vrot.slane %v6543_v49, %v12730_v26  ;;  %v6627_v10 = vcombine.high %v6511_v25, %v6512_v52  ;;  %v6596_v51 = vcombine.low %v6511_v25, %v6512_v52  ;;  %7039 = vmatpush1.bf16.msra.mxu0 %v11581_v46 }
 0x4b0   : > { %v6669_v28 = vrot.slane %v6662_v27, %v12730_v26  ;;  %7040 = vmatprep.subr.bf16.mxu0 %v11589_v37  ;;  %v11619_v37 = vld [vmem:[%s15325_s8 + $0x74] ss:$8 sps:$4 sm:$0xff]  }
 0x4b1   : > { %6585 = vrot.lane.b32.xlu0 %v6584_v31, %s15346_s19  ;;  %6551 = vrot.lane.b32.xlu1 %v6550_v55, %s15346_s19  ;;  %v6635_v35 = vrot.slane %v6627_v10, %v12730_v26  ;;  %v6603_v59 = vrot.slane %v6596_v51, %v12730_v26  ;;  %v6693_v9 = vcombine.high %v6550_v55, %v6550_v55 }
 0x4b2   : > { %v6677_v19 = vcombine.low %v6669_v28, %v6676_v47  ;;  %v6702_v17 = vcombine.high %v6584_v31, %v6584_v31  ;;  %v11596_v31 = vld [vmem:[%s15325_s8] ss:$8 sps:$4 sm:$0xff]  }
 0x4b3   : > { %v6643_v38 = vcombine.low %v6635_v35, %v6642_v3  ;;  %v6611_v8 = vcombine.low %v6603_v59, %v6610_v33  ;;  %7041 = vmatpush1.bf16.msra.mxu0 %v11587_v60  ;;  %v11601_v3 = vld [vmem:[%s15325_s8 + $0x14] ss:$8 sps:$4 sm:$0xff]   ;;  %v11599_v59 = vld [vmem:[%s15325_s8 + $0x10] ss:$8 sps:$4 sm:$0xff]   ;;  %v11614_v60 = vld [vmem:[%s15325_s8 + $0x60] ss:$8 sps:$4 sm:$0xff]  }
 0x4b4   : > { %v6684_v42 = vrot.slane %v6677_v19, %v12730_v26  ;;  %7042 = vmatprep.subr.bf16.mxu0 %v11595_v57  ;;  %v11628_v57 = vld [vmem:[%s15325_s8 + $0xa4] ss:$8 sps:$4 sm:$0xff]  }
 0x4b5   : > { %v6650_v54 = vrot.slane %v6643_v38, %v12730_v26  ;;  %v6618_v29 = vrot.slane %v6611_v8, %v12730_v26  ;;  %v11598_v26 = vld [vmem:[%s15325_s8 + $0x4] ss:$8 sps:$4 sm:$0xff]   ;;  %v11605_v38 = vld [vmem:[%s15325_s8 + $0x30] ss:$8 sps:$4 sm:$0xff]  }
 0x4b6   : > { %7287 = vmatprep.subr.bf16.mxu1 %v11598_v26  ;;  %v11610_v8 = vld [vmem:[%s15325_s8 + $0x44] ss:$8 sps:$4 sm:$0xff]   ;;  %v11626_v26 = vld [vmem:[%s15325_s8 + $0xa0] ss:$8 sps:$4 sm:$0xff]  }
 0x4b7   : > { %6651 = vrot.lane.b32.xlu0 %v6650_v54, %s15346_s19  ;;  %6619 = vrot.lane.b32.xlu1 %v6618_v29, %s15346_s19  ;;  %v6711_v30 = vcombine.high %v6618_v29, %v6618_v29  ;;  %v6720_v61 = vcombine.high %v6650_v54, %v6650_v54  ;;  %v11608_v54 = vld [vmem:[%s15325_s8 + $0x40] ss:$8 sps:$4 sm:$0xff]   ;;  %v11613_v29 = vld [vmem:[%s15325_s8 + $0x54] ss:$8 sps:$4 sm:$0xff]   ;;  %s10212_s19 = sshll.u32 %s12056_s0, 4  ;;  %s8926_s0 = scalar_lea.sflag [#allocation7], %s581_s29 }
 0x4b8   : > { %7043 = vmatpush1.bf16.msra.mxu0 %v11593_v0  ;;  %v11623_v0 = vld [vmem:[%s15325_s8 + $0x90] ss:$8 sps:$4 sm:$0xff]   ;;  %s15275_s27 = scalar_lea.hbm %s15335_s18, %s10212_s19 }
 0x4bb   : > { %6694 = vrot.lane.b32.xlu0 %v6693_v9, %s15381_s3  ;;  %6685 = vrot.lane.b32.xlu1 %v6684_v42, %s15381_s3  ;;  %v11617_v9 = vld [vmem:[%s15325_s8 + $0x70] ss:$8 sps:$4 sm:$0xff]   ;;  %v11622_v42 = vld [vmem:[%s15325_s8 + $0x84] ss:$8 sps:$4 sm:$0xff]  }
 0x4bf   : > { %6703 = vrot.lane.b32.xlu1 %v6702_v17, %s15381_s3  ;;  %6712 = vrot.lane.b32.xlu0 %v6711_v30, %s15381_s3  ;;  %v11631_v17 = vld [vmem:[%s15325_s8 + $0xb4] ss:$8 sps:$4 sm:$0xff]   ;;  %v11629_v30 = vld [vmem:[%s15325_s8 + $0xb0] ss:$8 sps:$4 sm:$0xff]  }
 0x4c3   : > { %6721 = vrot.lane.b32.xlu1 %v6720_v61, %s15381_s3  ;;  %v11634_v61 = vld [vmem:[%s15325_s8 + $0xc4] ss:$8 sps:$4 sm:$0xff]   ;;  %s11874_s3 = scalar_lea.vmem %s11873_s25, 32 }
 0x4c4   : > { %p11876_p1 = scmp.lt.s32.totalorder %s11874_s3, %s11868_s21 }
 0x4c6   : > { %p11877_p2 = por %p11876_p1, %p11875_p0 }
 0x4c8   : > { %p11878_p3 = pnand %p11877_p2, %p11871_p13 }
 0x523   : > { %v6586_v41 = vpop.permute.xlu0 %6585  ;;  %v6552_v40 = vpop.permute.xlu1 %6551 }
 0x524   : > { %v6587_v62 = vrot.slane %v6586_v41, 7  ;;  %v6553_v6 = vrot.slane %v6552_v40, 7 }
 0x526   : > { %v6588_v20 = vsel %vm6554_vm0, %v6587_v62, %v6586_v41  ;;  %v6555_v45 = vsel %vm6554_vm0, %v6553_v6, %v6552_v40  ;;  %v11632_v41 = vld [vmem:[%s15325_s8 + $0xc0] ss:$8 sps:$4 sm:$0xff]   ;;  %v11637_v40 = vld [vmem:[%s15325_s8 + $0xd4] ss:$8 sps:$4 sm:$0xff]   ;;  %v11640_v62 = vld [vmem:[%s15325_s8 + $0xe4] ss:$8 sps:$4 sm:$0xff]  }
 0x527   : > { %6591 = vst.msk [vmem:[#allocation5 + $0x1] ss:$8 sm:$0x7] %vm14579_vm1, %v6588_v20  ;;  %6559 = vst.msk [vmem:[#allocation5] ss:$8 sm:$0x7] %vm14579_vm1, %v6555_v45 }
 0x528   : > { %v11638_v6 = vld [vmem:[%s15325_s8 + $0xe0] ss:$8 sps:$4 sm:$0xff]   ;;  %v11643_v20 = vld [vmem:[%s15325_s8 + $0xf4] ss:$8 sps:$4 sm:$0xff]   ;;  %v11641_v45 = vld [vmem:[%s15325_s8 + $0xf0] ss:$8 sps:$4 sm:$0xff]  }
 0x529   : > { %v6652_v53 = vpop.permute.xlu0 %6651  ;;  %v6620_v58 = vpop.permute.xlu1 %6619 }
 0x52a   : > { %v6653_v5 = vrot.slane %v6652_v53, 7  ;;  %v6621_v23 = vrot.slane %v6620_v58, 7 }
 0x52c   : > { %v6654_v24 = vsel %vm6554_vm0, %v6653_v5, %v6652_v53  ;;  %v6622_v44 = vsel %vm6554_vm0, %v6621_v23, %v6620_v58  ;;  %v11646_v53 = vld [vmem:[%s15325_s8 + $0x104] ss:$8 sps:$4 sm:$0xff]   ;;  %v11644_v5 = vld [vmem:[%s15325_s8 + $0x100] ss:$8 sps:$4 sm:$0xff]  }
 0x52d   : > { %6657 = vst.msk [vmem:[#allocation5 + $0x3] ss:$8 sm:$0x7] %vm14579_vm1, %v6654_v24  ;;  %6625 = vst.msk [vmem:[#allocation5 + $0x2] ss:$8 sm:$0x7] %vm14579_vm1, %v6622_v44  ;;  %v6695_v48 = vpop.permute.xlu0 %6694  ;;  %v6686_v56 = vpop.permute.xlu1 %6685 }
 0x52e   : > { %v6696_v43 = vrot.slane %v6695_v48, 7  ;;  %v6687_v11 = vrot.slane %v6686_v56, 7  ;;  %v11649_v24 = vld [vmem:[%s15325_s8 + $0x114] ss:$8 sps:$4 sm:$0xff]   ;;  %v11647_v44 = vld [vmem:[%s15325_s8 + $0x110] ss:$8 sps:$4 sm:$0xff]  }
 0x530   : > { %v6697_v2 = vsel %vm6554_vm0, %v6696_v43, %v6695_v48  ;;  %v6688_v21 = vsel %vm6554_vm0, %v6687_v11, %v6686_v56  ;;  %v11652_v48 = vld [vmem:[%s15325_s8 + $0x124] ss:$8 sps:$4 sm:$0xff]   ;;  %v11650_v43 = vld [vmem:[%s15325_s8 + $0x120] ss:$8 sps:$4 sm:$0xff]  }
 0x531   : > { %6700 = vst.msk [vmem:[#allocation4 + $0x1] ss:$8 sm:$0x7] %vm14579_vm1, %v6697_v2  ;;  %6691 = vst.msk [vmem:[#allocation5 + $0x4] ss:$8 sm:$0x7] %vm14579_vm1, %v6688_v21  ;;  %v6704_v25 = vpop.permute.xlu1 %6703  ;;  %v6713_v32 = vpop.permute.xlu0 %6712 }
 0x532   : > { %v6705_v52 = vrot.slane %v6704_v25, 7  ;;  %v6714_v22 = vrot.slane %v6713_v32, 7  ;;  %v11655_v11 = vld [vmem:[%s15325_s8 + $0x264] ss:$8 sps:$4 sm:$0xff]  }
 0x534   : > { %v6706_v49 = vsel %vm6554_vm0, %v6705_v52, %v6704_v25  ;;  %v6715_v63 = vsel %vm6554_vm0, %v6714_v22, %v6713_v32  ;;  %v11653_v25 = vld [vmem:[%s15325_s8 + $0x260] ss:$8 sps:$4 sm:$0xff]   ;;  %v11658_v22 = vld [vmem:[%s15325_s8 + $0x274] ss:$8 sps:$4 sm:$0xff]  }
 0x535   : > { %6709 = vst.msk [vmem:[#allocation4 + $0x2] ss:$8 sm:$0x7] %vm14579_vm1, %v6706_v49  ;;  %6718 = vst.msk [vmem:[#allocation4 + $0x3] ss:$8 sm:$0x7] %vm14579_vm1, %v6715_v63  ;;  %v6722_v27 = vpop.permute.xlu1 %6721 }
 0x536   : > { %v6723_v13 = vrot.slane %v6722_v27, 7  ;;  %v11656_v63 = vld [vmem:[%s15325_s8 + $0x270] ss:$8 sps:$4 sm:$0xff]  }
 0x538   : > { %v6724_v55 = vsel %vm6554_vm0, %v6723_v13, %v6722_v27  ;;  %v6733_v10 = vld [vmem:[#allocation5 + $0x8] sm:$0x1f]  ;;  %v6734_v51 = vld [vmem:[#allocation5 + $0x10] sm:$0x1f]  ;;  %v6732_v33 = vld [vmem:[#allocation5] sm:$0x1f] }
 0x539   : > { %6727 = vst.msk [vmem:[#allocation4 + $0x4] ss:$8 sm:$0x7] %vm14579_vm1, %v6724_v55  ;;  %v14613_v28 = vpack.c.bf16 %v6733_v10, %v6733_v10  ;;  %v14615_v47 = vpack.c.bf16 %v6734_v51, %v6734_v51  ;;  %v14617_v35 = vpack.c.bf16 %v6732_v33, %v6732_v33  ;;  %v11661_v27 = vld [vmem:[%s15325_s8 + $0x284] ss:$8 sps:$4 sm:$0xff]  }
 0x53a   : > { %v11659_v13 = vld [vmem:[%s15325_s8 + $0x280] ss:$8 sps:$4 sm:$0xff]   ;;  %v11662_v55 = vld [vmem:[%s15325_s8 + $0x290] ss:$8 sps:$4 sm:$0xff]   ;;  %v11667_v10 = vld [vmem:[%s15325_s8 + $0x2a4] ss:$8 sps:$4 sm:$0xff]  }
 0x53b   : > { %7044 = vmatprep.mubr.bf16.mxu0 %v14613_v28  ;;  %9898 = vmatmul.mubr.msk.bf16.vlgmr.msra.gmra.mrb[64].mxu1 %vm7008_vm3, %v14615_v47  ;;  %v11665_v51 = vld [vmem:[%s15325_s8 + $0x2a0] ss:$8 sps:$4 sm:$0xff]   ;;  %v11670_v33 = vld [vmem:[%s15325_s8 + $0x2b4] ss:$8 sps:$4 sm:$0xff]  }
 0x53c   : > { %7288 = vmatpush1.bf16.msra.mxu1 %v11596_v31  ;;  %7045 = vmatmul.mubr.bf16.vlgmr.msra.gmra.mrb[28].mxu0 %v14617_v35  ;;  %v11664_v31 = vld [vmem:[%s15325_s8 + $0x294] ss:$8 sps:$4 sm:$0xff]  }
 0x53d   : > { %7289 = vmatprep.subr.bf16.mxu1 %v11601_v3  ;;  %v11668_v3 = vld [vmem:[%s15325_s8 + $0x2b0] ss:$8 sps:$4 sm:$0xff]  }
 0x540   : > { %7290 = vmatpush1.bf16.msra.mxu1 %v11599_v59  ;;  %v6730_v19 = vld [vmem:[#allocation4 + $0x8] sm:$0x3f]  ;;  %v6729_v58 = vld [vmem:[#allocation4] sm:$0x3f]  ;;  %v6731_v2 = vld [vmem:[#allocation4 + $0x10] sm:$0x3f] }
 0x541   : > { %7291 = vmatprep.subr.bf16.mxu1 %v11604_v18  ;;  %v14635_v46 = vpack.c.bf16 %v6730_v19, %v6730_v19  ;;  %v14722_v23 = vpack.c.bf16 %v6729_v58, %v6729_v58  ;;  %v14746_v52 = vpack.c.bf16 %v6731_v2, %v6731_v2  ;;  %v11673_v59 = vld [vmem:[%s15325_s8 + $0x2c4] ss:$8 sps:$4 sm:$0xff]   ;;  %v11671_v18 = vld [vmem:[%s15325_s8 + $0x2c0] ss:$8 sps:$4 sm:$0xff]   ;;  %v11674_v19 = vld [vmem:[%s15325_s8 + $0x2d0] ss:$8 sps:$4 sm:$0xff]  }
 0x542   : > { %v11707_v58 = vld [vmem:[%s15325_s8 + $0x380] ss:$8 sps:$4 sm:$0xff]   ;;  %v11715_v2 = vld [vmem:[%s15325_s8 + $0x3a4] ss:$8 sps:$4 sm:$0xff]  }
 0x543   : > { %7319 = vmatprep.mubr.bf16.mxu1 %v14635_v46  ;;  %v7418_v56 = vshll.u32 %v14635_v46, 16  ;;  %v7416_v32 = vshrl.u32 %v14635_v46, 16 }
 0x544   : > { %7292 = vmatpush1.bf16.msra.mxu1 %v11602_v16  ;;  %v11676_v16 = vld [vmem:[%s15325_s8 + $0x2d4] ss:$8 sps:$4 sm:$0xff]  }
 0x545   : > { %7293 = vmatprep.subr.bf16.mxu1 %v11607_v34  ;;  %v7420_v21 = vrot.slane %v7418_v56, 1  ;;  %v11679_v34 = vld [vmem:[%s15325_s8 + $0x2e4] ss:$8 sps:$4 sm:$0xff]   ;;  %v11710_v56 = vld [vmem:[%s15325_s8 + $0x390] ss:$8 sps:$4 sm:$0xff]  }
 0x547   : > { %v7421_v49 = vor.u32 %v7420_v21, %v7416_v32  ;;  %v11716_v32 = vld [vmem:[%s15325_s8 + $0x3b0] ss:$8 sps:$4 sm:$0xff]  }
 0x548   : > { %7294 = vmatpush1.bf16.msra.mxu1 %v11605_v38  ;;  %v11677_v38 = vld [vmem:[%s15325_s8 + $0x2e0] ss:$8 sps:$4 sm:$0xff]  }
 0x549   : > { %7295 = vmatprep.subr.bf16.mxu1 %v11610_v8  ;;  %v11682_v8 = vld [vmem:[%s15325_s8 + $0x2f4] ss:$8 sps:$4 sm:$0xff]  }
 0x54c   : > { %7296 = vmatpush1.bf16.msra.mxu1 %v11608_v54  ;;  %v11680_v54 = vld [vmem:[%s15325_s8 + $0x2f0] ss:$8 sps:$4 sm:$0xff]  }
 0x54d   : > { %7297 = vmatprep.subr.bf16.mxu1 %v11613_v29  ;;  %v11685_v29 = vld [vmem:[%s15325_s8 + $0x304] ss:$8 sps:$4 sm:$0xff]  }
 0x550   : > { %7298 = vmatpush1.bf16.msra.mxu1 %v11611_v4  ;;  %v11683_v4 = vld [vmem:[%s15325_s8 + $0x300] ss:$8 sps:$4 sm:$0xff]  }
 0x551   : > { %7299 = vmatprep.subr.bf16.mxu1 %v11616_v12  ;;  %v11688_v12 = vld [vmem:[%s15325_s8 + $0x314] ss:$8 sps:$4 sm:$0xff]  }
 0x554   : > { %7300 = vmatpush1.bf16.msra.mxu1 %v11614_v60  ;;  %v11686_v60 = vld [vmem:[%s15325_s8 + $0x310] ss:$8 sps:$4 sm:$0xff]  }
 0x555   : > { %7301 = vmatprep.subr.bf16.mxu1 %v11619_v37  ;;  %v11691_v37 = vld [vmem:[%s15325_s8 + $0x324] ss:$8 sps:$4 sm:$0xff]  }
 0x558   : > { %7302 = vmatpush1.bf16.msra.mxu1 %v11617_v9  ;;  %v11689_v9 = vld [vmem:[%s15325_s8 + $0x320] ss:$8 sps:$4 sm:$0xff]  }
 0x559   : > { %7303 = vmatprep.subr.bf16.mxu1 %v11622_v42  ;;  %v11694_v42 = vld [vmem:[%s15325_s8 + $0x334] ss:$8 sps:$4 sm:$0xff]  }
 0x55c   : > { %7304 = vmatpush1.bf16.msra.mxu1 %v11620_v7  ;;  %v11692_v7 = vld [vmem:[%s15325_s8 + $0x330] ss:$8 sps:$4 sm:$0xff]  }
 0x55d   : > { %7305 = vmatprep.subr.bf16.mxu1 %v11625_v1  ;;  %v11697_v1 = vld [vmem:[%s15325_s8 + $0x344] ss:$8 sps:$4 sm:$0xff]  }
 0x560   : > { %7306 = vmatpush1.bf16.msra.mxu1 %v11623_v0  ;;  %v11695_v0 = vld [vmem:[%s15325_s8 + $0x340] ss:$8 sps:$4 sm:$0xff]  }
 0x561   : > { %7307 = vmatprep.subr.bf16.mxu1 %v11628_v57  ;;  %v11700_v57 = vld [vmem:[%s15325_s8 + $0x354] ss:$8 sps:$4 sm:$0xff]  }
 0x564   : > { %7308 = vmatpush1.bf16.msra.mxu1 %v11626_v26  ;;  %v7411_v26 = vshll.u32 %v14722_v23, 16 }
 0x565   : > { %7309 = vmatprep.subr.bf16.mxu1 %v11631_v17  ;;  %v11698_v17 = vld [vmem:[%s15325_s8 + $0x350] ss:$8 sps:$4 sm:$0xff]  }
 0x568   : > { %7310 = vmatpush1.bf16.msra.mxu1 %v11629_v30  ;;  %v7413_v30 = vrot.slane %v7411_v26, 1  ;;  %v11754_v26 = vld [vmem:[%s15325_s8 + $0x474] ss:$8 sps:$4 sm:$0xff]  }
 0x569   : > { %7311 = vmatprep.subr.bf16.mxu1 %v11634_v61  ;;  %v11703_v61 = vld [vmem:[%s15325_s8 + $0x364] ss:$8 sps:$4 sm:$0xff]  }
 0x56c   : > { %7312 = vmatpush1.bf16.msra.mxu1 %v11632_v41  ;;  %v7409_v41 = vshrl.u32 %v14722_v23, 16 }
 0x56d   : > { %7313 = vmatprep.subr.bf16.mxu1 %v11637_v40  ;;  %v11701_v40 = vld [vmem:[%s15325_s8 + $0x360] ss:$8 sps:$4 sm:$0xff]  }
 0x570   : > { %7314 = vmatpush1.bf16.msra.mxu1 %v11635_v50  ;;  %v7414_v50 = vor.u32 %v7413_v30, %v7409_v41  ;;  %v11757_v30 = vld [vmem:[%s15325_s8 + $0x484] ss:$8 sps:$4 sm:$0xff]   ;;  %v11755_v41 = vld [vmem:[%s15325_s8 + $0x480] ss:$8 sps:$4 sm:$0xff]  }
 0x571   : > { %7315 = vmatprep.subr.bf16.mxu1 %v11640_v62  ;;  %v11706_v62 = vld [vmem:[%s15325_s8 + $0x374] ss:$8 sps:$4 sm:$0xff]  }
 0x574   : > { %7316 = vmatpush1.bf16.msra.mxu1 %v11638_v6  ;;  %v11704_v6 = vld [vmem:[%s15325_s8 + $0x370] ss:$8 sps:$4 sm:$0xff]  }
 0x575   : > { %7317 = vmatprep.subr.bf16.mxu1 %v11643_v20  ;;  %v11709_v20 = vld [vmem:[%s15325_s8 + $0x384] ss:$8 sps:$4 sm:$0xff]  }
 0x578   : > { %7318 = vmatpush1.bf16.msra.mxu1 %v11641_v45  ;;  %v7424_v45 = vshll.u32 %v14746_v52, 16 }
 0x579   : > { %7328 = vmatprep.subr.bf16.mxu1 %v11646_v53  ;;  %v7756_v53 = vshll.u32 %v14613_v28, 16 }
 0x57b   : > { %7320 = vmatmul.mubr.bf16.vlgmr.msra.gmra.mrb[64].mxu1 %v14722_v23 }
 0x57c   : > { %7329 = vmatpush1.bf16.msra.mxu1 %v11644_v5  ;;  %7360 = vmatprep.mubr.bf16.mxu1 %v15380_v39  ;;  %v7426_v5 = vrot.slane %v7424_v45, 1  ;;  %v11758_v45 = vld [vmem:[%s15325_s8 + $0x490] ss:$8 sps:$4 sm:$0xff]  }
 0x57d   : > { %7330 = vmatprep.subr.bf16.mxu1 %v11649_v24  ;;  %v11712_v24 = vld [vmem:[%s15325_s8 + $0x394] ss:$8 sps:$4 sm:$0xff]  }
 0x580   : > { %7331 = vmatpush1.bf16.msra.mxu1 %v11647_v44  ;;  %v7758_v44 = vrot.slane %v7756_v53, 1 }
 0x581   : > { %7332 = vmatprep.subr.bf16.mxu1 %v11652_v48  ;;  %v7422_v48 = vshrl.u32 %v14746_v52, 16 }
 0x584   : > { %7333 = vmatpush1.bf16.msra.mxu1 %v11650_v43  ;;  %v7754_v43 = vshrl.u32 %v14613_v28, 16  ;;  %v11718_v28 = vld [vmem:[%s15325_s8 + $0x3b4] ss:$8 sps:$4 sm:$0xff]  }
 0x585   : > { %7623 = vmatprep.subr.bf16.mxu1 %v11655_v11  ;;  %v7427_v11 = vor.u32 %v7426_v5, %v7422_v48  ;;  %v11763_v5 = vld [vmem:[%s15325_s8 + $0x4a4] ss:$8 sps:$4 sm:$0xff]   ;;  %v7762_v48 = vshll.u32 %v14615_v47, 16 }
 0x586   : > { %v7759_v21 = vor.u32 %v7758_v44, %v7754_v43  ;;  %v11766_v44 = vld [vmem:[%s15325_s8 + $0x4b4] ss:$8 sps:$4 sm:$0xff]  }
 0x587   : > { %9937 = vmatmul.mubr.msk.bf16.vlgmr.msra.gmra.mrb[64].mxu1 %vm7008_vm3, %v14746_v52  ;;  %v7764_v43 = vrot.slane %v7762_v48, 1  ;;  %v8391_v48 = vld [vmem:[%s15327_s10] sm:$0x3] }
 0x588   : > { %7624 = vmatpush1.bf16.msra.mxu1 %v11653_v25  ;;  %7655 = vmatprep.mubr.bf16.mxu1 %v7421_v49  ;;  %v11713_v25 = vld [vmem:[%s15325_s8 + $0x3a0] ss:$8 sps:$4 sm:$0xff]  }
 0x589   : > { %7625 = vmatprep.subr.bf16.mxu1 %v11658_v22  ;;  %v11721_v22 = vld [vmem:[%s15325_s8 + $0x3c4] ss:$8 sps:$4 sm:$0xff]   ;;  %v11719_v49 = vld [vmem:[%s15325_s8 + $0x3c0] ss:$8 sps:$4 sm:$0xff]  }
 0x58c   : > { %7626 = vmatpush1.bf16.msra.mxu1 %v11656_v63  ;;  %v11724_v63 = vld [vmem:[%s15325_s8 + $0x3d4] ss:$8 sps:$4 sm:$0xff]  }
 0x58d   : > { %7627 = vmatprep.subr.bf16.mxu1 %v11661_v27  ;;  %v11722_v27 = vld [vmem:[%s15325_s8 + $0x3d0] ss:$8 sps:$4 sm:$0xff]  }
 0x590   : > { %7628 = vmatpush1.bf16.msra.mxu1 %v11659_v13  ;;  %v11727_v13 = vld [vmem:[%s15325_s8 + $0x3e4] ss:$8 sps:$4 sm:$0xff]  }
 0x591   : > { %7629 = vmatprep.subr.bf16.mxu1 %v11664_v31  ;;  %v11725_v31 = vld [vmem:[%s15325_s8 + $0x3e0] ss:$8 sps:$4 sm:$0xff]  }
 0x594   : > { %7630 = vmatpush1.bf16.msra.mxu1 %v11662_v55  ;;  %v11730_v55 = vld [vmem:[%s15325_s8 + $0x3f4] ss:$8 sps:$4 sm:$0xff]  }
 0x595   : > { %7631 = vmatprep.subr.bf16.mxu1 %v11667_v10  ;;  %v11728_v10 = vld [vmem:[%s15325_s8 + $0x3f0] ss:$8 sps:$4 sm:$0xff]  }
 0x598   : > { %7632 = vmatpush1.bf16.msra.mxu1 %v11665_v51  ;;  %v11733_v51 = vld [vmem:[%s15325_s8 + $0x404] ss:$8 sps:$4 sm:$0xff]  }
 0x599   : > { %7633 = vmatprep.subr.bf16.mxu1 %v11670_v33  ;;  %v11824_v33 = vld [vmem:[%s15329_s12 + $0x40] sm:$0xff]  }
 0x59a   : > { %10430 = vmatprep.subr.bf16.mxu0 %v11824_v33  ;;  %v11790_v33 = vld [vmem:[%s15325_s8 + $0x534] ss:$8 sps:$4 sm:$0xff]  }
 0x59c   : > { %7634 = vmatpush1.bf16.msra.mxu1 %v11668_v3  ;;  %v11825_v3 = vld [vmem:[%s15329_s12] sm:$0xff]  }
 0x59d   : > { %7635 = vmatprep.subr.bf16.mxu1 %v11673_v59  ;;  %v11826_v59 = vld [vmem:[%s15329_s12 + $0x48] sm:$0xff]   ;;  %10431 = vmatpush3.bf16.msra.mxu0 %v11825_v3  ;;  %v11788_v3 = vld [vmem:[%s15325_s8 + $0x530] ss:$8 sps:$4 sm:$0xff]  }
 0x59e   : > { %10432 = vmatprep.subr.bf16.mxu0 %v11826_v59  ;;  %v11793_v59 = vld [vmem:[%s15325_s8 + $0x544] ss:$8 sps:$4 sm:$0xff]  }
 0x5a0   : > { %7636 = vmatpush1.bf16.msra.mxu1 %v11671_v18  ;;  %v11731_v18 = vld [vmem:[%s15325_s8 + $0x400] ss:$8 sps:$4 sm:$0xff]  }
 0x5a1   : > { %7637 = vmatprep.subr.bf16.mxu1 %v11676_v16  ;;  %v11736_v16 = vld [vmem:[%s15325_s8 + $0x414] ss:$8 sps:$4 sm:$0xff]  }
 0x5a4   : > { %7638 = vmatpush1.bf16.msra.mxu1 %v11674_v19  ;;  %v11827_v19 = vld [vmem:[%s15329_s12 + $0x8] sm:$0xff]  }
 0x5a5   : > { %7639 = vmatprep.subr.bf16.mxu1 %v11679_v34  ;;  %v11828_v34 = vld [vmem:[%s15329_s12 + $0x50] sm:$0xff]   ;;  %10433 = vmatpush3.bf16.msra.mxu0 %v11827_v19 }
 0x5a6   : > { %10434 = vmatprep.subr.bf16.mxu0 %v11828_v34  ;;  %v11794_v19 = vld [vmem:[%s15325_s8 + $0x550] ss:$8 sps:$4 sm:$0xff]   ;;  %v11799_v34 = vld [vmem:[%s15325_s8 + $0x564] ss:$8 sps:$4 sm:$0xff]  }
 0x5a8   : > { %7640 = vmatpush1.bf16.msra.mxu1 %v11677_v38  ;;  %v11734_v38 = vld [vmem:[%s15325_s8 + $0x410] ss:$8 sps:$4 sm:$0xff]  }
 0x5a9   : > { %7641 = vmatprep.subr.bf16.mxu1 %v11682_v8  ;;  %v11739_v8 = vld [vmem:[%s15325_s8 + $0x424] ss:$8 sps:$4 sm:$0xff]  }
 0x5ac   : > { %7642 = vmatpush1.bf16.msra.mxu1 %v11680_v54  ;;  %v11829_v54 = vld [vmem:[%s15329_s12 + $0x10] sm:$0xff]  }
 0x5ad   : > { %7643 = vmatprep.subr.bf16.mxu1 %v11685_v29  ;;  %v11830_v29 = vld [vmem:[%s15329_s12 + $0x58] sm:$0xff]   ;;  %10435 = vmatpush3.bf16.msra.mxu0 %v11829_v54 }
 0x5ae   : > { %10436 = vmatprep.subr.bf16.mxu0 %v11830_v29  ;;  %v11800_v54 = vld [vmem:[%s15325_s8 + $0x570] ss:$8 sps:$4 sm:$0xff]   ;;  %v11805_v29 = vld [vmem:[%s15325_s8 + $0x584] ss:$8 sps:$4 sm:$0xff]  }
 0x5b0   : > { %7644 = vmatpush1.bf16.msra.mxu1 %v11683_v4  ;;  %v11737_v4 = vld [vmem:[%s15325_s8 + $0x420] ss:$8 sps:$4 sm:$0xff]  }
 0x5b1   : > { %7645 = vmatprep.subr.bf16.mxu1 %v11688_v12  ;;  %v11742_v12 = vld [vmem:[%s15325_s8 + $0x434] ss:$8 sps:$4 sm:$0xff]  }
 0x5b4   : > { %7646 = vmatpush1.bf16.msra.mxu1 %v11686_v60  ;;  %v11831_v60 = vld [vmem:[%s15329_s12 + $0x18] sm:$0xff]  }
 0x5b5   : > { %7647 = vmatprep.subr.bf16.mxu1 %v11691_v37  ;;  %v11740_v37 = vld [vmem:[%s15325_s8 + $0x430] ss:$8 sps:$4 sm:$0xff]   ;;  %10437 = vmatpush3.bf16.msra.mxu0 %v11831_v60 }
 0x5b6   : > { %v11806_v60 = vld [vmem:[%s15325_s8 + $0x590] ss:$8 sps:$4 sm:$0xff]  }
 0x5b8   : > { %7648 = vmatpush1.bf16.msra.mxu1 %v11689_v9  ;;  %v11745_v9 = vld [vmem:[%s15325_s8 + $0x444] ss:$8 sps:$4 sm:$0xff]  }
 0x5b9   : > { %7649 = vmatprep.subr.bf16.mxu1 %v11694_v42  ;;  %v11743_v42 = vld [vmem:[%s15325_s8 + $0x440] ss:$8 sps:$4 sm:$0xff]  }
 0x5bc   : > { %7650 = vmatpush1.bf16.msra.mxu1 %v11692_v7  ;;  %v11748_v7 = vld [vmem:[%s15325_s8 + $0x454] ss:$8 sps:$4 sm:$0xff]  }
 0x5bd   : > { %7651 = vmatprep.subr.bf16.mxu1 %v11697_v1  ;;  %v11746_v1 = vld [vmem:[%s15325_s8 + $0x450] ss:$8 sps:$4 sm:$0xff]  }
 0x5c0   : > { %7652 = vmatpush1.bf16.msra.mxu1 %v11695_v0  ;;  %v11751_v0 = vld [vmem:[%s15325_s8 + $0x464] ss:$8 sps:$4 sm:$0xff]  }
 0x5c1   : > { %7653 = vmatprep.subr.bf16.mxu1 %v11700_v57  ;;  %v11749_v57 = vld [vmem:[%s15325_s8 + $0x460] ss:$8 sps:$4 sm:$0xff]  }
 0x5c4   : > { %7654 = vmatpush1.bf16.msra.mxu1 %v11698_v17  ;;  %v11752_v17 = vld [vmem:[%s15325_s8 + $0x470] ss:$8 sps:$4 sm:$0xff]  }
 0x5c5   : > { %7664 = vmatprep.subr.bf16.mxu1 %v11703_v61  ;;  %v7749_v61 = vshll.u32 %v14617_v35, 16 }
 0x5c7   : > { %7656 = vmatmul.mubr.bf16.vlgmr.msra.gmra.mrb[64].mxu1 %v7414_v50  ;;  %v11760_v50 = vld [vmem:[%s15325_s8 + $0x494] ss:$8 sps:$4 sm:$0xff]  }
 0x5c8   : > { %7665 = vmatpush1.bf16.msra.mxu1 %v11701_v40  ;;  %7696 = vmatprep.mubr.bf16.mxu1 %v15380_v39  ;;  %v7751_v40 = vrot.slane %v7749_v61, 1  ;;  %v8089_v61 = vrot.slane %v14746_v52, 1  ;;  %v11835_v52 = vld [vmem:[%s15329_s12 + $0x28] sm:$0xff]  }
 0x5c9   : > { %7666 = vmatprep.subr.bf16.mxu1 %v11706_v62 }
 0x5cc   : > { %7667 = vmatpush1.bf16.msra.mxu1 %v11704_v6  ;;  %v7747_v6 = vshrl.u32 %v14617_v35, 16  ;;  %v11761_v35 = vld [vmem:[%s15325_s8 + $0x4a0] ss:$8 sps:$4 sm:$0xff]  }
 0x5cd   : > { %7668 = vmatprep.subr.bf16.mxu1 %v11709_v20 }
 0x5d0   : > { %7669 = vmatpush1.bf16.msra.mxu1 %v11707_v58  ;;  %v7752_v58 = vor.u32 %v7751_v40, %v7747_v6  ;;  %v11834_v40 = vld [vmem:[%s15329_s12 + $0x68] sm:$0xff]   ;;  %v11837_v6 = vld [vmem:[%s15329_s12 + $0x30] sm:$0xff]  }
 0x5d1   : > { %7961 = vmatprep.subr.bf16.mxu1 %v11712_v24 }
 0x5d3   : > { %10014 = vmatmul.mubr.msk.bf16.vlgmr.msra.gmra.mrb[64].mxu1 %vm7008_vm3, %v7427_v11  ;;  %v11769_v11 = vld [vmem:[%s15325_s8 + $0x4c4] ss:$8 sps:$4 sm:$0xff]  }
 0x5d4   : > { %7962 = vmatpush1.bf16.msra.mxu1 %v11710_v56  ;;  %7993 = vmatprep.mubr.bf16.mxu1 %v7759_v21  ;;  %v11764_v56 = vld [vmem:[%s15325_s8 + $0x4b0] ss:$8 sps:$4 sm:$0xff]   ;;  %v11767_v21 = vld [vmem:[%s15325_s8 + $0x4c0] ss:$8 sps:$4 sm:$0xff]  }
 0x5d5   : > { %7963 = vmatprep.subr.bf16.mxu1 %v11715_v2  ;;  %v7760_v2 = vshrl.u32 %v14615_v47, 16  ;;  %v11770_v47 = vld [vmem:[%s15325_s8 + $0x4d0] ss:$8 sps:$4 sm:$0xff]  }
 0x5d8   : > { %7964 = vmatpush1.bf16.msra.mxu1 %v11713_v25  ;;  %v7765_v25 = vor.u32 %v7764_v43, %v7760_v2 }
 0x5d9   : > { %7965 = vmatprep.subr.bf16.mxu1 %v11718_v28  ;;  %v11772_v28 = vld [vmem:[%s15325_s8 + $0x4d4] ss:$8 sps:$4 sm:$0xff]  }
 0x5dc   : > { %7966 = vmatpush1.bf16.msra.mxu1 %v11716_v32  ;;  %v8088_v32 = vrot.slane %v14635_v46, 1  ;;  %v11778_v46 = vld [vmem:[%s15325_s8 + $0x4f4] ss:$8 sps:$4 sm:$0xff]  }
 0x5dd   : > { %7967 = vmatprep.subr.bf16.mxu1 %v11721_v22  ;;  %v11775_v22 = vld [vmem:[%s15325_s8 + $0x4e4] ss:$8 sps:$4 sm:$0xff]  }
 0x5e0   : > { %7968 = vmatpush1.bf16.msra.mxu1 %v11719_v49  ;;  %v11773_v49 = vld [vmem:[%s15325_s8 + $0x4e0] ss:$8 sps:$4 sm:$0xff]  }
 0x5e1   : > { %7969 = vmatprep.subr.bf16.mxu1 %v11724_v63  ;;  %v11776_v63 = vld [vmem:[%s15325_s8 + $0x4f0] ss:$8 sps:$4 sm:$0xff]  }
 0x5e4   : > { %7970 = vmatpush1.bf16.msra.mxu1 %v11722_v27  ;;  %v11781_v27 = vld [vmem:[%s15325_s8 + $0x504] ss:$8 sps:$4 sm:$0xff]  }
 0x5e5   : > { %7971 = vmatprep.subr.bf16.mxu1 %v11727_v13  ;;  %v11779_v13 = vld [vmem:[%s15325_s8 + $0x500] ss:$8 sps:$4 sm:$0xff]  }
 0x5e8   : > { %7972 = vmatpush1.bf16.msra.mxu1 %v11725_v31  ;;  %v11784_v31 = vld [vmem:[%s15325_s8 + $0x514] ss:$8 sps:$4 sm:$0xff]  }
 0x5e9   : > { %7973 = vmatprep.subr.bf16.mxu1 %v11730_v55  ;;  %v11782_v55 = vld [vmem:[%s15325_s8 + $0x510] ss:$8 sps:$4 sm:$0xff]  }
 0x5ec   : > { %7974 = vmatpush1.bf16.msra.mxu1 %v11728_v10  ;;  %v11787_v10 = vld [vmem:[%s15325_s8 + $0x524] ss:$8 sps:$4 sm:$0xff]  }
 0x5ed   : > { %7975 = vmatprep.subr.bf16.mxu1 %v11733_v51  ;;  %v11785_v51 = vld [vmem:[%s15325_s8 + $0x520] ss:$8 sps:$4 sm:$0xff]  }
 0x5f0   : > { %7976 = vmatpush1.bf16.msra.mxu1 %v11731_v18  ;;  %v11791_v18 = vld [vmem:[%s15325_s8 + $0x540] ss:$8 sps:$4 sm:$0xff]  }
 0x5f1   : > { %7977 = vmatprep.subr.bf16.mxu1 %v11736_v16  ;;  %v11796_v16 = vld [vmem:[%s15325_s8 + $0x554] ss:$8 sps:$4 sm:$0xff]  }
 0x5f4   : > { %7978 = vmatpush1.bf16.msra.mxu1 %v11734_v38  ;;  %v11797_v38 = vld [vmem:[%s15325_s8 + $0x560] ss:$8 sps:$4 sm:$0xff]  }
 0x5f5   : > { %7979 = vmatprep.subr.bf16.mxu1 %v11739_v8  ;;  %v11802_v8 = vld [vmem:[%s15325_s8 + $0x574] ss:$8 sps:$4 sm:$0xff]  }
 0x5f8   : > { %7980 = vmatpush1.bf16.msra.mxu1 %v11737_v4  ;;  %v11803_v4 = vld [vmem:[%s15325_s8 + $0x580] ss:$8 sps:$4 sm:$0xff]  }
 0x5f9   : > { %7981 = vmatprep.subr.bf16.mxu1 %v11742_v12  ;;  %v11808_v12 = vld [vmem:[%s15325_s8 + $0x594] ss:$8 sps:$4 sm:$0xff]  }
 0x5fc   : > { %7982 = vmatpush1.bf16.msra.mxu1 %v11740_v37  ;;  %v11811_v37 = vld [vmem:[%s15325_s8 + $0x5a4] ss:$8 sps:$4 sm:$0xff]  }
 0x5fd   : > { %7983 = vmatprep.subr.bf16.mxu1 %v11745_v9  ;;  %v11809_v9 = vld [vmem:[%s15325_s8 + $0x5a0] ss:$8 sps:$4 sm:$0xff]  }
 0x600   : > { %7984 = vmatpush1.bf16.msra.mxu1 %v11743_v42  ;;  %v11814_v42 = vld [vmem:[%s15325_s8 + $0x5b4] ss:$8 sps:$4 sm:$0xff]  }
 0x601   : > { %7985 = vmatprep.subr.bf16.mxu1 %v11748_v7  ;;  %v11812_v7 = vld [vmem:[%s15325_s8 + $0x5b0] ss:$8 sps:$4 sm:$0xff]  }
 0x604   : > { %7986 = vmatpush1.bf16.msra.mxu1 %v11746_v1  ;;  %v11817_v1 = vld [vmem:[%s15325_s8 + $0x5c4] ss:$8 sps:$4 sm:$0xff]  }
 0x605   : > { %7987 = vmatprep.subr.bf16.mxu1 %v11751_v0  ;;  %v11815_v0 = vld [vmem:[%s15325_s8 + $0x5c0] ss:$8 sps:$4 sm:$0xff]  }
 0x608   : > { %7988 = vmatpush1.bf16.msra.mxu1 %v11749_v57  ;;  %v8087_v57 = vrot.slane %v14722_v23, 1  ;;  %v11821_v23 = vld [vmem:[%s15325_s8 + $0x5e0] ss:$8 sps:$4 sm:$0xff]  }
 0x609   : > { %7989 = vmatprep.subr.bf16.mxu1 %v11754_v26  ;;  %v11820_v26 = vld [vmem:[%s15325_s8 + $0x5d4] ss:$8 sps:$4 sm:$0xff]  }
 0x60c   : > { %7990 = vmatpush1.bf16.msra.mxu1 %v11752_v17  ;;  %v11818_v17 = vld [vmem:[%s15325_s8 + $0x5d0] ss:$8 sps:$4 sm:$0xff]  }
 0x60d   : > { %7991 = vmatprep.subr.bf16.mxu1 %v11757_v30  ;;  %v11823_v30 = vld [vmem:[%s15325_s8 + $0x5e4] ss:$8 sps:$4 sm:$0xff]  }
 0x60f   : > { %v14990_v62 = vpop.f32.mrb[28].mxu0 }
 0x610   : > { %7992 = vmatpush1.bf16.msra.mxu1 %v11755_v41  ;;  %v14993_v20 = vpop.f32.mrb[29].mxu0  ;;  %v11833_v41 = vld [vmem:[%s15329_s12 + $0x20] sm:$0xff]  }
 0x611   : > { %v7050_v53 = vpop.f32.mrb[30].mxu0  ;;  %8002 = vmatprep.subr.bf16.mxu1 %v11760_v50  ;;  %v11836_v50 = vld [vmem:[%s15329_s12 + $0x70] sm:$0xff]  }
 0x612   : > { %v7051_v24 = vpop.f32.mrb[31].mxu0  ;;  %v11839_v53 = vld [vmem:[%s15329_s12 + $0x38] sm:$0xff]  }
 0x613   : > { %7994 = vmatmul.mubr.bf16.vlgmr.msra.gmra.mrb[64].mxu1 %v7752_v58  ;;  %v11840_v58 = vld [vmem:[%s15328_s11 + $0x40] sm:$0xff]  }
 0x614   : > { %8003 = vmatpush1.bf16.msra.mxu1 %v11758_v45  ;;  %8034 = vmatprep.mubr.bf16.mxu1 %v15380_v39  ;;  %v11838_v45 = vld [vmem:[%s15329_s12 + $0x78] sm:$0xff]   ;;  %v8377_v24 = vld [vmem:[%s15326_s9] sm:$0x3] }
 0x615   : > { %8004 = vmatprep.subr.bf16.mxu1 %v11763_v5  ;;  %v8382_v2 = vrot.slane %v8377_v24, %v12632_v36 }
 0x618   : > { %8005 = vmatpush1.bf16.msra.mxu1 %v11761_v35 }
 0x619   : > { %8006 = vmatprep.subr.bf16.mxu1 %v11766_v44 }
 0x61c   : > { %8007 = vmatpush1.bf16.msra.mxu1 %v11764_v56 }
 0x61d   : > { %8285 = vmatprep.subr.bf16.mxu1 %v11769_v11 }
 0x61f   : > { %10091 = vmatmul.mubr.msk.bf16.vlgmr.msra.gmra.mrb[64].mxu1 %vm7008_vm3, %v7765_v25 }
 0x620   : > { %8286 = vmatpush1.bf16.msra.mxu1 %v11767_v21  ;;  %8317 = vmatprep.mubr.bf16.mxu1 %v8088_v32 }
 0x621   : > { %8287 = vmatprep.subr.bf16.mxu1 %v11772_v28  ;;  %v8386_v28 = vrot.slane %v8377_v24, %v12644_v14  ;;  %v11864_v24 = vld [vmem:[%s15333_s16] sm:$0xff]  }
 0x624   : > { %8288 = vmatpush1.bf16.msra.mxu1 %v11770_v47  ;;  %v8396_v47 = vrot.slane %v8391_v48, %v12632_v36  ;;  %v11842_v36 = vld [vmem:[%s15328_s11 + $0x48] sm:$0xff]  }
 0x625   : > { %8289 = vmatprep.subr.bf16.mxu1 %v11775_v22 }
 0x628   : > { %8290 = vmatpush1.bf16.msra.mxu1 %v11773_v49 }
 0x629   : > { %8291 = vmatprep.subr.bf16.mxu1 %v11778_v46 }
 0x62c   : > { %8292 = vmatpush1.bf16.msra.mxu1 %v11776_v63 }
 0x62d   : > { %8293 = vmatprep.subr.bf16.mxu1 %v11781_v27 }
 0x630   : > { %8294 = vmatpush1.bf16.msra.mxu1 %v11779_v13 }
 0x631   : > { %8295 = vmatprep.subr.bf16.mxu1 %v11784_v31 }
 0x634   : > { %8296 = vmatpush1.bf16.msra.mxu1 %v11782_v55 }
 0x635   : > { %8297 = vmatprep.subr.bf16.mxu1 %v11787_v10 }
 0x638   : > { %8298 = vmatpush1.bf16.msra.mxu1 %v11785_v51  ;;  %v11841_v51 = vld [vmem:[%s15328_s11] sm:$0xff]  }
 0x639   : > { %8299 = vmatprep.subr.bf16.mxu1 %v11790_v33 }
 0x63c   : > { %8300 = vmatpush1.bf16.msra.mxu1 %v11788_v3  ;;  %v11844_v3 = vld [vmem:[%s15328_s11 + $0x50] sm:$0xff]  }
 0x63d   : > { %8301 = vmatprep.subr.bf16.mxu1 %v11793_v59  ;;  %v11845_v59 = vld [vmem:[%s15328_s11 + $0x10] sm:$0xff]  }
 0x640   : > { %8302 = vmatpush1.bf16.msra.mxu1 %v11791_v18  ;;  %v11846_v18 = vld [vmem:[%s15328_s11 + $0x58] sm:$0xff]  }
 0x641   : > { %8303 = vmatprep.subr.bf16.mxu1 %v11796_v16  ;;  %v11847_v16 = vld [vmem:[%s15328_s11 + $0x18] sm:$0xff]  }
 0x644   : > { %8304 = vmatpush1.bf16.msra.mxu1 %v11794_v19  ;;  %v11848_v19 = vld [vmem:[%s15328_s11 + $0x60] sm:$0xff]  }
 0x645   : > { %8305 = vmatprep.subr.bf16.mxu1 %v11799_v34  ;;  %v11849_v34 = vld [vmem:[%s15328_s11 + $0x20] sm:$0xff]  }
 0x648   : > { %8306 = vmatpush1.bf16.msra.mxu1 %v11797_v38  ;;  %v11850_v38 = vld [vmem:[%s15328_s11 + $0x68] sm:$0xff]  }
 0x649   : > { %8307 = vmatprep.subr.bf16.mxu1 %v11802_v8  ;;  %v11851_v8 = vld [vmem:[%s15328_s11 + $0x28] sm:$0xff]  }
 0x64c   : > { %8308 = vmatpush1.bf16.msra.mxu1 %v11800_v54  ;;  %v11852_v54 = vld [vmem:[%s15328_s11 + $0x70] sm:$0xff]  }
 0x64d   : > { %8309 = vmatprep.subr.bf16.mxu1 %v11805_v29  ;;  %v11853_v29 = vld [vmem:[%s15328_s11 + $0x30] sm:$0xff]  }
 0x650   : > { %8310 = vmatpush1.bf16.msra.mxu1 %v11803_v4  ;;  %v11854_v4 = vld [vmem:[%s15328_s11 + $0x78] sm:$0xff]  }
 0x651   : > { %8311 = vmatprep.subr.bf16.mxu1 %v11808_v12  ;;  %v11855_v12 = vld [vmem:[%s15328_s11 + $0x38] sm:$0xff]  }
 0x654   : > { %8312 = vmatpush1.bf16.msra.mxu1 %v11806_v60  ;;  %v11856_v60 = vld [vmem:[%s15331_s14] sm:$0xff]  }
 0x655   : > { %8313 = vmatprep.subr.bf16.mxu1 %v11811_v37  ;;  %v11857_v37 = vld [vmem:[%s15331_s14 + $0x8] sm:$0xff]  }
 0x658   : > { %8314 = vmatpush1.bf16.msra.mxu1 %v11809_v9  ;;  %v11858_v9 = vld [vmem:[%s15331_s14 + $0x10] sm:$0xff]  }
 0x659   : > { %8315 = vmatprep.subr.bf16.mxu1 %v11814_v42  ;;  %v11859_v42 = vld [vmem:[%s15331_s14 + $0x18] sm:$0xff]  }
 0x65c   : > { %8316 = vmatpush1.bf16.msra.mxu1 %v11812_v7  ;;  %v11860_v7 = vld [vmem:[%s15331_s14 + $0x20] sm:$0xff]  }
 0x65d   : > { %8326 = vmatprep.subr.bf16.mxu1 %v11817_v1  ;;  %v11861_v1 = vld [vmem:[%s15331_s14 + $0x28] sm:$0xff]  }
 0x65f   : > { %8318 = vmatmul.mubr.bf16.vlgmr.msra.gmra.mrb[64].mxu1 %v8087_v57  ;;  %v11863_v57 = vld [vmem:[%s15331_s14 + $0x38] sm:$0xff]  }
 0x660   : > { %8327 = vmatpush1.bf16.msra.mxu1 %v11815_v0  ;;  %8358 = vmatprep.mubr.bf16.mxu1 %v15380_v39  ;;  %v11832_v39 = vld [vmem:[%s15329_s12 + $0x60] sm:$0xff]   ;;  %v11862_v0 = vld [vmem:[%s15331_s14 + $0x30] sm:$0xff]  }
 0x661   : > { %8328 = vmatprep.subr.bf16.mxu1 %v11820_v26  ;;  %10438 = vmatprep.subr.bf16.mxu0 %v11832_v39 }
 0x662   : > { %10439 = vmatpush3.bf16.msra.mxu0 %v11833_v41 }
 0x663   : > { %10440 = vmatprep.subr.bf16.mxu0 %v11834_v40 }
 0x664   : > { %8329 = vmatpush1.bf16.msra.mxu1 %v11818_v17 }
 0x665   : > { %8330 = vmatprep.subr.bf16.mxu1 %v11823_v30 }
 0x666   : > { %10441 = vmatpush3.bf16.msra.mxu0 %v11835_v52 }
 0x667   : > { %10442 = vmatprep.subr.bf16.mxu0 %v11836_v50  ;;  %v8751_v50 = vld [vmem:[%s15330_s13] sm:$0x1] }
 0x668   : > { %8331 = vmatpush1.bf16.msra.mxu1 %v11821_v23 }
 0x66a   : > { %10443 = vmatpush3.bf16.msra.mxu0 %v11837_v6 }
 0x66b   : > { %10168 = vmatmul.mubr.msk.bf16.vlgmr.msra.gmra.mrb[64].mxu1 %vm7008_vm3, %v8089_v61  ;;  %10444 = vmatprep.subr.bf16.mxu0 %v11838_v45 }
 0x66e   : > { %10445 = vmatpush3.bf16.msra.mxu0 %v11839_v53 }
 0x66f   : > { %10452 = vmatprep.subr.bf16.mxu0 %v11840_v58 }
 0x73e   : > { %v8360_v5 = vpop.f32.mrb[64].mxu1 }
 0x73f   : > { %v10729_v35 = vadd.f32 %v8360_v5, %v14990_v62  ;;  %v8362_v44 = vpop.f32.mrb[65].mxu1  ;;  %v8400_v62 = vrot.slane %v8391_v48, %v12644_v14  ;;  %v11843_v14 = vld [vmem:[%s15328_s11 + $0x8] sm:$0xff]  }
 0x740   : > { %v10730_v56 = vadd.f32 %v8362_v44, %v14993_v20  ;;  %v8364_v43 = vpop.f32.mrb[66].mxu1  ;;  %v8771_v44 = vld [vmem:[%s15332_s15] sm:$0x1] }
 0x741   : > { %v8371_v11 = vrot.slane %v10729_v35, 1  ;;  %v8365_v21 = vpop.f32.mrb[67].mxu1 }
 0x742   : > { %v8372_v25 = vrot.slane %v10730_v56, 1 }
 0x743   : > { %v8375_v32 = vmax.f32 %v10729_v35, %v8371_v11  ;;  %v11865_v35 = vld [vmem:[%s15333_s16 + $0x8] sm:$0xff]  }
 0x744   : > { %v8376_v22 = vmax.f32 %v10730_v56, %v8372_v25 }
 0x745   : > { %v8389_v49 = vmul.f32 %v8382_v2, %v8375_v32 }
 0x746   : > { %v8390_v46 = vmul.f32 %v8386_v28, %v8376_v22  ;;  %v8866_v28 = vld [vmem:[%s15334_s17] sm:$0x1] }
 0x747   : > { %v8403_v63 = vadd.f32 %v8396_v47, %v8389_v49 }
 0x748   : > { %v8404_v27 = vadd.f32 %v8400_v62, %v8390_v46 }
 0x749   : > { %v8405_v13 = vmax.f32 %v8403_v63, 0.0 }
 0x74a   : > { %v8406_v20 = vmax.f32 %v8404_v27, 0.0 }
 0x74b   : > { %v8407_v31 = vpack.c.bf16 %v8405_v13, %v8405_v13 }
 0x74c   : > { %v8408_v55 = vpack.c.bf16 %v8406_v20, %v8406_v20 }
 0x74d   : > { %v8475_v33 = vrot.slane %v8407_v31, 1 }
 0x74e   : > { %v8476_v10 = vrot.slane %v8408_v55, 1 }
 0x750   : > { %8607 = vmatprep.mubr.bf16.mxu0 %v8476_v10 }
 0x751   : > { %8608 = vmatmul.mubr.bf16.vlgmr.msra.gmra.mrb[32].mxu0 %v8475_v33 }
 0x752   : > { %10453 = vmatpush3.bf16.msra.mxu0 %v11841_v51  ;;  %8743 = vmatprep.mubr.bf16.mxu0 %v8408_v55 }
 0x753   : > { %10454 = vmatprep.subr.bf16.mxu0 %v11842_v36 }
 0x756   : > { %10455 = vmatpush3.bf16.msra.mxu0 %v11843_v14 }
 0x757   : > { %10456 = vmatprep.subr.bf16.mxu0 %v11844_v3 }
 0x75a   : > { %10457 = vmatpush3.bf16.msra.mxu0 %v11845_v59 }
 0x75b   : > { %10458 = vmatprep.subr.bf16.mxu0 %v11846_v18 }
 0x75e   : > { %10459 = vmatpush3.bf16.msra.mxu0 %v11847_v16 }
 0x75f   : > { %10460 = vmatprep.subr.bf16.mxu0 %v11848_v19 }
 0x762   : > { %10461 = vmatpush3.bf16.msra.mxu0 %v11849_v34 }
 0x763   : > { %10462 = vmatprep.subr.bf16.mxu0 %v11850_v38 }
 0x766   : > { %10463 = vmatpush3.bf16.msra.mxu0 %v11851_v8 }
 0x767   : > { %10464 = vmatprep.subr.bf16.mxu0 %v11852_v54 }
 0x76a   : > { %10465 = vmatpush3.bf16.msra.mxu0 %v11853_v29 }
 0x76b   : > { %10466 = vmatprep.subr.bf16.mxu0 %v11854_v4 }
 0x76e   : > { %10467 = vmatpush3.bf16.msra.mxu0 %v11855_v12 }
 0x76f   : > { %10686 = vmatprep.subr.bf16.mxu0 %v12646_v15 }
 0x771   : > { %8744 = vmatmul.mubr.bf16.vlgmr.msra.gmra.mrb[36].mxu0 %v8407_v31 }
 0x772   : > { %10702 = vmatprep.mubr.msk.bf16.mxu0 %vm11934_vm2, %v12646_v15  ;;  %10687 = vmatpush3.bf16.msra.mxu0 %v11856_v60 }
 0x773   : > { %10688 = vmatprep.subr.bf16.mxu0 %v12646_v15 }
 0x776   : > { %10689 = vmatpush3.bf16.msra.mxu0 %v11857_v37 }
 0x777   : > { %10690 = vmatprep.subr.bf16.mxu0 %v12646_v15 }
 0x77a   : > { %10691 = vmatpush3.bf16.msra.mxu0 %v11858_v9 }
 0x77b   : > { %10692 = vmatprep.subr.bf16.mxu0 %v12646_v15 }
 0x77e   : > { %10693 = vmatpush3.bf16.msra.mxu0 %v11859_v42 }
 0x77f   : > { %10694 = vmatprep.subr.bf16.mxu0 %v12646_v15 }
 0x782   : > { %10695 = vmatpush3.bf16.msra.mxu0 %v11860_v7 }
 0x783   : > { %10696 = vmatprep.subr.bf16.mxu0 %v12646_v15 }
 0x786   : > { %10697 = vmatpush3.bf16.msra.mxu0 %v11861_v1 }
 0x787   : > { %10698 = vmatprep.subr.bf16.mxu0 %v12646_v15 }
 0x78a   : > { %10699 = vmatpush3.bf16.msra.mxu0 %v11862_v0 }
 0x78b   : > { %10700 = vmatprep.subr.bf16.mxu0 %v12646_v15 }
 0x78e   : > { %10701 = vmatpush3.bf16.msra.mxu0 %v11863_v57 }
 0x78f   : > { %10706 = vmatprep.subr.bf16.mxu0 %v12646_v15 }
 0x824   : > { %v10446_v26 = vpop.f32.mrb[32].mxu0 }
 0x825   : > { %v10447_v17 = vpop.f32.mrb[33].mxu0 }
 0x826   : > { %v10448_v30 = vadd.f32 %v10447_v17, %v10446_v26  ;;  %v10449_v23 = vpop.f32.mrb[34].mxu0 }
 0x827   : > { %v10450_v61 = vpop.f32.mrb[35].mxu0 }
 0x844   : > { %v10468_v39 = vpop.f32.mrb[36].mxu0 }
 0x845   : > { %v10469_v41 = vpop.f32.mrb[37].mxu0 }
 0x846   : > { %v10470_v40 = vadd.f32 %v10469_v41, %v10468_v39  ;;  %v10471_v52 = vpop.f32.mrb[38].mxu0 }
 0x847   : > { %v10472_v6 = vpop.f32.mrb[39].mxu0 }
 0x848   : > { %v8746_v45 = vadd.f32 %v10470_v40, %v10448_v30 }
 0x84a   : > { %v8752_v53 = vadd.f32 %v8751_v50, %v8746_v45 }
 0x84c   : > { %v8753_v58 = vmax.f32 %v8752_v53, 0.0 }
 0x84e   : > { %v8754_v5 = vpack.c.bf16 %v8753_v58, %v8753_v58 }
 0x850   : > { %10703 = vmatmul.mubr.bf16.vlgmr.msra.gmra.mrb[40].mxu0 %v8754_v5 }
 0x851   : > { %10710 = vmatprep.mubr.msk.bf16.mxu0 %vm11934_vm2, %v12646_v15  ;;  %10707 = vmatpush3.bf16.msra.mxu0 %v11864_v24  ;;  %vm8879_vm2 = vcmask 261120  }
 0x852   : > { %10708 = vmatprep.subr.bf16.mxu0 %v12646_v15 }
 0x855   : > { %10709 = vmatpush3.bf16.msra.mxu0 %v11865_v35 }
 0x923   : > { %v8854_v48 = vpop.f32.mrb[40].mxu0 }
 0x924   : > { %v8855_v56 = vadd.f32 %v8854_v48, %v8771_v44  ;;  %v10704_v43 = vpop.f32.mrb[41].mxu0 }
 0x925   : > { %v8857_v11 = vpop.f32.mrb[42].mxu0 }
 0x926   : > { %v8860_v2 = vmax.f32 %v8855_v56, 0.0  ;;  %v10705_v21 = vpop.f32.mrb[43].mxu0 }
 0x928   : > { %v8861_v25 = vpack.c.bf16 %v8860_v2, %v8860_v2 }
 0x92a   : > { %10711 = vmatmul.mubr.msk.bf16.vlgmr.msra.gmra.mrb[44].mxu0 %vm8879_vm2, %v8861_v25 }
 0x9fd   : > { %v8917_v15 = vpop.f32.mrb[44].mxu0 }
 0x9fe   : > { %v8918_v32 = vadd.f32 %v8917_v15, %v8866_v28  ;;  %v10712_v47 = vpop.f32.mrb[45].mxu0 }
 0x9ff   : > { %v8920_v22 = vpop.f32.mrb[46].mxu0 }
 0xa00   : > { %v10713_v62 = vpop.f32.mrb[47].mxu0  ;;  %8924 = vst.msk [vmem:[%s582_s23] sm:$0x1] %vm8923_vm4, %v8918_v32 }
 0xa01   : > { %11881 = shalt.err (!%p11878_p3)
}
 0xa02   : > { %s11882_s29 = scalar_lea.hbm %s15275_s27, 16  ;;  %s11886_s1 = scalar_lea.hbm %s15335_s18, 32 }
 0xa03   : > { %p11883_p4 = scmp.ne.s32.totalorder %s15275_s27, %s11882_s29  ;;  %p11887_p9 = scmp.lt.u32.totalorder %s15275_s27, %s15335_s18 }
 0xa04   : > { %p11888_p10 = scmp.lt.u32.totalorder %s11886_s1, %s11882_s29  ;;  %p11890_p12 = scmp.lt.u32.totalorder %s11882_s29, %s15275_s27 }
 0xa05   : > { %p11884_p7 = pnand %p11883_p4, %p12073_p5 }
 0xa06   : > { %p11889_p11 = por %p11888_p10, %p11887_p9 }
 0xa07   : > { %p11885_p8 = pneg %p11884_p7 }
 0xa08   : > { %p11891_p13 = por %p11890_p12, %p11889_p11 }
 0xa0a   : > { %p11892_p0 = pnand %p11891_p13, %p11885_p8 }
 0xa0c   : > { %11895 = shalt.err (!%p11892_p0)
}
 0xa0d   : > { %11018 = dma.vmem_to_hbm [thread:$0]  (%p12073_p5), %s15277_s20, 16, %s15275_s27, %s8926_s0  }
 0xa0e PF: > { %s15384_s21 = sld [smem:[#allocation9_spill]]  ;;  %p11024_p1 = scmp.ge.s32.totalorder %s11930_s30, 2 }
 0xa10   : > { %p11021_p2 = pnand %p11024_p1, %p12077_p6 }
 0xa14   : > { %s8950_s3 = sand.u32 1, %s15384_s21  }
 0xa15   : > { %s8951_s19 = scalar_lea.sflag [#allocation7], %s8950_s3 }
 0xa16   : > { %11913 = dma.done.wait (!%p11021_p2), %s8951_s19, 16  }
 0xa17   : > { %11915 = vsyncadd (!%p11021_p2), %s8951_s19, 4294967280  ;;  %s15386_s30 = sld [smem:[#allocation11_spill]]  ;;  %s15387_s29 = sld [smem:[#allocation10_spill]] }
 0xa18   : > { %s15388_s23 = sld [smem:[#allocation12_spill]]  ;;  %s15389_s27 = smov %s11922_s28 }
 0xa1d   : > { %p28_p3 = scmp.ge.s32.totalorder %s15386_s30, 4   ;;  %s15390_s28 = smov %s15387_s29 }
 0xa1e   : > { %s15391_s29 = smov %s15388_s23 }
 0xa1f   :  { %30 = sbr.rel (!%p28_p3) target bundleno = 8 (0x8), region = 188 }
 0xa26   :  { %8955 = vsyncpa [#allocation7], 1 }
 0xa27   :  { %8957 = vsyncpa [#allocation7 + $0x1], 1 }

</bundles_post_ra>
